<compile_context>
chip_gen: v7x
topology: tpu7x:2x2x1
jax: 0.10.0
libtpu: 0.0.40
codegen_flags: <defaults>
</compile_context>

<pallas_src>
import jax
import jax.numpy as jnp
from jax import lax
from jax.experimental import pallas as pl
from jax.experimental.pallas import tpu as pltpu


def _cdiv(a, b):
    return (a + b - 1) // b


def _round_up(a, b):
    return _cdiv(a, b) * b


def _softplus(x):
    # Numerically stable softplus, matches torch.nn.Softplus (beta=1); torch's
    # threshold=20 linear shortcut differs by less than f32 rounding.  Written
    # with exp/log (not log1p) so it lowers to plain EUP pushes.
    return jnp.maximum(x, 0.0) + jnp.log(1.0 + jnp.exp(-jnp.abs(x)))


def resblock_kernel(x_ref, w1_ref, b1_ref, w2_ref, b2_ref, o_ref):
    """One (tm, 128) row tile: out = softplus(softplus(x@W1+b1)@W2+b2 + x)."""
    # Linear1 + Softplus.  (tm,128)@(128,128) is MXU-native, lane-dense.
    h = jnp.dot(x_ref[...], w1_ref[...],
                preferred_element_type=jnp.float32) + b1_ref[...]
    h = _softplus(h)
    # Linear2.
    r = jnp.dot(h, w2_ref[...],
                preferred_element_type=jnp.float32) + b2_ref[...]
    # post_act(residual + x): re-read x here (shorter live range across the
    # two matmuls -> less vreg/VMEM pressure at large tiles).
    o_ref[...] = _softplus(r + x_ref[...]).astype(o_ref.dtype)


def resblock_forward(x, w1, b1, w2, b2, *, block_rows=4096):
    """ResBlock forward.

    x  : (N, F) float32
    w1, w2 : (F, F) PyTorch (out, in) layout
    b1, b2 : (F,)
    """
    N, F = x.shape
    assert w1.shape == (F, F) and w2.shape == (F, F)
    assert b1.shape == (F,) and b2.shape == (F,)

    # Lane packing factor: p consecutive batch rows share one 128-wide lane row.
    if F <= 128:
        if 128 % F != 0:
            # TODO(synk): general F needs an in-kernel transpose (pltpu.einshape) path.
            raise NotImplementedError("in_features must divide 128 or be a multiple of 128")
        p = 128 // F
    else:
        if F % 128 != 0:
            # TODO(synk): general F needs an in-kernel transpose (pltpu.einshape) path.
            raise NotImplementedError("in_features must divide 128 or be a multiple of 128")
        p = 1
    L = p * F  # lane width of the packed layout (multiple of 128)

    # Zero-copy (N, F) -> (N/p, L) reinterpretation.  Only a ragged N % p needs
    # a tiny pad; ragged row *tiles* are handled by Pallas edge masking.
    n_pad = _round_up(N, p)
    x_in = x if n_pad == N else jnp.pad(x, ((0, n_pad - N), (0, 0)))
    x_packed = x_in.reshape(n_pad // p, L)
    M = x_packed.shape[0]

    # Block-diagonal weights: p copies of W^T on the diagonal, so
    #   (x_packed @ W_bd)[m, j*F:(j+1)*F] == x[p*m + j] @ W^T.
    # Built once per call (64 KiB each at F=32).
    eye_p = jnp.eye(p, dtype=w1.dtype)
    w1_bd = jnp.kron(eye_p, w1.T)                       # (L, L)
    w2_bd = jnp.kron(eye_p, w2.T)                       # (L, L)
    b1_t = jnp.tile(b1, p).reshape(1, L)
    b2_t = jnp.tile(b2, p).reshape(1, L)

    # Row tile: target ~2 MiB f32 input tile (amortizes per-step overhead),
    # capped at <= 4 MiB for large F, capped at ceil(M/2) so both v7x
    # TensorCores get work on mid-sized batches, sublane-aligned to 8.
    tm = min(int(block_rows), max(8, (4 * 1024 * 1024) // (L * 4)))
    tm = min(tm, max(1, _cdiv(M, 2)))
    tm = max(8, _round_up(tm, 8))
    tm = min(tm, _round_up(M, 8))
    n_steps = _cdiv(M, tm)

    out_packed = pl.pallas_call(
        resblock_kernel,
        out_shape=jax.ShapeDtypeStruct((M, L), x.dtype),
        grid_spec=pltpu.PrefetchScalarGridSpec(
            num_scalar_prefetch=0,
            grid=(n_steps,),
            in_specs=[
                # x tile: (tm, L), lane-dense, contiguous in HBM.
                pl.BlockSpec((tm, L), lambda i: (i, 0)),
                # Weights / biases: constant block index -> fetched once, resident.
                pl.BlockSpec((L, L), lambda i: (0, 0)),   # W1 block-diagonal
                pl.BlockSpec((1, L), lambda i: (0, 0)),   # b1 tiled
                pl.BlockSpec((L, L), lambda i: (0, 0)),   # W2 block-diagonal
                pl.BlockSpec((1, L), lambda i: (0, 0)),   # b2 tiled
            ],
            out_specs=pl.BlockSpec((tm, L), lambda i: (i, 0)),
        ),
        compiler_params=pltpu.CompilerParams(
            # Independent batch-row tiles -> megacore-shardable on v7x.
            dimension_semantics=("parallel",),
            # Actual footprint is ~<16 MiB at tm=4096; 32 MiB leaves headroom
            # and respects v7x's 64 MiB physical VMEM per core.
            vmem_limit_bytes=32 * 1024 * 1024,
        ),
    )(x_packed, w1_bd, b1_t, w2_bd, b2_t)

    out = out_packed.reshape(n_pad, F)                   # zero-copy
    return out if n_pad == N else out[:N]


def resblock_reference(x, w1, b1, w2, b2):
    # High-precision pure-JAX reference (HIGHEST keeps the f32 matmuls exact).
    hp = lax.Precision.HIGHEST
    h = jax.nn.softplus(jnp.matmul(x, w1.T, precision=hp) + b1)
    r = jnp.matmul(h, w2.T, precision=hp) + b2
    return jax.nn.softplus(r + x)


if __name__ == "__main__":
    key = jax.random.PRNGKey(0)
    F = 32  # in_features of the ResBlock
    kx1, kx2, k1, kb1, k2, kb2 = jax.random.split(key, 6)

    # PyTorch-like init: U(-1/sqrt(F), 1/sqrt(F)).
    bound = 1.0 / (F ** 0.5)
    w1 = jax.random.uniform(k1, (F, F), minval=-bound, maxval=bound, dtype=jnp.float32)
    b1 = jax.random.uniform(kb1, (F,), minval=-bound, maxval=bound, dtype=jnp.float32)
    w2 = jax.random.uniform(k2, (F, F), minval=-bound, maxval=bound, dtype=jnp.float32)
    b2 = jax.random.uniform(kb2, (F,), minval=-bound, maxval=bound, dtype=jnp.float32)

    # Tolerance: the f32 matmul may take a single bf16 MXU pass under DEFAULT
    # precision on one side (kernel or XLA reference); structural/layout bugs
    # give O(0.1-1) errors, so 2e-2 still validates packing and semantics.
    tol = dict(atol=2e-2, rtol=2e-2)

    # Case 1: N multiple of 4*8 -> fully zero-copy packing, 2 parallel grid steps.
    N1 = 4096
    x1 = jax.random.normal(kx1, (N1, F), dtype=jnp.float32)
    out1 = jax.block_until_ready(resblock_forward(x1, w1, b1, w2, b2))
    ref1 = resblock_reference(x1, w1, b1, w2, b2)
    assert out1.shape == (N1, F)
    assert bool(jnp.allclose(out1, ref1, **tol)), "mismatch vs reference (case 1)"

    # Case 2: ragged N (not a multiple of 4) -> tiny pad for the reshape plus a
    # Pallas-masked ragged last row-block and a multi-step grid.
    N2 = 613
    x2 = jax.random.normal(kx2, (N2, F), dtype=jnp.float32)
    out2 = jax.block_until_ready(resblock_forward(x2, w1, b1, w2, b2, block_rows=64))
    ref2 = resblock_reference(x2, w1, b1, w2, b2)
    assert out2.shape == (N2, F)
    assert bool(jnp.allclose(out2, ref2, **tol)), "mismatch vs reference (case 2)"

    print("KERNEL_OK")
</pallas_src>

<mosaic_0001>
module attributes {stable_mosaic.version = 11 : i64} {
  func.func @resblock_kernel(%arg0: i32, %arg1: memref<512x128xf32, #tpu.memory_space<vmem>>, %arg2: memref<128x128xf32, #tpu.memory_space<vmem>>, %arg3: memref<1x128xf32, #tpu.memory_space<vmem>>, %arg4: memref<128x128xf32, #tpu.memory_space<vmem>>, %arg5: memref<1x128xf32, #tpu.memory_space<vmem>>, %arg6: memref<512x128xf32, #tpu.memory_space<vmem>>) attributes {dimension_semantics = [#tpu.dimension_semantics<parallel>], iteration_bounds = array<i64: 2>, scalar_prefetch = 0 : i64, scratch_operands = 0 : i64, tpu.core_type = #tpu.core_type<tc>, window_params = [{transform_indices = @transform_0, window_bounds = array<i64: 512, 128>}, {pipeline_mode = #tpu.pipeline_mode<synchronous>, transform_indices = @transform_1, window_bounds = array<i64: 128, 128>}, {pipeline_mode = #tpu.pipeline_mode<synchronous>, transform_indices = @transform_2, window_bounds = array<i64: 1, 128>}, {pipeline_mode = #tpu.pipeline_mode<synchronous>, transform_indices = @transform_3, window_bounds = array<i64: 128, 128>}, {pipeline_mode = #tpu.pipeline_mode<synchronous>, transform_indices = @transform_4, window_bounds = array<i64: 1, 128>}, {transform_indices = @transform_5, window_bounds = array<i64: 512, 128>}]} {
    %c0 = arith.constant 0 : index
    %c0_0 = arith.constant 0 : index
    %0 = vector.load %arg1[%c0, %c0_0] : memref<512x128xf32, #tpu.memory_space<vmem>>, vector<512x128xf32>
    %c0_1 = arith.constant 0 : index
    %c0_2 = arith.constant 0 : index
    %1 = vector.load %arg2[%c0_1, %c0_2] : memref<128x128xf32, #tpu.memory_space<vmem>>, vector<128x128xf32>
    %cst = arith.constant dense<0.000000e+00> : vector<512x128xf32>
    %2 = tpu.matmul %0, %1, %cst {dimension_numbers = #tpu.dot_dimension_numbers<[1], [0], [0], [1], [0, 0, 1, 1], [], []>} : vector<512x128xf32>, vector<128x128xf32>, vector<512x128xf32> -> vector<512x128xf32>
    %c0_3 = arith.constant 0 : index
    %c0_4 = arith.constant 0 : index
    %3 = vector.load %arg3[%c0_3, %c0_4] : memref<1x128xf32, #tpu.memory_space<vmem>>, vector<1x128xf32>
    %4 = vector.broadcast %3 : vector<1x128xf32> to vector<512x128xf32>
    %5 = arith.addf %2, %4 : vector<512x128xf32>
    %cst_5 = arith.constant 0.000000e+00 : f32
    %6 = vector.broadcast %cst_5 : f32 to vector<512x128xf32>
    %7 = arith.maximumf %5, %6 : vector<512x128xf32>
    %8 = math.absf %5 : vector<512x128xf32>
    %cst_6 = arith.constant 0.000000e+00 : f32
    %9 = vector.broadcast %cst_6 : f32 to vector<512x128xf32>
    %10 = arith.subf %9, %8 : vector<512x128xf32>
    %11 = math.exp %10 : vector<512x128xf32>
    %cst_7 = arith.constant 1.000000e+00 : f32
    %12 = vector.broadcast %cst_7 : f32 to vector<512x128xf32>
    %13 = arith.addf %12, %11 : vector<512x128xf32>
    %14 = math.log %13 : vector<512x128xf32>
    %15 = arith.addf %7, %14 : vector<512x128xf32>
    %c0_8 = arith.constant 0 : index
    %c0_9 = arith.constant 0 : index
    %16 = vector.load %arg4[%c0_8, %c0_9] : memref<128x128xf32, #tpu.memory_space<vmem>>, vector<128x128xf32>
    %cst_10 = arith.constant dense<0.000000e+00> : vector<512x128xf32>
    %17 = tpu.matmul %15, %16, %cst_10 {dimension_numbers = #tpu.dot_dimension_numbers<[1], [0], [0], [1], [0, 0, 1, 1], [], []>} : vector<512x128xf32>, vector<128x128xf32>, vector<512x128xf32> -> vector<512x128xf32>
    %c0_11 = arith.constant 0 : index
    %c0_12 = arith.constant 0 : index
    %18 = vector.load %arg5[%c0_11, %c0_12] : memref<1x128xf32, #tpu.memory_space<vmem>>, vector<1x128xf32>
    %19 = vector.broadcast %18 : vector<1x128xf32> to vector<512x128xf32>
    %20 = arith.addf %17, %19 : vector<512x128xf32>
    %c0_13 = arith.constant 0 : index
    %c0_14 = arith.constant 0 : index
    %21 = vector.load %arg1[%c0_13, %c0_14] : memref<512x128xf32, #tpu.memory_space<vmem>>, vector<512x128xf32>
    %22 = arith.addf %20, %21 : vector<512x128xf32>
    %cst_15 = arith.constant 0.000000e+00 : f32
    %23 = vector.broadcast %cst_15 : f32 to vector<512x128xf32>
    %24 = arith.maximumf %22, %23 : vector<512x128xf32>
    %25 = math.absf %22 : vector<512x128xf32>
    %cst_16 = arith.constant 0.000000e+00 : f32
    %26 = vector.broadcast %cst_16 : f32 to vector<512x128xf32>
    %27 = arith.subf %26, %25 : vector<512x128xf32>
    %28 = math.exp %27 : vector<512x128xf32>
    %cst_17 = arith.constant 1.000000e+00 : f32
    %29 = vector.broadcast %cst_17 : f32 to vector<512x128xf32>
    %30 = arith.addf %29, %28 : vector<512x128xf32>
    %31 = math.log %30 : vector<512x128xf32>
    %32 = arith.addf %24, %31 : vector<512x128xf32>
    %c0_18 = arith.constant 0 : index
    %c0_19 = arith.constant 0 : index
    %33 = vector.load %arg6[%c0_18, %c0_19] : memref<512x128xf32, #tpu.memory_space<vmem>>, vector<512x128xf32>
    tpu.vector_store %arg6[%c0_18, %c0_19], %32 {strides = array<i32>} : memref<512x128xf32, #tpu.memory_space<vmem>>, vector<512x128xf32>,
    return
  }
  func.func @transform_0(%arg0: i32) -> (i32, i32) {
    %c0_i32 = arith.constant 0 : i32
    %c0_i32_0 = arith.constant 0 : i32
    return %arg0, %c0_i32 : i32, i32
  }
  func.func @transform_1(%arg0: i32) -> (i32, i32) {
    %c0_i32 = arith.constant 0 : i32
    %c0_i32_0 = arith.constant 0 : i32
    %c0_i32_1 = arith.constant 0 : i32
    return %c0_i32, %c0_i32_0 : i32, i32
  }
  func.func @transform_2(%arg0: i32) -> (i32, i32) {
    %c0_i32 = arith.constant 0 : i32
    %c0_i32_0 = arith.constant 0 : i32
    %c0_i32_1 = arith.constant 0 : i32
    return %c0_i32, %c0_i32_0 : i32, i32
  }
  func.func @transform_3(%arg0: i32) -> (i32, i32) {
    %c0_i32 = arith.constant 0 : i32
    %c0_i32_0 = arith.constant 0 : i32
    %c0_i32_1 = arith.constant 0 : i32
    return %c0_i32, %c0_i32_0 : i32, i32
  }
  func.func @transform_4(%arg0: i32) -> (i32, i32) {
    %c0_i32 = arith.constant 0 : i32
    %c0_i32_0 = arith.constant 0 : i32
    %c0_i32_1 = arith.constant 0 : i32
    return %c0_i32, %c0_i32_0 : i32, i32
  }
  func.func @transform_5(%arg0: i32) -> (i32, i32) {
    %c0_i32 = arith.constant 0 : i32
    %c0_i32_0 = arith.constant 0 : i32
    return %arg0, %c0_i32 : i32, i32
  }
}

</mosaic_0001>

<bundles_post_ra>
// kernel: tpu_custom_call.1
= control target key start
LH: loop header
LB: loop body
LE: loop exit
PB: predicated region body
PF: predicated region fallthrough
CT: control target
= control target key end

     0   :  { %10 = vsyncpa [#allocation3], 0  ;;  %s5287_s0 = inlined_call_operand.hbm [shape: f32[1024,128], index: 0, kind: input, shape index: {}]   ;;  %s5288_s1 = inlined_call_operand.hbm [shape: f32[128,128], index: 1, kind: input, shape index: {}]   ;;  %s5289_s2 = inlined_call_operand.vmem [shape: f32[1,128], index: 2, kind: input, shape index: {}]   ;;  %s5290_s3 = inlined_call_operand.hbm [shape: f32[128,128], index: 3, kind: input, shape index: {}]   ;;  %s5291_s4 = inlined_call_operand.vmem [shape: f32[1,128], index: 4, kind: input, shape index: {}]   ;;  %s5292_s5 = inlined_call_operand.hbm [shape: f32[1024,128], index: 5, kind: output, shape index: {}]  }
   0x1   :  { %12 = vsyncpa [#allocation3 + $0x1], 0 }
   0x2   :  { %13 = vsyncpa [#allocation6], 0 }
   0x3   :  { %14 = vsyncpa [#allocation4], 0 }
   0x4   :  { %16 = vsyncpa [#allocation4 + $0x1], 0  ;;  %s3887_s18 = smov 0   ;;  %s3889_s19 = smov 0  }
   0x5   :  { %s3891_s20 = smov 0   ;;  %s3893_s21 = smov 0  }
   0x6 LB: > { %s3908_s22 = sadd.s32 4294967295, %s3847_s21   ;;  %s2540_s23 = sadd.s32 4294967294, %s3847_s21   ;;  %s3847_s21 = sphi %s3893_s21, %s5319_s21   ;;  %s3843_s20 = sphi %s3891_s20, %s5318_s20   ;;  %s3839_s19 = sphi %s3889_s19, %s5317_s19   ;;  %s3835_s18 = sphi %s3887_s18, %s5316_s18  }
   0x7   : > { %p42_p0 = scmp.ne.s32.totalorder %s3839_s19, %s3835_s18  ;;  %p5293_p1 = scmp.eq.s32.totalorder %s3908_s22, 0 }
   0x8   : > { %p156_p3 = scmp.eq.s32.totalorder %s2540_s23, 1  ;;  %p2541_p5 = scmp.ge.s32.totalorder %s3847_s21, 1 }
   0x9   : > { %p3917_p4 = por %p5293_p1, %p42_p0  ;;  %p163_p7 = scmp.lt.s32.totalorder %s3847_s21, 3 }
   0xa   : > { %p3922_p6 = por %p156_p3, %p42_p0  ;;  %s3849_s27 = smov [#allocation5]  }
   0xb   : > { %s5296_s24 = scalar_select %p3917_p4, 1, 0 }
   0xc   : > { %s5297_s25 = scalar_select %p3922_p6, 1, 0 }
   0xd   : > { %p3927_p8 = pnand %p2541_p5, %p163_p7  ;;  %s175_s28 = sshll.u32 %s3849_s27, 4  ;;  %s3931_s28 = int_to_ptr.vmem [resolvable:$true] %s175_s28 }
   0xe   : > { %s3850_s30 = smov [#allocation7]   ;;  %s3691_s9 = scalar_lea.hbm %s5288_s1, 2048 }
   0xf   : > { %p3054_p9 = pneg %p3927_p8  ;;  %s191_s6 = sshll.u32 %s3850_s30, 4  ;;  %s3942_s6 = int_to_ptr.vmem [resolvable:$true] %s191_s6 }
  0x10   : > { %p3692_p12 = scmp.ne.s32.totalorder %s5288_s1, %s3691_s9  ;;  %p3698_p5 = scmp.lt.u32.totalorder %s3691_s9, %s5288_s1 }
  0x11   : > { %p3938_p11 = pnand %p3054_p9, %p5293_p1 }
  0x13   : > { %p3693_p13 = pneg %p3938_p11 }
  0x15   : > { %p3694_p0 = pnand %p3693_p13, %p3692_p12 }
  0x17   : > { %p3695_p3 = pneg %p3694_p0 }
  0x19   : > { %p3700_p7 = pnand %p3698_p5, %p3695_p3 }
  0x1b   : > { %3703 = shalt.err (!%p3700_p7)
}
  0x1c   : > { %s3704_s14 = scalar_lea.vmem %s3931_s28, 2048  ;;  %p3712_p2 = scmp.lt.s32.totalorder %s3931_s28, %s3931_s28 }
  0x1d   : > { %p3705_p9 = scmp.ne.s32.totalorder %s3931_s28, %s3704_s14  ;;  %p3713_p12 = scmp.lt.s32.totalorder %s3704_s14, %s3704_s14 }
  0x1f   : > { %p3707_p10 = pnand %p3705_p9, %p3693_p13  ;;  %p3714_p0 = por %p3713_p12, %p3712_p2 }
  0x21   : > { %p3708_p1 = pneg %p3707_p10 }
  0x23   : > { %p3715_p6 = pnand %p3714_p0, %p3708_p1 }
  0x25   : > { %3718 = shalt.err (!%p3715_p6)
}
  0x26   : > { %s3851_s15 = smov 128   ;;  %s3852_s16 = smov 8  }
  0x27   : > { %3057 = dma.hbm_to_vmem [thread:$0]  (!%p3938_p11), %s5288_s1, 2048, %s3931_s28, [#allocation6], %s3851_s15, %s3851_s15, %s3852_s16  }
  0x28   : > { %s3719_s7 = scalar_lea.hbm %s5290_s3, 2048 }
  0x29   : > { %p3720_p1 = scmp.ne.s32.totalorder %s5290_s3, %s3719_s7  ;;  %p3726_p10 = scmp.lt.u32.totalorder %s3719_s7, %s5290_s3 }
  0x2b   : > { %p3722_p2 = pnand %p3720_p1, %p3693_p13 }
  0x2d   : > { %p3723_p6 = pneg %p3722_p2 }
  0x2f   : > { %p3728_p3 = pnand %p3726_p10, %p3723_p6 }
  0x31   : > { %3731 = shalt.err (!%p3728_p3)
}
  0x32   : > { %s3732_s28 = scalar_lea.vmem %s3942_s6, 2048  ;;  %p3740_p12 = scmp.lt.s32.totalorder %s3942_s6, %s3942_s6 }
  0x33   : > { %p3733_p5 = scmp.ne.s32.totalorder %s3942_s6, %s3732_s28  ;;  %p3741_p0 = scmp.lt.s32.totalorder %s3732_s28, %s3732_s28 }
  0x35   : > { %p3735_p7 = pnand %p3733_p5, %p3693_p13  ;;  %p3742_p1 = por %p3741_p0, %p3740_p12 }
  0x37   : > { %p3736_p9 = pneg %p3735_p7 }
  0x39   : > { %p3743_p2 = pnand %p3742_p1, %p3736_p9 }
  0x3b   : > { %3746 = shalt.err (!%p3743_p2)
}
  0x3c   : > { %3060 = dma.hbm_to_vmem [thread:$0]  (!%p3938_p11), %s5290_s3, 2048, %s3942_s6, [#allocation6], %s3851_s15, %s3851_s15, %s3852_s16  }
  0x3d   : > { %s4003_s29 = sadd.s32 1, %s3847_s21   ;;  %s29_s14 = sadd.s32 1, %s3843_s20 }
  0x3e   : > { %s26_s17 = ssub.s32 %s3847_s21, %s4003_s29  ;;  %p36_p13 = scmp.ne.s32.totalorder %s3843_s20, %s3839_s19 }
  0x3f   : > { %p27_p6 = scmp.eq.s32.totalorder %s26_s17, 0  ;;  %p37_p10 = scmp.eq.s32.totalorder %s3847_s21, 0 }
  0x40   : > { %p5300_p3 = scmp.eq.s32.totalorder %s3908_s22, 1  ;;  %p3071_p7 = scmp.lt.s32.totalorder %s3847_s21, 2 }
  0x41   : > { %s4019_s27 = scalar_select %p27_p6, %s3843_s20, %s29_s14  }
  0x42   : > { %p4013_p5 = por %p5300_p3, %p36_p13  ;;  %p38_p9 = por %p37_p10, %p36_p13 }
  0x43   : > { %s208_s30 = sand.u32 1, %s3843_s20   ;;  %s2560_s6 = sshll.u32 %s3847_s21, 13 }
  0x44   : > { %s5301_s23 = scalar_select %p4013_p5, 1, 0 }
  0x45   : > { %s2545_s7 = sshll.u32 %s208_s30, 9  ;;  %s4026_s10 = scalar_lea.hbm %s5287_s0, %s2560_s6 }
  0x46   : > { %s212_s11 = scalar_lea.vmem [#allocation2], %s2545_s7  ;;  %p4030_p11 = pnand %p3071_p7, %p38_p9 }
  0x47   : > { %s219_s28 = sshll.u32 %s212_s11, 4  ;;  %s4034_s13 = scalar_lea.sflag [#allocation3], %s208_s30  ;;  %s4028_s28 = int_to_ptr.vmem [resolvable:$true] %s219_s28 }
  0x48   : > { %s3747_s14 = scalar_lea.hbm %s4026_s10, 8192  ;;  %p3749_p0 = pneg %p4030_p11 }
  0x49   : > { %p3748_p12 = scmp.ne.s32.totalorder %s4026_s10, %s3747_s14  ;;  %s3752_s6 = scalar_lea.hbm %s5287_s0, 16384 }
  0x4a   : > { %p3753_p13 = scmp.lt.u32.totalorder %s4026_s10, %s5287_s0  ;;  %p3754_p6 = scmp.lt.u32.totalorder %s3752_s6, %s3747_s14 }
  0x4b   : > { %p3750_p1 = pnand %p3749_p0, %p3748_p12  ;;  %p3756_p3 = scmp.lt.u32.totalorder %s3747_s14, %s4026_s10 }
  0x4c   : > { %p3755_p10 = por %p3754_p6, %p3753_p13 }
  0x4d   : > { %p3751_p2 = pneg %p3750_p1 }
  0x4e   : > { %p3757_p7 = por %p3756_p3, %p3755_p10 }
  0x50   : > { %p3758_p9 = pnand %p3757_p7, %p3751_p2 }
  0x52   : > { %3761 = shalt.err (!%p3758_p9)
}
  0x53   : > { %s3762_s30 = scalar_lea.vmem %s4028_s28, 8192  ;;  %s3853_s11 = smov [#allocation2]  }
  0x54   : > { %p3763_p12 = scmp.ne.s32.totalorder %s4028_s28, %s3762_s30  ;;  %s3767_s17 = sshll.u32 %s3853_s11, 4  ;;  %s3768_s17 = int_to_ptr.vmem [resolvable:$false] %s3767_s17 }
  0x55   : > { %s3769_s7 = scalar_lea.vmem %s3768_s17, 16384  ;;  %p3770_p4 = scmp.lt.s32.totalorder %s4028_s28, %s3768_s17 }
  0x56   : > { %p3765_p1 = pnand %p3763_p12, %p3749_p0  ;;  %p3771_p13 = scmp.lt.s32.totalorder %s3769_s7, %s3762_s30 }
  0x58   : > { %p3766_p5 = pneg %p3765_p1  ;;  %p3772_p6 = por %p3771_p13, %p3770_p4 }
  0x5a   : > { %p3773_p10 = pnand %p3772_p6, %p3766_p5 }
  0x5c   : > { %3776 = shalt.err (!%p3773_p10)
}
  0x5d   : > { %3064 = dma.hbm_to_vmem [thread:$0]  (!%p4030_p11), %s4026_s10, 8192, %s4028_s28, %s4034_s13, %s3851_s15, %s3851_s15, %s3852_s16  }
  0x5e   : > { %231 = sbr.rel (%p3927_p8) target bundleno = 836 (0x344), region = 40  ;;  %s4068_s14 = sand.u32 (!%p3927_p8), 1, %s3839_s19  }
  0x5f   : > { %s2549_s6 = sshll.u32 (!%p3927_p8), %s4068_s14, 9  ;;  %s234_s8 = scalar_lea.sflag (!%p3927_p8), [#allocation3], %s4068_s14 }
  0x60   : > { %s4074_s12 = scalar_lea.vmem (!%p3927_p8), [#allocation2], %s2549_s6  ;;  %p5303_p4 = scmp.ne.s32.totalorder (!%p3927_p8), %s5296_s24, 0 }
  0x65   : > { %3822 = dma.done.wait (%p5303_p4), %s234_s8, 8192  }
  0x66   : > { %3824 = vsyncadd (%p5303_p4), %s234_s8, 4294959104  ;;  %p5304_p5 = scmp.eq.s32.totalorder %s3908_s22, 0 }
  0x68   : > { %3826 = dma.done.wait (%p5304_p5), [#allocation6], 4096   ;;  %p5305_p8 = pmov %p5304_p5 }
  0x69   : > { %v338_v0 = vld [vmem:[#allocation5] sm:$0xff]  ;;  %v339_v1 = vld [vmem:[#allocation5 + $0x8] sm:$0xff]  ;;  %v340_v2 = vld [vmem:[#allocation5 + $0x10] sm:$0xff]  ;;  %s4754_s13 = scalar_lea.vmem [#allocation8], %s2549_s6  ;;  %s2561_s11 = sshll.u32 %s3908_s22, 13 }
  0x6a   : > { %3828 = vsyncadd (%p5305_p8), [#allocation6], 4294963200  ;;  %v2978_v3 = vpack.c.bf16 %v339_v1, %v338_v0  ;;  %v341_v4 = vld [vmem:[#allocation5 + $0x18] sm:$0xff]  ;;  %v342_v6 = vld [vmem:[#allocation5 + $0x20] sm:$0xff]  ;;  %s2448_s17 = sshll.u32 %s4754_s13, 4  ;;  %s5239_s8 = scalar_lea.hbm %s5292_s5, %s2561_s11  ;;  %s5241_s17 = int_to_ptr.vmem [resolvable:$true] %s2448_s17 }
  0x6b   : > { %v2982_v5 = vpack.c.bf16 %v341_v4, %v340_v2  ;;  %v343_v7 = vld [vmem:[#allocation5 + $0x28] sm:$0xff]  ;;  %v274_v9 = vld [vmem:[%s4074_s12] sm:$0xff]  ;;  %v344_v10 = vld [vmem:[#allocation5 + $0x30] sm:$0xff]  ;;  %s2435_s22 = scalar_lea.sflag [#allocation4], %s4068_s14  ;;  %p5313_p0 = scmp.ne.s32.totalorder %s5301_s23, 0 }
  0x6c   : > { %2979 = vmatprep.subr.bf16.mxu0 %v2978_v3  ;;  %v2986_v8 = vpack.c.bf16 %v343_v7, %v342_v6  ;;  %v345_v11 = vld [vmem:[#allocation5 + $0x38] sm:$0xff]  ;;  %2754 = vmatprep.mubr.f32.mxu0 %v274_v9  ;;  %v346_v13 = vld [vmem:[#allocation5 + $0x40] sm:$0xff]  ;;  %v347_v14 = vld [vmem:[#allocation5 + $0x48] sm:$0xff]  ;;  %s3854_s24 = smov [#allocation8]  }
  0x6d   : > { %2981 = vmatpush3.bf16.msra.mxu0 %v2978_v3  ;;  %v2990_v12 = vpack.c.bf16 %v345_v11, %v344_v10  ;;  %v2994_v15 = vpack.c.bf16 %v347_v14, %v346_v13  ;;  %v348_v16 = vld [vmem:[#allocation5 + $0x50] sm:$0xff]  ;;  %v349_v17 = vld [vmem:[#allocation5 + $0x58] sm:$0xff]  ;;  %v350_v19 = vld [vmem:[#allocation5 + $0x60] sm:$0xff]  ;;  %s3781_s26 = sshll.u32 %s3854_s24, 4  ;;  %s3782_s26 = int_to_ptr.vmem [resolvable:$false] %s3781_s26 }
  0x6e   : > { %2983 = vmatprep.subr.bf16.mxu0 %v2982_v5  ;;  %v2998_v18 = vpack.c.bf16 %v349_v17, %v348_v16  ;;  %v351_v20 = vld [vmem:[#allocation5 + $0x68] sm:$0xff]  ;;  %v352_v22 = vld [vmem:[#allocation5 + $0x70] sm:$0xff]  ;;  %v353_v23 = vld [vmem:[#allocation5 + $0x78] sm:$0xff]  ;;  %s3783_s15 = scalar_lea.vmem %s3782_s26, 16384  ;;  %p3784_p7 = scmp.lt.s32.totalorder %s5241_s17, %s3782_s26 }
  0x6f   : > { %v3002_v21 = vpack.c.bf16 %v351_v20, %v350_v19  ;;  %v3006_v24 = vpack.c.bf16 %v353_v23, %v352_v22  ;;  %v275_v25 = vld [vmem:[%s4074_s12 + $0x8] sm:$0xff]  ;;  %v276_v26 = vld [vmem:[%s4074_s12 + $0x10] sm:$0xff]  ;;  %v277_v27 = vld [vmem:[%s4074_s12 + $0x18] sm:$0xff] }
  0x70   : > { %v278_v28 = vld [vmem:[%s4074_s12 + $0x20] sm:$0xff]  ;;  %v279_v29 = vld [vmem:[%s4074_s12 + $0x28] sm:$0xff]  ;;  %v280_v30 = vld [vmem:[%s4074_s12 + $0x30] sm:$0xff] }
  0x71   : > { %2985 = vmatpush3.bf16.msra.mxu0 %v2982_v5  ;;  %v281_v31 = vld [vmem:[%s4074_s12 + $0x38] sm:$0xff]  ;;  %v282_v32 = vld [vmem:[%s4074_s12 + $0x40] sm:$0xff]  ;;  %v283_v33 = vld [vmem:[%s4074_s12 + $0x48] sm:$0xff] }
  0x72   : > { %2987 = vmatprep.subr.bf16.mxu0 %v2986_v8  ;;  %v284_v34 = vld [vmem:[%s4074_s12 + $0x50] sm:$0xff]  ;;  %v285_v35 = vld [vmem:[%s4074_s12 + $0x58] sm:$0xff]  ;;  %v286_v36 = vld [vmem:[%s4074_s12 + $0x60] sm:$0xff] }
  0x73   : > { %v287_v37 = vld [vmem:[%s4074_s12 + $0x68] sm:$0xff]  ;;  %v288_v38 = vld [vmem:[%s4074_s12 + $0x70] sm:$0xff]  ;;  %v289_v39 = vld [vmem:[%s4074_s12 + $0x78] sm:$0xff] }
  0x74   : > { %v290_v40 = vld [vmem:[%s4074_s12 + $0x80] sm:$0xff]  ;;  %v291_v41 = vld [vmem:[%s4074_s12 + $0x88] sm:$0xff]  ;;  %v292_v42 = vld [vmem:[%s4074_s12 + $0x90] sm:$0xff] }
  0x75   : > { %2989 = vmatpush3.bf16.msra.mxu0 %v2986_v8  ;;  %v293_v43 = vld [vmem:[%s4074_s12 + $0x98] sm:$0xff]  ;;  %v294_v44 = vld [vmem:[%s4074_s12 + $0xa0] sm:$0xff]  ;;  %v295_v45 = vld [vmem:[%s4074_s12 + $0xa8] sm:$0xff] }
  0x76   : > { %2991 = vmatprep.subr.bf16.mxu0 %v2990_v12  ;;  %v296_v46 = vld [vmem:[%s4074_s12 + $0xb0] sm:$0xff]  ;;  %v297_v47 = vld [vmem:[%s4074_s12 + $0xb8] sm:$0xff]  ;;  %v298_v48 = vld [vmem:[%s4074_s12 + $0xc0] sm:$0xff] }
  0x77   : > { %v299_v49 = vld [vmem:[%s4074_s12 + $0xc8] sm:$0xff]  ;;  %v300_v50 = vld [vmem:[%s4074_s12 + $0xd0] sm:$0xff]  ;;  %v301_v51 = vld [vmem:[%s4074_s12 + $0xd8] sm:$0xff] }
  0x78   : > { %v302_v52 = vld [vmem:[%s4074_s12 + $0xe0] sm:$0xff]  ;;  %v303_v53 = vld [vmem:[%s4074_s12 + $0xe8] sm:$0xff]  ;;  %v304_v54 = vld [vmem:[%s4074_s12 + $0xf0] sm:$0xff] }
  0x79   : > { %2993 = vmatpush3.bf16.msra.mxu0 %v2990_v12  ;;  %v305_v55 = vld [vmem:[%s4074_s12 + $0xf8] sm:$0xff]  ;;  %v306_v56 = vld [vmem:[%s4074_s12 + $0x100] sm:$0xff]  ;;  %v307_v57 = vld [vmem:[%s4074_s12 + $0x108] sm:$0xff] }
  0x7a   : > { %2995 = vmatprep.subr.bf16.mxu0 %v2994_v15  ;;  %v308_v58 = vld [vmem:[%s4074_s12 + $0x110] sm:$0xff]  ;;  %v309_v59 = vld [vmem:[%s4074_s12 + $0x118] sm:$0xff]  ;;  %v310_v60 = vld [vmem:[%s4074_s12 + $0x120] sm:$0xff] }
  0x7b   : > { %v311_v61 = vld [vmem:[%s4074_s12 + $0x128] sm:$0xff]  ;;  %v312_v62 = vld [vmem:[%s4074_s12 + $0x130] sm:$0xff]  ;;  %v313_v63 = vld [vmem:[%s4074_s12 + $0x138] sm:$0xff] }
  0x7c   : > { %v314_v0 = vld [vmem:[%s4074_s12 + $0x140] sm:$0xff]  ;;  %v315_v1 = vld [vmem:[%s4074_s12 + $0x148] sm:$0xff]  ;;  %v316_v2 = vld [vmem:[%s4074_s12 + $0x150] sm:$0xff] }
  0x7d   : > { %2997 = vmatpush3.bf16.msra.mxu0 %v2994_v15  ;;  %v317_v3 = vld [vmem:[%s4074_s12 + $0x158] sm:$0xff]  ;;  %v318_v4 = vld [vmem:[%s4074_s12 + $0x160] sm:$0xff]  ;;  %v319_v5 = vld [vmem:[%s4074_s12 + $0x168] sm:$0xff] }
  0x7e   : > { %2999 = vmatprep.subr.bf16.mxu0 %v2998_v18  ;;  %v320_v6 = vld [vmem:[%s4074_s12 + $0x170] sm:$0xff]  ;;  %v1322_v7 = vld [vmem:[#allocation7] sm:$0xff]  ;;  %v1323_v8 = vld [vmem:[#allocation7 + $0x8] sm:$0xff] }
  0x7f   : > { %v3010_v9 = vpack.c.bf16 %v1323_v8, %v1322_v7  ;;  %v321_v10 = vld [vmem:[%s4074_s12 + $0x178] sm:$0xff]  ;;  %v322_v11 = vld [vmem:[%s4074_s12 + $0x180] sm:$0xff]  ;;  %v1324_v12 = vld [vmem:[#allocation7 + $0x10] sm:$0xff] }
  0x80   : > { %v1325_v13 = vld [vmem:[#allocation7 + $0x18] sm:$0xff]  ;;  %v323_v15 = vld [vmem:[%s4074_s12 + $0x188] sm:$0xff]  ;;  %v324_v16 = vld [vmem:[%s4074_s12 + $0x190] sm:$0xff] }
  0x81   : > { %3001 = vmatpush3.bf16.msra.mxu0 %v2998_v18  ;;  %3011 = vmatprep.subr.bf16.mxu1 %v3010_v9  ;;  %v3014_v14 = vpack.c.bf16 %v1325_v13, %v1324_v12  ;;  %v1326_v17 = vld [vmem:[#allocation7 + $0x20] sm:$0xff]  ;;  %v1327_v18 = vld [vmem:[#allocation7 + $0x28] sm:$0xff]  ;;  %v325_v19 = vld [vmem:[%s4074_s12 + $0x198] sm:$0xff] }
  0x82   : > { %3003 = vmatprep.subr.bf16.mxu0 %v3002_v21  ;;  %3013 = vmatpush3.bf16.msra.mxu1 %v3010_v9  ;;  %v3018_v20 = vpack.c.bf16 %v1327_v18, %v1326_v17  ;;  %v327_v22 = vld [vmem:[%s4074_s12 + $0x1a8] sm:$0xff]  ;;  %v1328_v23 = vld [vmem:[#allocation7 + $0x30] sm:$0xff] }
  0x83   : > { %3015 = vmatprep.subr.bf16.mxu1 %v3014_v14 }
  0x85   : > { %3005 = vmatpush3.bf16.msra.mxu0 %v3002_v21  ;;  %v326_v21 = vld [vmem:[%s4074_s12 + $0x1a0] sm:$0xff] }
  0x86   : > { %3007 = vmatprep.subr.bf16.mxu0 %v3006_v24  ;;  %3017 = vmatpush3.bf16.msra.mxu1 %v3014_v14 }
  0x87   : > { %3019 = vmatprep.subr.bf16.mxu1 %v3018_v20 }
  0x89   : > { %3009 = vmatpush3.bf16.msra.mxu0 %v3006_v24  ;;  %v1329_v24 = vld [vmem:[#allocation7 + $0x38] sm:$0xff] }
  0x8a   : > { %3021 = vmatpush3.bf16.msra.mxu1 %v3018_v20 }
  0x8c   : > { %2755 = vmatmul.mubr.f32.vlgmr.msra.gmra.mrb[0].mxu0 %v275_v25  ;;  %v328_v25 = vld [vmem:[%s4074_s12 + $0x1b0] sm:$0xff] }
  0x8d   : > { %2757 = vmatprep.mubr.f32.mxu0 %v276_v26  ;;  %v3022_v26 = vpack.c.bf16 %v1329_v24, %v1328_v23 }
  0x8f   : > { %3023 = vmatprep.subr.bf16.mxu1 %v3022_v26 }
  0x90   : > { %2758 = vmatmul.mubr.f32.gmra.mrb[2].mxu0 %v277_v27  ;;  %v329_v27 = vld [vmem:[%s4074_s12 + $0x1b8] sm:$0xff]  ;;  %3025 = vmatpush3.bf16.msra.mxu1 %v3022_v26 }
  0x91   : > { %2760 = vmatprep.mubr.f32.mxu0 %v278_v28  ;;  %v330_v28 = vld [vmem:[%s4074_s12 + $0x1c0] sm:$0xff] }
  0x94   : > { %2761 = vmatmul.mubr.f32.gmra.mrb[4].mxu0 %v279_v29  ;;  %v1330_v29 = vld [vmem:[#allocation7 + $0x40] sm:$0xff] }
  0x95   : > { %2763 = vmatprep.mubr.f32.mxu0 %v280_v30  ;;  %v1331_v30 = vld [vmem:[#allocation7 + $0x48] sm:$0xff] }
  0x98   : > { %2764 = vmatmul.mubr.f32.gmra.mrb[6].mxu0 %v281_v31  ;;  %v3026_v31 = vpack.c.bf16 %v1331_v30, %v1330_v29 }
  0x99   : > { %2766 = vmatprep.mubr.f32.mxu0 %v282_v32  ;;  %v331_v32 = vld [vmem:[%s4074_s12 + $0x1c8] sm:$0xff] }
  0x9a   : > { %3027 = vmatprep.subr.bf16.mxu1 %v3026_v31 }
  0x9b   : > { %3029 = vmatpush3.bf16.msra.mxu1 %v3026_v31 }
  0x9c   : > { %2767 = vmatmul.mubr.f32.gmra.mrb[8].mxu0 %v283_v33  ;;  %v332_v33 = vld [vmem:[%s4074_s12 + $0x1d0] sm:$0xff] }
  0x9d   : > { %2769 = vmatprep.mubr.f32.mxu0 %v284_v34  ;;  %v1332_v34 = vld [vmem:[#allocation7 + $0x50] sm:$0xff] }
  0xa0   : > { %2770 = vmatmul.mubr.f32.gmra.mrb[10].mxu0 %v285_v35  ;;  %v1333_v35 = vld [vmem:[#allocation7 + $0x58] sm:$0xff] }
  0xa1   : > { %2772 = vmatprep.mubr.f32.mxu0 %v286_v36  ;;  %v3030_v36 = vpack.c.bf16 %v1333_v35, %v1332_v34 }
  0xa3   : > { %3031 = vmatprep.subr.bf16.mxu1 %v3030_v36 }
  0xa4   : > { %2773 = vmatmul.mubr.f32.gmra.mrb[12].mxu0 %v287_v37  ;;  %v333_v37 = vld [vmem:[%s4074_s12 + $0x1d8] sm:$0xff]  ;;  %3033 = vmatpush3.bf16.msra.mxu1 %v3030_v36 }
  0xa5   : > { %2775 = vmatprep.mubr.f32.mxu0 %v288_v38  ;;  %v334_v38 = vld [vmem:[%s4074_s12 + $0x1e0] sm:$0xff] }
  0xa8   : > { %2776 = vmatmul.mubr.f32.gmra.mrb[14].mxu0 %v289_v39  ;;  %v1334_v39 = vld [vmem:[#allocation7 + $0x60] sm:$0xff] }
  0xa9   : > { %2778 = vmatprep.mubr.f32.mxu0 %v290_v40  ;;  %v1335_v40 = vld [vmem:[#allocation7 + $0x68] sm:$0xff] }
  0xac   : > { %2779 = vmatmul.mubr.f32.gmra.mrb[16].mxu0 %v291_v41  ;;  %v3034_v41 = vpack.c.bf16 %v1335_v40, %v1334_v39 }
  0xad   : > { %2781 = vmatprep.mubr.f32.mxu0 %v292_v42  ;;  %v335_v42 = vld [vmem:[%s4074_s12 + $0x1e8] sm:$0xff] }
  0xae   : > { %3035 = vmatprep.subr.bf16.mxu1 %v3034_v41 }
  0xaf   : > { %3037 = vmatpush3.bf16.msra.mxu1 %v3034_v41 }
  0xb0   : > { %2782 = vmatmul.mubr.f32.gmra.mrb[18].mxu0 %v293_v43  ;;  %v336_v43 = vld [vmem:[%s4074_s12 + $0x1f0] sm:$0xff] }
  0xb1   : > { %2784 = vmatprep.mubr.f32.mxu0 %v294_v44  ;;  %v1336_v44 = vld [vmem:[#allocation7 + $0x70] sm:$0xff] }
  0xb4   : > { %2785 = vmatmul.mubr.f32.gmra.mrb[20].mxu0 %v295_v45  ;;  %v1337_v45 = vld [vmem:[#allocation7 + $0x78] sm:$0xff] }
  0xb5   : > { %2787 = vmatprep.mubr.f32.mxu0 %v296_v46  ;;  %v3038_v46 = vpack.c.bf16 %v1337_v45, %v1336_v44 }
  0xb7   : > { %3039 = vmatprep.subr.bf16.mxu1 %v3038_v46 }
  0xb8   : > { %2788 = vmatmul.mubr.f32.gmra.mrb[22].mxu0 %v297_v47  ;;  %v337_v47 = vld [vmem:[%s4074_s12 + $0x1f8] sm:$0xff]  ;;  %3041 = vmatpush3.bf16.msra.mxu1 %v3038_v46 }
  0xb9   : > { %2790 = vmatprep.mubr.f32.mxu0 %v298_v48  ;;  %v4151_v48 = vld [vmem:[%s5289_s2] ss:$0 sm:$0xff] }
  0xbc   : > { %2791 = vmatmul.mubr.f32.gmra.mrb[24].mxu0 %v299_v49 }
  0xbd   : > { %2793 = vmatprep.mubr.f32.mxu0 %v300_v50 }
  0xc0   : > { %2794 = vmatmul.mubr.f32.gmra.mrb[26].mxu0 %v301_v51 }
  0xc1   : > { %2796 = vmatprep.mubr.f32.mxu0 %v302_v52 }
  0xc4   : > { %2797 = vmatmul.mubr.f32.gmra.mrb[28].mxu0 %v303_v53 }
  0xc5   : > { %2799 = vmatprep.mubr.f32.mxu0 %v304_v54 }
  0xc8   : > { %2800 = vmatmul.mubr.f32.gmra.mrb[30].mxu0 %v305_v55 }
  0xc9   : > { %2802 = vmatprep.mubr.f32.mxu0 %v306_v56 }
  0xcc   : > { %2803 = vmatmul.mubr.f32.gmra.mrb[32].mxu0 %v307_v57 }
  0xcd   : > { %2805 = vmatprep.mubr.f32.mxu0 %v308_v58 }
  0xd0   : > { %2806 = vmatmul.mubr.f32.gmra.mrb[34].mxu0 %v309_v59 }
  0xd1   : > { %2808 = vmatprep.mubr.f32.mxu0 %v310_v60 }
  0xd4   : > { %2809 = vmatmul.mubr.f32.gmra.mrb[36].mxu0 %v311_v61 }
  0xd5   : > { %2811 = vmatprep.mubr.f32.mxu0 %v312_v62 }
  0xd8   : > { %2812 = vmatmul.mubr.f32.gmra.mrb[38].mxu0 %v313_v63 }
  0xd9   : > { %2814 = vmatprep.mubr.f32.mxu0 %v314_v0 }
  0xdc   : > { %2815 = vmatmul.mubr.f32.gmra.mrb[40].mxu0 %v315_v1 }
  0xdd   : > { %2817 = vmatprep.mubr.f32.mxu0 %v316_v2 }
  0xe0   : > { %2818 = vmatmul.mubr.f32.gmra.mrb[42].mxu0 %v317_v3 }
  0xe1   : > { %2820 = vmatprep.mubr.f32.mxu0 %v318_v4 }
  0xe4   : > { %2821 = vmatmul.mubr.f32.gmra.mrb[44].mxu0 %v319_v5 }
  0xe5   : > { %2823 = vmatprep.mubr.f32.mxu0 %v320_v6 }
  0xe8   : > { %2824 = vmatmul.mubr.f32.gmra.mrb[46].mxu0 %v321_v10 }
  0xe9   : > { %2826 = vmatprep.mubr.f32.mxu0 %v322_v11 }
  0xec   : > { %2827 = vmatmul.mubr.f32.gmra.mrb[48].mxu0 %v323_v15 }
  0xed   : > { %2829 = vmatprep.mubr.f32.mxu0 %v324_v16 }
  0xf0   : > { %2830 = vmatmul.mubr.f32.gmra.mrb[50].mxu0 %v325_v19 }
  0xf1   : > { %2832 = vmatprep.mubr.f32.mxu0 %v326_v21 }
  0xf4   : > { %2833 = vmatmul.mubr.f32.gmra.mrb[52].mxu0 %v327_v22 }
  0xf5   : > { %2835 = vmatprep.mubr.f32.mxu0 %v328_v25 }
  0xf8   : > { %2836 = vmatmul.mubr.f32.gmra.mrb[54].mxu0 %v329_v27 }
  0xf9   : > { %2838 = vmatprep.mubr.f32.mxu0 %v330_v28 }
  0xfc   : > { %2839 = vmatmul.mubr.f32.gmra.mrb[56].mxu0 %v331_v32 }
  0xfd   : > { %2841 = vmatprep.mubr.f32.mxu0 %v332_v33 }
 0x100   : > { %2842 = vmatmul.mubr.f32.gmra.mrb[58].mxu0 %v333_v37 }
 0x101   : > { %2844 = vmatprep.mubr.f32.mxu0 %v334_v38 }
 0x104   : > { %2845 = vmatmul.mubr.f32.gmra.mrb[60].mxu0 %v335_v42 }
 0x105   : > { %2847 = vmatprep.mubr.f32.mxu0 %v336_v43 }
 0x108   : > { %2848 = vmatmul.mubr.f32.gmra.mrb[62].mxu0 %v337_v47 }
 0x15f   : > { %v2756_v49 = vpop.f32.mrb[0].mxu0 }
 0x160   : > { %v4154_v50 = vadd.f32 %v2756_v49, %v4151_v48  ;;  %v427_v51 = vpop.f32.mrb[1].mxu0 }
 0x161   : > { %v4166_v62 = vadd.f32 %v4151_v48, %v427_v51 }
 0x162   : > { %v811_v52 = vand.u32 2147483647, %v4154_v50  ;;  %v747_v42 = vmax.f32 %v4154_v50, 0.0 }
 0x163   : > { %v2759_v53 = vpop.f32.mrb[2].mxu0  ;;  %v810_v8 = vand.u32 2147483647, %v4166_v62  ;;  %v746_v51 = vmax.f32 %v4166_v62, 0.0 }
 0x164   : > { %v875_v54 = vsub.f32 0.0, %v811_v52  ;;  %v4158_v55 = vadd.f32 %v2759_v53, %v4151_v48  ;;  %v437_v56 = vpop.f32.mrb[3].mxu0 }
 0x165   : > { %v4161_v57 = vadd.f32 %v4151_v48, %v437_v56  ;;  %v874_v18 = vsub.f32 0.0, %v810_v8 }
 0x166   : > { %v940_v58 = vmul.f32 1.442695, %v875_v54  ;;  %v813_v59 = vand.u32 2147483647, %v4158_v55  ;;  %v749_v52 = vmax.f32 %v4158_v55, 0.0 }
 0x167   : > { %v812_v60 = vand.u32 2147483647, %v4161_v57  ;;  %v2762_v61 = vpop.f32.mrb[4].mxu0  ;;  %v938_v27 = vmul.f32 1.442695, %v874_v18  ;;  %v748_v54 = vmax.f32 %v4161_v57, 0.0 }
 0x168   : > { %v877_v63 = vsub.f32 0.0, %v813_v59  ;;  %v4169_v0 = vadd.f32 %v2762_v61, %v4151_v48  ;;  %v447_v1 = vpop.f32.mrb[5].mxu0  ;;  %3113 = vpow2.f32 %v940_v58 }
 0x169   : > { %v876_v2 = vsub.f32 0.0, %v812_v60  ;;  %v4172_v3 = vadd.f32 %v4151_v48, %v447_v1 }
 0x16a   : > { %v944_v4 = vmul.f32 1.442695, %v877_v63  ;;  %v815_v5 = vand.u32 2147483647, %v4169_v0 }
 0x16b   : > { %v814_v6 = vand.u32 2147483647, %v4172_v3  ;;  %v2765_v7 = vpop.f32.mrb[6].mxu0  ;;  %v942_v9 = vmul.f32 1.442695, %v876_v2 }
 0x16c   : > { %v879_v10 = vsub.f32 0.0, %v815_v5  ;;  %v4178_v11 = vadd.f32 %v2765_v7, %v4151_v48  ;;  %v457_v12 = vpop.f32.mrb[7].mxu0  ;;  %3115 = vpow2.f32 %v944_v4 }
 0x16d   : > { %v4181_v13 = vadd.f32 %v4151_v48, %v457_v12  ;;  %v878_v15 = vsub.f32 0.0, %v814_v6  ;;  %3117 = vpow2.f32 %v942_v9  ;;  %v751_v6 = vmax.f32 %v4169_v0, 0.0 }
 0x16e   : > { %v948_v14 = vmul.f32 1.442695, %v879_v10  ;;  %v817_v16 = vand.u32 2147483647, %v4178_v11  ;;  %v750_v10 = vmax.f32 %v4172_v3, 0.0  ;;  %v753_v12 = vmax.f32 %v4178_v11, 0.0 }
 0x16f   : > { %v2768_v17 = vpop.f32.mrb[8].mxu0  ;;  %v816_v19 = vand.u32 2147483647, %v4181_v13  ;;  %v946_v23 = vmul.f32 1.442695, %v878_v15 }
 0x170   : > { %v4186_v20 = vadd.f32 %v2768_v17, %v4151_v48  ;;  %v467_v21 = vpop.f32.mrb[9].mxu0  ;;  %3119 = vpow2.f32 %v948_v14  ;;  %v881_v24 = vsub.f32 0.0, %v817_v16 }
 0x171   : > { %v4189_v22 = vadd.f32 %v4151_v48, %v467_v21  ;;  %v880_v28 = vsub.f32 0.0, %v816_v19  ;;  %3121 = vpow2.f32 %v946_v23  ;;  %v752_v21 = vmax.f32 %v4181_v13, 0.0 }
 0x172   : > { %v819_v25 = vand.u32 2147483647, %v4186_v20  ;;  %v3114_v26 = vpop.eup %3113  ;;  %v952_v33 = vmul.f32 1.442695, %v881_v24  ;;  %3123 = vpow2.f32 %v938_v27 }
 0x173   : > { %v818_v29 = vand.u32 2147483647, %v4189_v22  ;;  %v2771_v30 = vpop.f32.mrb[10].mxu0  ;;  %v1067_v36 = vadd.f32 1.0, %v3114_v26  ;;  %v950_v38 = vmul.f32 1.442695, %v880_v28 }
 0x174   : > { %v4194_v31 = vadd.f32 %v2771_v30, %v4151_v48  ;;  %v477_v32 = vpop.f32.mrb[11].mxu0  ;;  %v883_v34 = vsub.f32 0.0, %v819_v25  ;;  %3125 = vpow2.f32 %v952_v33 }
 0x175   : > { %v4197_v35 = vadd.f32 %v4151_v48, %v477_v32  ;;  %v882_v39 = vsub.f32 0.0, %v818_v29  ;;  %3127 = vlog2.f32 %v1067_v36  ;;  %v755_v32 = vmax.f32 %v4186_v20, 0.0 }
 0x176   : > { %v3116_v37 = vpop.eup %3115  ;;  %v821_v40 = vand.u32 2147483647, %v4194_v31  ;;  %v956_v47 = vmul.f32 1.442695, %v883_v34  ;;  %3129 = vpow2.f32 %v950_v38 }
 0x177   : > { %v2774_v41 = vpop.f32.mrb[12].mxu0  ;;  %v820_v43 = vand.u32 2147483647, %v4197_v35  ;;  %v3118_v46 = vpop.eup %3117  ;;  %v1069_v53 = vadd.f32 1.0, %v3116_v37  ;;  %v954_v59 = vmul.f32 1.442695, %v882_v39 }
 0x178   : > { %v4203_v44 = vadd.f32 %v2774_v41, %v4151_v48  ;;  %v487_v45 = vpop.f32.mrb[13].mxu0  ;;  %v885_v60 = vsub.f32 0.0, %v821_v40  ;;  %v1068_v63 = vadd.f32 1.0, %v3118_v46  ;;  %3131 = vpow2.f32 %v956_v47 }
 0x179   : > { %v4206_v49 = vadd.f32 %v4151_v48, %v487_v45  ;;  %v884_v1 = vsub.f32 0.0, %v820_v43  ;;  %3133 = vlog2.f32 %v1069_v53  ;;  %v754_v37 = vmax.f32 %v4189_v22, 0.0 }
 0x17a   : > { %v3120_v58 = vpop.eup %3119  ;;  %v823_v61 = vand.u32 2147483647, %v4203_v44  ;;  %3135 = vpow2.f32 %v954_v59  ;;  %v960_v16 = vmul.f32 1.442695, %v885_v60 }
 0x17b   : > { %v2777_v56 = vpop.f32.mrb[14].mxu0  ;;  %v822_v2 = vand.u32 2147483647, %v4206_v49  ;;  %v1071_v9 = vadd.f32 1.0, %v3120_v58  ;;  %v3122_v15 = vpop.eup %3121  ;;  %3137 = vlog2.f32 %v1068_v63  ;;  %v958_v23 = vmul.f32 1.442695, %v884_v1 }
 0x17c   : > { %v4214_v4 = vadd.f32 %v2777_v56, %v4151_v48  ;;  %v497_v5 = vpop.f32.mrb[15].mxu0  ;;  %v887_v7 = vsub.f32 0.0, %v823_v61  ;;  %v3124_v25 = vpop.eup %3123  ;;  %v1070_v30 = vadd.f32 1.0, %v3122_v15 }
 0x17d   : > { %v4218_v8 = vadd.f32 %v4151_v48, %v497_v5  ;;  %v886_v17 = vsub.f32 0.0, %v822_v2  ;;  %3139 = vlog2.f32 %v1071_v9  ;;  %v1066_v46 = vadd.f32 1.0, %v3124_v25 }
 0x17e   : > { %v825_v18 = vand.u32 2147483647, %v4214_v4  ;;  %v964_v26 = vmul.f32 1.442695, %v887_v7  ;;  %v3126_v36 = vpop.eup %3125  ;;  %3141 = vpow2.f32 %v960_v16  ;;  %v756_v2 = vmax.f32 %v4197_v35, 0.0 }
 0x17f   : > { %v2780_v14 = vpop.f32.mrb[16].mxu0  ;;  %v824_v24 = vand.u32 2147483647, %v4218_v8  ;;  %v962_v38 = vmul.f32 1.442695, %v886_v17  ;;  %v3128_v41 = vpop.eup %3127  ;;  %3143 = vpow2.f32 %v958_v23 }
 0x180   : > { %v507_v19 = vpop.f32.mrb[17].mxu0  ;;  %v889_v27 = vsub.f32 0.0, %v825_v18  ;;  %v4226_v28 = vadd.f32 %v2780_v14, %v4151_v48  ;;  %v3130_v47 = vpop.eup %3129  ;;  %3145 = vpow2.f32 %v964_v26 }
 0x181   : > { %v4229_v29 = vadd.f32 %v4151_v48, %v507_v19  ;;  %v888_v33 = vsub.f32 0.0, %v824_v24  ;;  %3147 = vlog2.f32 %v1070_v30  ;;  %v1072_v15 = vadd.f32 1.0, %v3130_v47 }
 0x182   : > { %v827_v39 = vand.u32 2147483647, %v4226_v28  ;;  %v968_v53 = vmul.f32 1.442695, %v889_v27  ;;  %v3132_v1 = vpop.eup %3131  ;;  %3149 = vpow2.f32 %v962_v38  ;;  %v1073_v19 = vadd.f32 1.0, %v3126_v36 }
 0x183   : > { %v2783_v34 = vpop.f32.mrb[18].mxu0  ;;  %v826_v45 = vand.u32 2147483647, %v4229_v29  ;;  %v966_v59 = vmul.f32 1.442695, %v888_v33  ;;  %v4244_v14 = vpop.eup %3133  ;;  %3151 = vlog2.f32 %v1066_v46  ;;  %v758_v38 = vmax.f32 %v4206_v49, 0.0 }
 0x184   : > { %v517_v40 = vpop.f32.mrb[19].mxu0  ;;  %v891_v56 = vsub.f32 0.0, %v827_v39  ;;  %v4237_v58 = vadd.f32 %v2783_v34, %v4151_v48  ;;  %v3136_v18 = vpop.eup %3135  ;;  %3153 = vpow2.f32 %v968_v53  ;;  %v1075_v34 = vadd.f32 1.0, %v3132_v1 }
 0x185   : > { %v890_v60 = vsub.f32 0.0, %v826_v45  ;;  %v4240_v61 = vadd.f32 %v4151_v48, %v517_v40  ;;  %v3138_v25 = vpop.eup %3137  ;;  %3155 = vpow2.f32 %v966_v59  ;;  %v1074_v45 = vadd.f32 1.0, %v3136_v18 }
 0x186   : > { %v972_v5 = vmul.f32 1.442695, %v891_v56  ;;  %v829_v7 = vand.u32 2147483647, %v4237_v58  ;;  %v1133_v47 = vmul.f32 0.6931472, %v3128_v41 }
 0x187   : > { %v2786_v63 = vpop.f32.mrb[20].mxu0  ;;  %v828_v17 = vand.u32 2147483647, %v4240_v61  ;;  %v970_v26 = vmul.f32 1.442695, %v890_v60  ;;  %v4256_v40 = vpop.eup %3139 }
 0x188   : > { %v527_v9 = vpop.f32.mrb[21].mxu0  ;;  %v893_v23 = vsub.f32 0.0, %v829_v7  ;;  %v4249_v24 = vadd.f32 %v2786_v63, %v4151_v48  ;;  %3157 = vpow2.f32 %v972_v5  ;;  %v3142_v53 = vpop.eup %3141 }
 0x189   : > { %v892_v27 = vsub.f32 0.0, %v828_v17  ;;  %v4252_v30 = vadd.f32 %v4151_v48, %v527_v9  ;;  %3159 = vlog2.f32 %v1072_v15  ;;  %v3144_v63 = vpop.eup %3143 }
 0x18a   : > { %v831_v39 = vand.u32 2147483647, %v4249_v24  ;;  %3161 = vlog2.f32 %v1073_v19  ;;  %v976_v56 = vmul.f32 1.442695, %v893_v23  ;;  %v3146_v15 = vpop.eup %3145  ;;  %v1076_v1 = vadd.f32 1.0, %v3144_v63 }
 0x18b   : > { %v2789_v33 = vpop.f32.mrb[22].mxu0  ;;  %v830_v60 = vand.u32 2147483647, %v4252_v30  ;;  %3163 = vpow2.f32 %v970_v26  ;;  %v974_v5 = vmul.f32 1.442695, %v892_v27  ;;  %v3148_v23 = vpop.eup %3147  ;;  %v1259_v26 = vadd.f32 %v1133_v47, %v747_v42 }
 0x18c   : > { %v537_v36 = vpop.f32.mrb[23].mxu0  ;;  %v895_v59 = vsub.f32 0.0, %v831_v39  ;;  %v4262_v7 = vadd.f32 %v2789_v33, %v4151_v48  ;;  %3165 = vlog2.f32 %v1075_v34  ;;  %v1077_v39 = vadd.f32 1.0, %v3142_v53  ;;  %v3150_v27 = vpop.eup %3149 }
 0x18d   : > { %v894_v18 = vsub.f32 0.0, %v830_v60  ;;  %3167 = vlog2.f32 %v1074_v45  ;;  %v1135_v33 = vmul.f32 0.6931472, %v3138_v25  ;;  %v3152_v34 = vpop.eup %3151  ;;  %v1079_v43 = vadd.f32 1.0, %v3146_v15 }
 0x18e   : > { %v980_v41 = vmul.f32 1.442695, %v895_v59  ;;  %3169 = vpow2.f32 %v976_v56  ;;  %v833_v16 = vand.u32 2147483647, %v4262_v7  ;;  %v4270_v60 = vadd.f32 %v4151_v48, %v537_v36  ;;  %v3154_v53 = vpop.eup %3153 }
 0x18f   : > { %v2792_v9 = vpop.f32.mrb[24].mxu0  ;;  %3171 = vpow2.f32 %v974_v5  ;;  %v978_v59 = vmul.f32 1.442695, %v894_v18  ;;  %v1131_v17 = vmul.f32 0.6931472, %v3152_v34  ;;  %v3156_v47 = vpop.eup %3155  ;;  %v1078_v25 = vadd.f32 1.0, %v3150_v27 }
 0x190   : > { %v547_v19 = vpop.f32.mrb[25].mxu0  ;;  %3173 = vpow2.f32 %v980_v41  ;;  %v897_v46 = vsub.f32 0.0, %v833_v16  ;;  %v4273_v50 = vadd.f32 %v2792_v9, %v4151_v48  ;;  %v1137_v56 = vmul.f32 0.6931472, %v4244_v14 }
 0x191   : > { %3175 = vlog2.f32 %v1077_v39  ;;  %v832_v63 = vand.u32 2147483647, %v4270_v60  ;;  %v1258_v36 = vadd.f32 %v1131_v17, %v746_v51  ;;  %v1260_v15 = vadd.f32 %v1135_v33, %v748_v54 }
 0x192   : > { %v3158_v5 = vpop.eup %3157  ;;  %3177 = vlog2.f32 %v1076_v1  ;;  %v1139_v16 = vmul.f32 0.6931472, %v3148_v23  ;;  %v765_v9 = vmax.f32 %v4237_v58, 0.0  ;;  %v984_v18 = vmul.f32 1.442695, %v897_v46 }
 0x193   : > { %v2795_v45 = vpop.f32.mrb[26].mxu0  ;;  %v3160_v41 = vpop.eup %3159  ;;  %3179 = vpow2.f32 %v978_v59  ;;  %v896_v39 = vsub.f32 0.0, %v832_v63  ;;  %v1081_v14 = vadd.f32 1.0, %v3154_v53  ;;  %2882 = vmatprep.mubr.f32.mxu1 %v1258_v36  ;;  %v835_v1 = vand.u32 2147483647, %v4273_v50 }
 0x194   : > { %v557_v42 = vpop.f32.mrb[27].mxu0  ;;  %v3162_v34 = vpop.eup %3161  ;;  %3181 = vlog2.f32 %v1079_v43  ;;  %v4284_v62 = vadd.f32 %v4151_v48, %v547_v19  ;;  %v1080_v54 = vadd.f32 1.0, %v3156_v47  ;;  %v1083_v17 = vadd.f32 1.0, %v3158_v5  ;;  %2883 = vmatmul.mubr.f32.vlgmr.msra.gmra.mrb[0].mxu1 %v1259_v26 }
 0x195   : > { %v3164_v57 = vpop.eup %3163  ;;  %3183 = vlog2.f32 %v1078_v25  ;;  %v1261_v46 = vadd.f32 %v1137_v56, %v749_v52  ;;  %2885 = vmatprep.mubr.f32.mxu1 %v1260_v15  ;;  %v1262_v43 = vadd.f32 %v1139_v16, %v750_v10  ;;  %v899_v33 = vsub.f32 0.0, %v835_v1 }
 0x196   : > { %v3166_v23 = vpop.eup %3165  ;;  %v834_v59 = vand.u32 2147483647, %v4284_v62  ;;  %v1143_v53 = vmul.f32 0.6931472, %v3160_v41  ;;  %3185 = vpow2.f32 %v984_v18  ;;  %v982_v63 = vmul.f32 1.442695, %v896_v39 }
 0x197   : > { %v2798_v27 = vpop.f32.mrb[28].mxu0  ;;  %v3168_v19 = vpop.eup %3167  ;;  %v1141_v25 = vmul.f32 0.6931472, %v4256_v40  ;;  %v4293_v47 = vadd.f32 %v2795_v45, %v4151_v48  ;;  %3187 = vlog2.f32 %v1081_v14  ;;  %v1082_v52 = vadd.f32 1.0, %v3164_v57 }
 0x198   : > { %v567_v51 = vpop.f32.mrb[29].mxu0  ;;  %v3170_v55 = vpop.eup %3169  ;;  %v898_v56 = vsub.f32 0.0, %v834_v59  ;;  %v4296_v3 = vadd.f32 %v4151_v48, %v557_v42  ;;  %3189 = vlog2.f32 %v1080_v54  ;;  %v764_v36 = vmax.f32 %v4240_v61, 0.0  ;;  %2886 = vmatmul.mubr.f32.gmra.mrb[2].mxu1 %v1261_v46 }
 0x199   : > { %v3172_v5 = vpop.eup %3171  ;;  %v988_v15 = vmul.f32 1.442695, %v899_v33  ;;  %v837_v40 = vand.u32 2147483647, %v4293_v47  ;;  %3191 = vlog2.f32 %v1083_v17  ;;  %2888 = vmatprep.mubr.f32.mxu1 %v1262_v43  ;;  %v1264_v41 = vadd.f32 %v1143_v53, %v752_v21 }
 0x19a   : > { %v3174_v16 = vpop.eup %3173  ;;  %v986_v45 = vmul.f32 1.442695, %v898_v56  ;;  %v1145_v18 = vmul.f32 0.6931472, %v3162_v34  ;;  %3193 = vpow2.f32 %v982_v63  ;;  %v1263_v42 = vadd.f32 %v1141_v25, %v751_v6 }
 0x19b   : > { %v2801_v26 = vpop.f32.mrb[30].mxu0  ;;  %v3176_v39 = vpop.eup %3175  ;;  %v836_v14 = vand.u32 2147483647, %v4296_v3  ;;  %v1147_v1 = vmul.f32 0.6931472, %v3168_v19  ;;  %3195 = vlog2.f32 %v1082_v52  ;;  %v1085_v46 = vadd.f32 1.0, %v3170_v55 }
 0x19c   : > { %v577_v10 = vpop.f32.mrb[31].mxu0  ;;  %v3178_v54 = vpop.eup %3177  ;;  %v1084_v17 = vadd.f32 1.0, %v3172_v5  ;;  %v4308_v43 = vadd.f32 %v2798_v27, %v4151_v48  ;;  %v1087_v34 = vadd.f32 1.0, %v3174_v16  ;;  %2889 = vmatmul.mubr.f32.gmra.mrb[4].mxu1 %v1263_v42  ;;  %3197 = vpow2.f32 %v988_v15 }
 0x19d   : > { %v3180_v21 = vpop.eup %3179  ;;  %v901_v33 = vsub.f32 0.0, %v837_v40  ;;  %v4311_v0 = vadd.f32 %v4151_v48, %v567_v51  ;;  %3199 = vpow2.f32 %v986_v45  ;;  %2891 = vmatprep.mubr.f32.mxu1 %v1264_v41  ;;  %v1266_v59 = vadd.f32 %v1147_v1, %v754_v37 }
 0x19e   : > { %v3182_v6 = vpop.eup %3181  ;;  %v1149_v53 = vmul.f32 0.6931472, %v3166_v23  ;;  %v839_v19 = vand.u32 2147483647, %v4308_v43  ;;  %v1265_v63 = vadd.f32 %v1145_v18, %v753_v12  ;;  %v900_v25 = vsub.f32 0.0, %v836_v14 }
 0x19f   : > { %v4305_v57 = vpop.f32.mrb[32].mxu0  ;;  %v3184_v27 = vpop.eup %3183  ;;  %v838_v55 = vand.u32 2147483647, %v4311_v0  ;;  %v1151_v52 = vmul.f32 0.6931472, %v3178_v54  ;;  %3201 = vlog2.f32 %v1085_v46  ;;  %v767_v51 = vmax.f32 %v4249_v24, 0.0 }
 0x1a0   : > { %v587_v13 = vpop.f32.mrb[33].mxu0  ;;  %v766_v5 = vmax.f32 %v4252_v30, 0.0  ;;  %v1086_v22 = vadd.f32 1.0, %v3180_v21  ;;  %v3186_v23 = vpop.eup %3185  ;;  %2892 = vmatmul.mubr.f32.gmra.mrb[6].mxu1 %v1265_v63  ;;  %v992_v15 = vmul.f32 1.442695, %v901_v33  ;;  %v903_v40 = vsub.f32 0.0, %v839_v19 }
 0x1a1   : > { %v4326_v11 = vadd.f32 %v2801_v26, %v4151_v48  ;;  %v4329_v12 = vadd.f32 %v4151_v48, %v577_v10  ;;  %v3188_v16 = vpop.eup %3187  ;;  %3203 = vlog2.f32 %v1084_v17  ;;  %2894 = vmatprep.mubr.f32.mxu1 %v1266_v59  ;;  %v902_v45 = vsub.f32 0.0, %v838_v55 }
 0x1a2   : > { %v1268_v41 = vadd.f32 %v1151_v52, %v756_v2  ;;  %v1155_v18 = vmul.f32 0.6931472, %v3184_v27  ;;  %v3190_v42 = vpop.eup %3189  ;;  %3205 = vlog2.f32 %v1087_v34  ;;  %v990_v14 = vmul.f32 1.442695, %v900_v25 }
 0x1a3   : > { %v4319_v56 = vpop.f32.mrb[34].mxu0  ;;  %v1267_v1 = vadd.f32 %v1149_v53, %v755_v32  ;;  %v1153_v54 = vmul.f32 0.6931472, %v3176_v39  ;;  %v4335_v26 = vpop.eup %3191  ;;  %3207 = vlog2.f32 %v1086_v22  ;;  %v769_v10 = vmax.f32 %v4262_v7, 0.0 }
 0x1a4   : > { %v4323_v37 = vpop.f32.mrb[35].mxu0  ;;  %v1089_v46 = vadd.f32 1.0, %v3186_v23  ;;  %v841_v17 = vand.u32 2147483647, %v4326_v11  ;;  %v3194_v33 = vpop.eup %3193  ;;  %v768_v35 = vmax.f32 %v4270_v60, 0.0  ;;  %3209 = vpow2.f32 %v992_v15 }
 0x1a5   : > { %2895 = vmatmul.mubr.f32.gmra.mrb[8].mxu1 %v1267_v1  ;;  %v996_v2 = vmul.f32 1.442695, %v903_v40  ;;  %v840_v34 = vand.u32 2147483647, %v4329_v12  ;;  %v3196_v32 = vpop.eup %3195  ;;  %v994_v39 = vmul.f32 1.442695, %v902_v45  ;;  %v1270_v59 = vadd.f32 %v1155_v18, %v758_v38 }
 0x1a6   : > { %2897 = vmatprep.mubr.f32.mxu1 %v1268_v41  ;;  %v4347_v53 = vadd.f32 %v4305_v57, %v4151_v48  ;;  %v4350_v19 = vadd.f32 %v4151_v48, %v587_v13  ;;  %v3198_v27 = vpop.eup %3197  ;;  %v771_v63 = vmax.f32 %v4273_v50, 0.0  ;;  %3211 = vpow2.f32 %v990_v14 }
 0x1a7   : > { %v2810_v21 = vpop.f32.mrb[36].mxu0  ;;  %v5306_v25 = vmax.f32 %v4194_v31, 0.0  ;;  %v1157_v52 = vmul.f32 0.6931472, %v3182_v6  ;;  %v3200_v23 = vpop.eup %3199  ;;  %3213 = vlog2.f32 %v1089_v46  ;;  %v1088_v49 = vadd.f32 1.0, %v3194_v33 }
 0x1a8   : > { %v4341_v20 = vpop.f32.mrb[37].mxu0  ;;  %v905_v38 = vsub.f32 0.0, %v841_v17  ;;  %v843_v57 = vand.u32 2147483647, %v4347_v53  ;;  %3215 = vpow2.f32 %v996_v2  ;;  %v904_v13 = vsub.f32 0.0, %v840_v34 }
 0x1a9   : > { %v1269_v55 = vadd.f32 %v1153_v54, %v5306_v25  ;;  %v842_v15 = vand.u32 2147483647, %v4350_v19  ;;  %v1159_v40 = vmul.f32 0.6931472, %v3190_v42  ;;  %v3202_v45 = vpop.eup %3201  ;;  %v1091_v41 = vadd.f32 1.0, %v3198_v27 }
 0x1aa   : > { %v770_v31 = vmax.f32 %v4284_v62, 0.0  ;;  %3217 = vpow2.f32 %v994_v39  ;;  %v4362_v6 = vadd.f32 %v4319_v56, %v4151_v48  ;;  %v1090_v14 = vadd.f32 1.0, %v3200_v23 }
 0x1ab   : > { %v4355_v22 = vpop.f32.mrb[38].mxu0  ;;  %2898 = vmatmul.mubr.f32.gmra.mrb[10].mxu1 %v1269_v55  ;;  %v5307_v1 = vmax.f32 %v4203_v44, 0.0  ;;  %v5308_v46 = vmax.f32 %v4218_v8, 0.0  ;;  %v1161_v33 = vmul.f32 0.6931472, %v3188_v16  ;;  %v3204_v2 = vpop.eup %3203  ;;  %3219 = vlog2.f32 %v1088_v49 }
 0x1ac   : > { %2900 = vmatprep.mubr.f32.mxu1 %v1270_v59  ;;  %v617_v18 = vpop.f32.mrb[39].mxu0  ;;  %v773_v34 = vmax.f32 %v4293_v47, 0.0  ;;  %v1000_v39 = vmul.f32 1.442695, %v905_v38  ;;  %v907_v59 = vsub.f32 0.0, %v843_v57  ;;  %v4373_v56 = vpop.eup %3205  ;;  %v906_v44 = vsub.f32 0.0, %v842_v15 }
 0x1ad   : > { %v1271_v54 = vadd.f32 %v1157_v52, %v5307_v1  ;;  %v1272_v17 = vadd.f32 %v1159_v40, %v5308_v46  ;;  %v998_v25 = vmul.f32 1.442695, %v904_v13  ;;  %v845_v55 = vand.u32 2147483647, %v4362_v6  ;;  %v3208_v16 = vpop.eup %3207 }
 0x1ae   : > { %v4378_v8 = vadd.f32 %v4151_v48, %v4323_v37  ;;  %3221 = vlog2.f32 %v1091_v41  ;;  %v772_v52 = vmax.f32 %v4296_v3, 0.0  ;;  %v1163_v23 = vmul.f32 0.6931472, %v3196_v32  ;;  %v3210_v38 = vpop.eup %3209 }
 0x1af   : > { %v4368_v42 = vpop.f32.mrb[40].mxu0  ;;  %2901 = vmatmul.mubr.f32.gmra.mrb[12].mxu1 %v1271_v54  ;;  %v4382_v49 = vadd.f32 %v2810_v21, %v4151_v48  ;;  %3223 = vlog2.f32 %v1090_v14  ;;  %v5309_v57 = vmax.f32 %v4214_v4, 0.0  ;;  %v909_v15 = vsub.f32 0.0, %v845_v55 }
 0x1b0   : > { %v4371_v27 = vpop.f32.mrb[41].mxu0  ;;  %2903 = vmatprep.mubr.f32.mxu1 %v1272_v17  ;;  %v1165_v40 = vmul.f32 0.6931472, %v4335_v26  ;;  %3225 = vpow2.f32 %v1000_v39  ;;  %v1004_v37 = vmul.f32 1.442695, %v907_v59  ;;  %v5310_v54 = vmax.f32 %v4229_v29, 0.0  ;;  %v3212_v21 = vpop.eup %3211 }
 0x1b1   : > { %v1273_v13 = vadd.f32 %v1161_v33, %v5309_v57  ;;  %v844_v41 = vand.u32 2147483647, %v4378_v8  ;;  %3227 = vpow2.f32 %v998_v25  ;;  %v1002_v4 = vmul.f32 1.442695, %v906_v44  ;;  %v3214_v26 = vpop.eup %3213 }
 0x1b2   : > { %v1274_v32 = vadd.f32 %v1163_v23, %v5310_v54  ;;  %v847_v17 = vand.u32 2147483647, %v4382_v49  ;;  %v1008_v33 = vmul.f32 1.442695, %v909_v15  ;;  %v4398_v39 = vadd.f32 %v4151_v48, %v4341_v20  ;;  %v3216_v59 = vpop.eup %3215 }
 0x1b3   : > { %v4387_v1 = vpop.f32.mrb[42].mxu0  ;;  %2904 = vmatmul.mubr.f32.gmra.mrb[14].mxu1 %v1273_v13  ;;  %v908_v55 = vsub.f32 0.0, %v844_v41  ;;  %v1167_v29 = vmul.f32 0.6931472, %v3204_v2  ;;  %v5311_v23 = vmax.f32 %v4226_v28, 0.0  ;;  %v4404_v25 = vadd.f32 %v4355_v22, %v4151_v48 }
 0x1b4   : > { %v4392_v46 = vpop.f32.mrb[43].mxu0  ;;  %2906 = vmatprep.mubr.f32.mxu1 %v1274_v32  ;;  %v1169_v54 = vmul.f32 0.6931472, %v3202_v45  ;;  %v4407_v44 = vadd.f32 %v4151_v48, %v617_v18  ;;  %v3218_v15 = vpop.eup %3217  ;;  %3229 = vpow2.f32 %v1004_v37  ;;  %v911_v20 = vsub.f32 0.0, %v847_v17 }
 0x1b5   : > { %v1275_v57 = vadd.f32 %v1165_v40, %v5311_v23  ;;  %v1006_v41 = vmul.f32 1.442695, %v908_v55  ;;  %v846_v2 = vand.u32 2147483647, %v4398_v39  ;;  %v1092_v28 = vadd.f32 1.0, %v3212_v21  ;;  %v3220_v18 = vpop.eup %3219 }
 0x1b6   : > { %v774_v45 = vmax.f32 %v4311_v0, 0.0  ;;  %3231 = vpow2.f32 %v1002_v4  ;;  %v1276_v22 = vadd.f32 %v1167_v29, %v764_v36  ;;  %v1093_v40 = vadd.f32 1.0, %v3210_v38 }
 0x1b7   : > { %v4409_v13 = vpop.f32.mrb[44].mxu0  ;;  %2907 = vmatmul.mubr.f32.gmra.mrb[16].mxu1 %v1275_v57  ;;  %v777_v23 = vmax.f32 %v4326_v11, 0.0  ;;  %3233 = vpow2.f32 %v1008_v33  ;;  %v910_v37 = vsub.f32 0.0, %v846_v2  ;;  %v1094_v55 = vadd.f32 1.0, %v3218_v15 }
 0x1b8   : > { %v4412_v32 = vpop.f32.mrb[45].mxu0  ;;  %2909 = vmatprep.mubr.f32.mxu1 %v1276_v22  ;;  %v1277_v17 = vadd.f32 %v1169_v54, %v765_v9  ;;  %v849_v21 = vand.u32 2147483647, %v4404_v25  ;;  %v848_v14 = vand.u32 2147483647, %v4407_v44  ;;  %v3222_v57 = vpop.eup %3221  ;;  %3235 = vpow2.f32 %v1006_v41 }
 0x1b9   : > { %v1012_v61 = vmul.f32 1.442695, %v911_v20  ;;  %v1171_v36 = vmul.f32 0.6931472, %v3208_v16  ;;  %v1173_v38 = vmul.f32 0.6931472, %v4373_v56  ;;  %v3224_v29 = vpop.eup %3223  ;;  %3237 = vlog2.f32 %v1092_v28 }
 0x1ba   : > { %v1010_v33 = vmul.f32 1.442695, %v910_v37  ;;  %v913_v15 = vsub.f32 0.0, %v849_v21  ;;  %v912_v2 = vsub.f32 0.0, %v848_v14  ;;  %v3226_v9 = vpop.eup %3225  ;;  %3239 = vlog2.f32 %v1093_v40 }
 0x1bb   : > { %v4422_v4 = vpop.f32.mrb[46].mxu0  ;;  %2910 = vmatmul.mubr.f32.gmra.mrb[18].mxu1 %v1277_v17  ;;  %v1095_v54 = vadd.f32 1.0, %v3216_v59  ;;  %v776_v22 = vmax.f32 %v4329_v12, 0.0  ;;  %v1278_v41 = vadd.f32 %v1171_v36, %v766_v5  ;;  %v3228_v20 = vpop.eup %3227  ;;  %3241 = vlog2.f32 %v1094_v55 }
 0x1bc   : > { %v4425_v58 = vpop.f32.mrb[47].mxu0  ;;  %v1016_v16 = vmul.f32 1.442695, %v913_v15  ;;  %v1279_v56 = vadd.f32 %v1173_v38, %v767_v51  ;;  %v4434_v28 = vadd.f32 %v4368_v42, %v4151_v48  ;;  %3243 = vpow2.f32 %v1012_v61 }
 0x1bd   : > { %2912 = vmatprep.mubr.f32.mxu1 %v1278_v41  ;;  %v4440_v59 = vadd.f32 %v4151_v48, %v4371_v27  ;;  %v1175_v30 = vmul.f32 0.6931472, %v3220_v18  ;;  %v1177_v5 = vmul.f32 0.6931472, %v3214_v26  ;;  %3245 = vpow2.f32 %v1010_v33 }
 0x1be   : > { %v1014_v37 = vmul.f32 1.442695, %v912_v2  ;;  %v851_v24 = vand.u32 2147483647, %v4434_v28  ;;  %v4447_v51 = vadd.f32 %v4387_v1, %v4151_v48  ;;  %v3230_v42 = vpop.eup %3229  ;;  %v1097_v55 = vadd.f32 1.0, %v3226_v9 }
 0x1bf   : > { %v4436_v14 = vpop.f32.mrb[48].mxu0  ;;  %2913 = vmatmul.mubr.f32.gmra.mrb[20].mxu1 %v1279_v56  ;;  %3247 = vpow2.f32 %v1016_v16  ;;  %v850_v17 = vand.u32 2147483647, %v4440_v59  ;;  %v1280_v27 = vadd.f32 %v1175_v30, %v768_v35  ;;  %v1096_v18 = vadd.f32 1.0, %v3228_v20 }
 0x1c0   : > { %v4442_v40 = vpop.f32.mrb[49].mxu0  ;;  %v3232_v26 = vpop.eup %3231  ;;  %3249 = vlog2.f32 %v1095_v54  ;;  %v915_v21 = vsub.f32 0.0, %v851_v24  ;;  %v1281_v61 = vadd.f32 %v1177_v5, %v769_v10  ;;  %v853_v33 = vand.u32 2147483647, %v4447_v51 }
 0x1c1   : > { %v3234_v38 = vpop.eup %3233  ;;  %v914_v1 = vsub.f32 0.0, %v850_v17  ;;  %2915 = vmatprep.mubr.f32.mxu1 %v1280_v27  ;;  %v4459_v15 = vadd.f32 %v4151_v48, %v4392_v46  ;;  %v1179_v60 = vmul.f32 0.6931472, %v3224_v29  ;;  %v1099_v2 = vadd.f32 1.0, %v3230_v42  ;;  %v4481_v27 = vld [vmem:[%s5289_s2] ss:$0 sm:$0xff] }
 0x1c2   : > { %3251 = vpow2.f32 %v1014_v37  ;;  %v1020_v9 = vmul.f32 1.442695, %v915_v21  ;;  %v1181_v7 = vmul.f32 0.6931472, %v3222_v57  ;;  %v3236_v10 = vpop.eup %3235  ;;  %v1098_v54 = vadd.f32 1.0, %v3232_v26 }
 0x1c3   : > { %v4454_v36 = vpop.f32.mrb[50].mxu0  ;;  %2916 = vmatmul.mubr.f32.gmra.mrb[22].mxu1 %v1281_v61  ;;  %3253 = vlog2.f32 %v1097_v55  ;;  %v917_v41 = vsub.f32 0.0, %v853_v33  ;;  %v852_v20 = vand.u32 2147483647, %v4459_v15  ;;  %v3238_v16 = vpop.eup %3237  ;;  %v1101_v56 = vadd.f32 1.0, %v3234_v38 }
 0x1c4   : > { %v4461_v35 = vpop.f32.mrb[51].mxu0  ;;  %3255 = vlog2.f32 %v1096_v18  ;;  %v1282_v46 = vadd.f32 %v1179_v60, %v770_v31  ;;  %v4468_v29 = vadd.f32 %v4409_v13, %v4151_v48  ;;  %v3240_v5 = vpop.eup %3239  ;;  %v1018_v57 = vmul.f32 1.442695, %v914_v1 }
 0x1c5   : > { %3257 = vpow2.f32 %v1020_v9  ;;  %v916_v37 = vsub.f32 0.0, %v852_v20  ;;  %v1283_v24 = vadd.f32 %v1181_v7, %v771_v63  ;;  %v3242_v55 = vpop.eup %3241  ;;  %v779_v17 = vmax.f32 %v4347_v53, 0.0 }
 0x1c6   : > { %3259 = vlog2.f32 %v1099_v2  ;;  %v1100_v62 = vadd.f32 1.0, %v3236_v10  ;;  %2918 = vmatprep.mubr.f32.mxu1 %v1282_v46  ;;  %v855_v48 = vand.u32 2147483647, %v4468_v29  ;;  %v3244_v31 = vpop.eup %3243  ;;  %v1024_v13 = vmul.f32 1.442695, %v917_v41 }
 0x1c7   : > { %v4470_v30 = vpop.f32.mrb[52].mxu0  ;;  %3261 = vlog2.f32 %v1098_v54  ;;  %2919 = vmatmul.mubr.f32.gmra.mrb[24].mxu1 %v1283_v24  ;;  %v4485_v50 = vadd.f32 %v4481_v27, %v4412_v32  ;;  %v1183_v63 = vmul.f32 0.6931472, %v3238_v16  ;;  %v3246_v26 = vpop.eup %3245  ;;  %v1185_v21 = vmul.f32 0.6931472, %v3240_v5 }
 0x1c8   : > { %v4474_v42 = vpop.f32.mrb[53].mxu0  ;;  %3263 = vlog2.f32 %v1101_v56  ;;  %v919_v18 = vsub.f32 0.0, %v855_v48  ;;  %v4489_v61 = vadd.f32 %v4481_v27, %v4422_v4  ;;  %v778_v33 = vmax.f32 %v4350_v19, 0.0 }
 0x1c9   : > { %v3248_v1 = vpop.eup %3247  ;;  %3265 = vpow2.f32 %v1018_v57  ;;  %v1022_v60 = vmul.f32 1.442695, %v916_v37  ;;  %v854_v2 = vand.u32 2147483647, %v4485_v50  ;;  %v1103_v7 = vadd.f32 1.0, %v3244_v31 }
 0x1ca   : > { %v3250_v9 = vpop.eup %3249  ;;  %3267 = vlog2.f32 %v1100_v62  ;;  %v1028_v10 = vmul.f32 1.442695, %v919_v18  ;;  %v1284_v54 = vadd.f32 %v1183_v63, %v772_v52  ;;  %v1102_v4 = vadd.f32 1.0, %v3246_v26 }
 0x1cb   : > { %v4491_v38 = vpop.f32.mrb[54].mxu0  ;;  %3269 = vpow2.f32 %v1024_v13  ;;  %v918_v41 = vsub.f32 0.0, %v854_v2  ;;  %v1285_v20 = vadd.f32 %v1185_v21, %v773_v34  ;;  %v1105_v56 = vadd.f32 1.0, %v3248_v1 }
 0x1cc   : > { %v4495_v32 = vpop.f32.mrb[55].mxu0  ;;  %v3252_v16 = vpop.eup %3251  ;;  %2921 = vmatprep.mubr.f32.mxu1 %v1284_v54  ;;  %v857_v46 = vand.u32 2147483647, %v4489_v61  ;;  %v4504_v5 = vadd.f32 %v4481_v27, %v4425_v58  ;;  %v1187_v57 = vmul.f32 0.6931472, %v3242_v55  ;;  %3271 = vpow2.f32 %v1022_v60 }
 0x1cd   : > { %v3254_v3 = vpop.eup %3253  ;;  %v1026_v52 = vmul.f32 1.442695, %v918_v41  ;;  %2922 = vmatmul.mubr.f32.gmra.mrb[26].mxu1 %v1285_v20  ;;  %v1189_v24 = vmul.f32 0.6931472, %v3250_v9  ;;  %v4510_v47 = vadd.f32 %v4481_v27, %v4436_v14  ;;  %3273 = vpow2.f32 %v1028_v10 }
 0x1ce   : > { %v3256_v62 = vpop.eup %3255  ;;  %v921_v48 = vsub.f32 0.0, %v857_v46  ;;  %v856_v58 = vand.u32 2147483647, %v4504_v5  ;;  %v1286_v55 = vadd.f32 %v1187_v57, %v774_v45  ;;  %v1104_v13 = vadd.f32 1.0, %v3252_v16 }
 0x1cf   : > { %v4506_v37 = vpop.f32.mrb[56].mxu0  ;;  %v3258_v31 = vpop.eup %3257  ;;  %3275 = vpow2.f32 %v1026_v52  ;;  %v5312_v63 = vmax.f32 %v4308_v43, 0.0  ;;  %v859_v18 = vand.u32 2147483647, %v4510_v47  ;;  %v4522_v60 = vadd.f32 %v4481_v27, %v4442_v40 }
 0x1d0   : > { %v4512_v34 = vpop.f32.mrb[57].mxu0  ;;  %v3260_v14 = vpop.eup %3259  ;;  %3277 = vlog2.f32 %v1103_v7  ;;  %v1032_v21 = vmul.f32 1.442695, %v921_v48  ;;  %v920_v1 = vsub.f32 0.0, %v856_v58  ;;  %2924 = vmatprep.mubr.f32.mxu1 %v1286_v55  ;;  %v1191_v9 = vmul.f32 0.6931472, %v3256_v62 }
 0x1d1   : > { %v1287_v26 = vadd.f32 %v1189_v24, %v5312_v63  ;;  %v3262_v0 = vpop.eup %3261  ;;  %3279 = vlog2.f32 %v1102_v4  ;;  %v923_v45 = vsub.f32 0.0, %v859_v18  ;;  %v1193_v43 = vmul.f32 0.6931472, %v3254_v3 }
 0x1d2   : > { %v3264_v10 = vpop.eup %3263  ;;  %v781_v54 = vmax.f32 %v4362_v6, 0.0  ;;  %3281 = vlog2.f32 %v1105_v56  ;;  %v1107_v7 = vadd.f32 1.0, %v3258_v31  ;;  %v858_v41 = vand.u32 2147483647, %v4522_v60 }
 0x1d3   : > { %v4524_v2 = vpop.f32.mrb[58].mxu0  ;;  %2925 = vmatmul.mubr.f32.gmra.mrb[28].mxu1 %v1287_v26  ;;  %v3266_v16 = vpop.eup %3265  ;;  %v780_v40 = vmax.f32 %v4378_v8, 0.0  ;;  %3283 = vlog2.f32 %v1104_v13  ;;  %v1030_v46 = vmul.f32 1.442695, %v920_v1  ;;  %v1288_v4 = vadd.f32 %v1191_v9, %v776_v22 }
 0x1d4   : > { %v4528_v20 = vpop.f32.mrb[59].mxu0  ;;  %v3268_v57 = vpop.eup %3267  ;;  %v1036_v52 = vmul.f32 1.442695, %v923_v45  ;;  %v922_v3 = vsub.f32 0.0, %v858_v41  ;;  %v1289_v24 = vadd.f32 %v1193_v43, %v777_v23  ;;  %v4537_v56 = vadd.f32 %v4481_v27, %v4454_v36 }
 0x1d5   : > { %v3270_v48 = vpop.eup %3269  ;;  %v783_v58 = vmax.f32 %v4382_v49, 0.0  ;;  %3285 = vpow2.f32 %v1032_v21  ;;  %2927 = vmatprep.mubr.f32.mxu1 %v1288_v4  ;;  %v4544_v12 = vadd.f32 %v4481_v27, %v4461_v35  ;;  %v1195_v22 = vmul.f32 0.6931472, %v3262_v0 }
 0x1d6   : > { %3287 = vlog2.f32 %v1107_v7  ;;  %v1106_v11 = vadd.f32 1.0, %v3266_v16  ;;  %v1034_v23 = vmul.f32 1.442695, %v922_v3  ;;  %v861_v36 = vand.u32 2147483647, %v4537_v56  ;;  %v3272_v31 = vpop.eup %3271 }
 0x1d7   : > { %v4539_v62 = vpop.f32.mrb[60].mxu0  ;;  %2928 = vmatmul.mubr.f32.gmra.mrb[30].mxu1 %v1289_v24  ;;  %v782_v13 = vmax.f32 %v4398_v39, 0.0  ;;  %3289 = vpow2.f32 %v1030_v46  ;;  %v860_v63 = vand.u32 2147483647, %v4544_v12  ;;  %v1290_v26 = vadd.f32 %v1195_v22, %v778_v33  ;;  %v3274_v35 = vpop.eup %3273 }
 0x1d8   : > { %v4546_v55 = vpop.f32.mrb[61].mxu0  ;;  %v1109_v18 = vadd.f32 1.0, %v3270_v48  ;;  %3291 = vpow2.f32 %v1036_v52  ;;  %v925_v21 = vsub.f32 0.0, %v861_v36  ;;  %v1197_v1 = vmul.f32 0.6931472, %v3260_v14 }
 0x1d9   : > { %v3276_v45 = vpop.eup %3275  ;;  %3293 = vpow2.f32 %v1034_v23  ;;  %v924_v9 = vsub.f32 0.0, %v860_v63  ;;  %2930 = vmatprep.mubr.f32.mxu1 %v1290_v26  ;;  %v4557_v43 = vadd.f32 %v4481_v27, %v4470_v30  ;;  %v4561_v7 = vadd.f32 %v4481_v27, %v4474_v42 }
 0x1da   : > { %v3278_v33 = vpop.eup %3277  ;;  %3295 = vlog2.f32 %v1106_v11  ;;  %v1108_v41 = vadd.f32 1.0, %v3272_v31  ;;  %v1040_v14 = vmul.f32 1.442695, %v925_v21  ;;  %v1291_v16 = vadd.f32 %v1197_v1, %v779_v17 }
 0x1db   : > { %v4553_v0 = vpop.f32.mrb[62].mxu0  ;;  %v3280_v46 = vpop.eup %3279  ;;  %v1111_v4 = vadd.f32 1.0, %v3274_v35  ;;  %v1110_v52 = vadd.f32 1.0, %v3276_v45  ;;  %v1038_v3 = vmul.f32 1.442695, %v924_v9  ;;  %3297 = vlog2.f32 %v1109_v18 }
 0x1dc   : > { %v4563_v19 = vpop.f32.mrb[63].mxu0  ;;  %v863_v30 = vand.u32 2147483647, %v4557_v43  ;;  %v3282_v24 = vpop.eup %3281  ;;  %2931 = vmatmul.mubr.f32.gmra.mrb[32].mxu1 %v1291_v16  ;;  %v862_v42 = vand.u32 2147483647, %v4561_v7  ;;  %3299 = vpow2.f32 %v1040_v14  ;;  %v4571_v53 = vadd.f32 %v4481_v27, %v4491_v38 }
 0x1dd   : > { %v1199_v48 = vmul.f32 0.6931472, %v3268_v57  ;;  %v1201_v22 = vmul.f32 0.6931472, %v3264_v10  ;;  %v3284_v23 = vpop.eup %3283  ;;  %v4575_v17 = vadd.f32 %v4481_v27, %v4495_v32  ;;  %v785_v36 = vmax.f32 %v4404_v25, 0.0 }
 0x1de   : > { %v927_v11 = vsub.f32 0.0, %v863_v30  ;;  %3301 = vpow2.f32 %v1038_v3  ;;  %v926_v31 = vsub.f32 0.0, %v862_v42  ;;  %v865_v38 = vand.u32 2147483647, %v4571_v53 }
 0x1df   : > { %v1292_v63 = vadd.f32 %v1199_v48, %v780_v40  ;;  %v3286_v57 = vpop.eup %3285  ;;  %3303 = vlog2.f32 %v1108_v41  ;;  %v1293_v26 = vadd.f32 %v1201_v22, %v781_v54  ;;  %v784_v32 = vmax.f32 %v4407_v44, 0.0 }
 0x1e0   : > { %v1044_v10 = vmul.f32 1.442695, %v927_v11  ;;  %v4583_v35 = vpop.eup %3287  ;;  %3305 = vlog2.f32 %v1111_v4  ;;  %v1042_v18 = vmul.f32 1.442695, %v926_v31  ;;  %v864_v25 = vand.u32 2147483647, %v4575_v17 }
 0x1e1   : > { %2933 = vmatprep.mubr.f32.mxu1 %v1292_v63  ;;  %v3290_v21 = vpop.eup %3289  ;;  %3307 = vlog2.f32 %v1110_v52  ;;  %v929_v8 = vsub.f32 0.0, %v865_v38  ;;  %v1203_v40 = vmul.f32 0.6931472, %v3280_v46  ;;  %v1205_v1 = vmul.f32 0.6931472, %v3278_v33 }
 0x1e2   : > { %2934 = vmatmul.mubr.f32.gmra.mrb[34].mxu1 %v1293_v26  ;;  %v3292_v45 = vpop.eup %3291  ;;  %v1113_v6 = vadd.f32 1.0, %v3286_v57  ;;  %v928_v54 = vsub.f32 0.0, %v864_v25  ;;  %v4589_v9 = vadd.f32 %v4481_v27, %v4506_v37  ;;  %v4593_v44 = vadd.f32 %v4481_v27, %v4512_v34 }
 0x1e3   : > { %v3294_v41 = vpop.eup %3293  ;;  %v787_v14 = vmax.f32 %v4434_v28, 0.0  ;;  %3309 = vpow2.f32 %v1044_v10  ;;  %v1048_v16 = vmul.f32 1.442695, %v929_v8  ;;  %v1294_v46 = vadd.f32 %v1203_v40, %v782_v13 }
 0x1e4   : > { %v3296_v33 = vpop.eup %3295  ;;  %v786_v4 = vmax.f32 %v4440_v59, 0.0  ;;  %3311 = vpow2.f32 %v1042_v18  ;;  %v1046_v52 = vmul.f32 1.442695, %v928_v54  ;;  %v1295_v37 = vadd.f32 %v1205_v1, %v783_v58 }
 0x1e5   : > { %v1112_v3 = vadd.f32 1.0, %v3290_v21  ;;  %v1115_v30 = vadd.f32 1.0, %v3292_v45  ;;  %v1114_v34 = vadd.f32 1.0, %v3294_v41  ;;  %2936 = vmatprep.mubr.f32.mxu1 %v1294_v46  ;;  %v867_v42 = vand.u32 2147483647, %v4589_v9  ;;  %v3298_v28 = vpop.eup %3297 }
 0x1e6   : > { %3313 = vlog2.f32 %v1113_v6  ;;  %2937 = vmatmul.mubr.f32.gmra.mrb[36].mxu1 %v1295_v37  ;;  %v866_v39 = vand.u32 2147483647, %v4593_v44  ;;  %v1207_v13 = vmul.f32 0.6931472, %v3284_v23  ;;  %v1209_v48 = vmul.f32 0.6931472, %v3282_v24  ;;  %v3300_v22 = vpop.eup %3299 }
 0x1e7   : > { %3315 = vpow2.f32 %v1048_v16  ;;  %v931_v59 = vsub.f32 0.0, %v867_v42  ;;  %v4605_v49 = vadd.f32 %v4481_v27, %v4524_v2  ;;  %v4609_v58 = vadd.f32 %v4481_v27, %v4528_v20 }
 0x1e8   : > { %v3302_v11 = vpop.eup %3301  ;;  %v789_v31 = vmax.f32 %v4447_v51, 0.0  ;;  %3317 = vpow2.f32 %v1046_v52  ;;  %v930_v63 = vsub.f32 0.0, %v866_v39  ;;  %v1296_v57 = vadd.f32 %v1207_v13, %v784_v32 }
 0x1e9   : > { %v3304_v10 = vpop.eup %3303  ;;  %3319 = vlog2.f32 %v1112_v3  ;;  %v1117_v24 = vadd.f32 1.0, %v3300_v22  ;;  %v1116_v23 = vadd.f32 1.0, %v3302_v11  ;;  %v1297_v26 = vadd.f32 %v1209_v48, %v785_v36 }
 0x1ea   : > { %v3306_v38 = vpop.eup %3305  ;;  %3321 = vlog2.f32 %v1115_v30  ;;  %v1052_v18 = vmul.f32 1.442695, %v931_v59  ;;  %v1050_v2 = vmul.f32 1.442695, %v930_v63  ;;  %2939 = vmatprep.mubr.f32.mxu1 %v1296_v57  ;;  %v869_v25 = vand.u32 2147483647, %v4605_v49 }
 0x1eb   : > { %v3308_v20 = vpop.eup %3307  ;;  %3323 = vlog2.f32 %v1114_v34  ;;  %2940 = vmatmul.mubr.f32.gmra.mrb[38].mxu1 %v1297_v26  ;;  %v868_v51 = vand.u32 2147483647, %v4609_v58  ;;  %v1211_v21 = vmul.f32 0.6931472, %v3296_v33  ;;  %v1213_v32 = vmul.f32 0.6931472, %v4583_v35 }
 0x1ec   : > { %3325 = vlog2.f32 %v1116_v23  ;;  %v933_v8 = vsub.f32 0.0, %v869_v25  ;;  %v4617_v36 = vadd.f32 %v4481_v27, %v4539_v62  ;;  %v4621_v40 = vadd.f32 %v4481_v27, %v4546_v55 }
 0x1ed   : > { %v3310_v1 = vpop.eup %3309  ;;  %v788_v45 = vmax.f32 %v4459_v15, 0.0  ;;  %3327 = vpow2.f32 %v1050_v2  ;;  %v932_v6 = vsub.f32 0.0, %v868_v51  ;;  %v1298_v54 = vadd.f32 %v1211_v21, %v786_v4 }
 0x1ee   : > { %v3312_v41 = vpop.eup %3311  ;;  %3329 = vpow2.f32 %v1052_v18  ;;  %v1056_v16 = vmul.f32 1.442695, %v933_v8  ;;  %v1299_v35 = vadd.f32 %v1213_v32, %v787_v14  ;;  %v871_v46 = vand.u32 2147483647, %v4617_v36 }
 0x1ef   : > { %3331 = vlog2.f32 %v1117_v24  ;;  %v1118_v33 = vadd.f32 1.0, %v3312_v41  ;;  %v1054_v62 = vmul.f32 1.442695, %v932_v6  ;;  %2942 = vmatprep.mubr.f32.mxu1 %v1298_v54  ;;  %v870_v52 = vand.u32 2147483647, %v4621_v40 }
 0x1f0   : > { %v3314_v55 = vpop.eup %3313  ;;  %v1119_v37 = vadd.f32 1.0, %v3310_v1  ;;  %2943 = vmatmul.mubr.f32.gmra.mrb[40].mxu1 %v1299_v35  ;;  %v935_v3 = vsub.f32 0.0, %v871_v46  ;;  %v1215_v15 = vmul.f32 0.6931472, %v3304_v10  ;;  %v1217_v30 = vmul.f32 0.6931472, %v3298_v28 }
 0x1f1   : > { %v3316_v34 = vpop.eup %3315  ;;  %3333 = vlog2.f32 %v1118_v33  ;;  %v934_v4 = vsub.f32 0.0, %v870_v52  ;;  %v4628_v14 = vadd.f32 %v4481_v27, %v4553_v0  ;;  %v4632_v42 = vadd.f32 %v4481_v27, %v4563_v19 }
 0x1f2   : > { %v3318_v39 = vpop.eup %3317  ;;  %v791_v13 = vmax.f32 %v4468_v29, 0.0  ;;  %3335 = vpow2.f32 %v1056_v16  ;;  %v1060_v48 = vmul.f32 1.442695, %v935_v3  ;;  %v1300_v22 = vadd.f32 %v1215_v15, %v788_v45 }
 0x1f3   : > { %v3320_v59 = vpop.eup %3319  ;;  %v1120_v11 = vadd.f32 1.0, %v3318_v39  ;;  %3337 = vpow2.f32 %v1054_v62  ;;  %v1058_v28 = vmul.f32 1.442695, %v934_v4  ;;  %v1301_v63 = vadd.f32 %v1217_v30, %v789_v31 }
 0x1f4   : > { %v3322_v57 = vpop.eup %3321  ;;  %v790_v10 = vmax.f32 %v4485_v50, 0.0  ;;  %3339 = vlog2.f32 %v1119_v37  ;;  %v1121_v0 = vadd.f32 1.0, %v3316_v34  ;;  %2945 = vmatprep.mubr.f32.mxu1 %v1300_v22  ;;  %v873_v27 = vand.u32 2147483647, %v4628_v14 }
 0x1f5   : > { %v3324_v19 = vpop.eup %3323  ;;  %3341 = vlog2.f32 %v1120_v11  ;;  %2946 = vmatmul.mubr.f32.gmra.mrb[42].mxu1 %v1301_v63  ;;  %v872_v29 = vand.u32 2147483647, %v4632_v42  ;;  %v1219_v24 = vmul.f32 0.6931472, %v3308_v20  ;;  %v1221_v23 = vmul.f32 0.6931472, %v3306_v38 }
 0x1f6   : > { %v3326_v26 = vpop.eup %3325  ;;  %v792_v18 = vmax.f32 %v4504_v5, 0.0  ;;  %3343 = vpow2.f32 %v1060_v48  ;;  %v937_v31 = vsub.f32 0.0, %v873_v27  ;;  %v1223_v2 = vmul.f32 0.6931472, %v3320_v59 }
 0x1f7   : > { %v3328_v25 = vpop.eup %3327  ;;  %3345 = vpow2.f32 %v1058_v28  ;;  %v936_v50 = vsub.f32 0.0, %v872_v29  ;;  %v1302_v51 = vadd.f32 %v1219_v24, %v790_v10  ;;  %v1225_v21 = vmul.f32 0.6931472, %v3314_v55 }
 0x1f8   : > { %v3330_v32 = vpop.eup %3329  ;;  %v1122_v8 = vadd.f32 1.0, %v3328_v25  ;;  %v1064_v1 = vmul.f32 1.442695, %v937_v31  ;;  %v1303_v45 = vadd.f32 %v1221_v23, %v791_v13  ;;  %v1304_v6 = vadd.f32 %v1223_v2, %v792_v18 }
 0x1f9   : > { %v3332_v54 = vpop.eup %3331  ;;  %v794_v20 = vmax.f32 %v4522_v60, 0.0  ;;  %3347 = vlog2.f32 %v1121_v0  ;;  %v1062_v38 = vmul.f32 1.442695, %v936_v50  ;;  %2948 = vmatprep.mubr.f32.mxu1 %v1302_v51  ;;  %v1227_v5 = vmul.f32 0.6931472, %v3324_v19 }
 0x1fa   : > { %v793_v41 = vmax.f32 %v4489_v61, 0.0  ;;  %3349 = vlog2.f32 %v1122_v8  ;;  %2949 = vmatmul.mubr.f32.gmra.mrb[44].mxu1 %v1303_v45  ;;  %v1123_v35 = vadd.f32 1.0, %v3330_v32  ;;  %v1231_v33 = vmul.f32 0.6931472, %v3326_v26 }
 0x1fb   : > { %v3334_v16 = vpop.eup %3333  ;;  %3351 = vpow2.f32 %v1064_v1  ;;  %2951 = vmatprep.mubr.f32.mxu1 %v1304_v6  ;;  %v1306_v46 = vadd.f32 %v1227_v5, %v794_v20  ;;  %v1229_v55 = vmul.f32 0.6931472, %v3322_v57  ;;  %v796_v60 = vmax.f32 %v4544_v12, 0.0 }
 0x1fc   : > { %v3336_v62 = vpop.eup %3335  ;;  %3353 = vpow2.f32 %v1062_v38  ;;  %v1305_v52 = vadd.f32 %v1225_v21, %v793_v41  ;;  %v795_v15 = vmax.f32 %v4510_v47, 0.0  ;;  %v1235_v39 = vmul.f32 0.6931472, %v3334_v16 }
 0x1fd   : > { %v3338_v37 = vpop.eup %3337  ;;  %3355 = vlog2.f32 %v1123_v35  ;;  %v1125_v34 = vadd.f32 1.0, %v3336_v62  ;;  %v1308_v4 = vadd.f32 %v1231_v33, %v796_v60  ;;  %v1233_v22 = vmul.f32 0.6931472, %v3332_v54 }
 0x1fe   : > { %v3340_v3 = vpop.eup %3339  ;;  %v1124_v30 = vadd.f32 1.0, %v3338_v37  ;;  %2952 = vmatmul.mubr.f32.gmra.mrb[46].mxu1 %v1305_v52  ;;  %v1307_v48 = vadd.f32 %v1229_v55, %v795_v15  ;;  %v798_v11 = vmax.f32 %v4561_v7, 0.0  ;;  %v797_v12 = vmax.f32 %v4537_v56, 0.0 }
 0x1ff   : > { %v3342_v61 = vpop.eup %3341  ;;  %2954 = vmatprep.mubr.f32.mxu1 %v1306_v46  ;;  %v800_v27 = vmax.f32 %v4575_v17, 0.0  ;;  %v1237_v29 = vmul.f32 0.6931472, %v3340_v3  ;;  %v799_v7 = vmax.f32 %v4557_v43, 0.0  ;;  %v802_v51 = vmax.f32 %v4593_v44, 0.0 }
 0x200   : > { %v3344_v13 = vpop.eup %3343  ;;  %3357 = vlog2.f32 %v1124_v30  ;;  %v1239_v47 = vmul.f32 0.6931472, %v3342_v61  ;;  %v1310_v10 = vadd.f32 %v1235_v39, %v798_v11  ;;  %v1309_v19 = vadd.f32 %v1233_v22, %v797_v12  ;;  %v4659_v30 = vld [vmem:[%s5291_s4] ss:$0 sm:$0xff] }
 0x201   : > { %v3346_v59 = vpop.eup %3345  ;;  %3359 = vlog2.f32 %v1125_v34  ;;  %v1127_v57 = vadd.f32 1.0, %v3344_v13  ;;  %v1311_v2 = vadd.f32 %v1237_v29, %v799_v7  ;;  %v801_v21 = vmax.f32 %v4571_v53, 0.0 }
 0x202   : > { %v1126_v28 = vadd.f32 1.0, %v3346_v59  ;;  %2955 = vmatmul.mubr.f32.gmra.mrb[48].mxu1 %v1307_v48  ;;  %v1312_v56 = vadd.f32 %v1239_v47, %v800_v27  ;;  %v804_v6 = vmax.f32 %v4609_v58, 0.0  ;;  %v803_v20 = vmax.f32 %v4589_v9, 0.0 }
 0x203   : > { %v3348_v63 = vpop.eup %3347  ;;  %2957 = vmatprep.mubr.f32.mxu1 %v1308_v4  ;;  %v806_v16 = vmax.f32 %v4621_v40, 0.0  ;;  %v805_v35 = vmax.f32 %v4605_v49, 0.0  ;;  %v808_v9 = vmax.f32 %v4632_v42, 0.0  ;;  %v807_v37 = vmax.f32 %v4617_v36, 0.0  ;;  %v3626_v4 = vld [vmem:[%s4074_s12 + $0x8] sm:$0xff] }
 0x204   : > { %v3350_v0 = vpop.eup %3349  ;;  %3361 = vlog2.f32 %v1126_v28  ;;  %v1241_v25 = vmul.f32 0.6931472, %v3348_v63  ;;  %v809_v49 = vmax.f32 %v4628_v14, 0.0  ;;  %v3627_v14 = vld [vmem:[%s4074_s12] sm:$0xff]  ;;  %v3628_v63 = vld [vmem:[%s4074_s12 + $0x18] sm:$0xff] }
 0x205   : > { %v3352_v24 = vpop.eup %3351  ;;  %3363 = vlog2.f32 %v1127_v57  ;;  %v1243_v31 = vmul.f32 0.6931472, %v3350_v0  ;;  %v3629_v0 = vld [vmem:[%s4074_s12 + $0x10] sm:$0xff] }
 0x206   : > { %v3354_v23 = vpop.eup %3353  ;;  %2958 = vmatmul.mubr.f32.gmra.mrb[50].mxu1 %v1309_v19  ;;  %v1129_v26 = vadd.f32 1.0, %v3352_v24  ;;  %v1313_v8 = vadd.f32 %v1241_v25, %v801_v21 }
 0x207   : > { %v1128_v18 = vadd.f32 1.0, %v3354_v23  ;;  %2960 = vmatprep.mubr.f32.mxu1 %v1310_v10  ;;  %v3356_v50 = vpop.eup %3355  ;;  %v1314_v43 = vadd.f32 %v1243_v31, %v802_v51  ;;  %v3631_v51 = vld [vmem:[%s4074_s12 + $0x20] sm:$0xff] }
 0x208   : > { %v1245_v1 = vmul.f32 0.6931472, %v3356_v50 }
 0x209   : > { %3365 = vlog2.f32 %v1128_v18 }
 0x20a   : > { %v3358_v17 = vpop.eup %3357  ;;  %2961 = vmatmul.mubr.f32.gmra.mrb[52].mxu1 %v1311_v2  ;;  %3367 = vlog2.f32 %v1129_v26  ;;  %v1315_v5 = vadd.f32 %v1245_v1, %v803_v20  ;;  %v3630_v2 = vld [vmem:[%s4074_s12 + $0x28] sm:$0xff] }
 0x20b   : > { %2963 = vmatprep.mubr.f32.mxu1 %v1312_v56  ;;  %v1247_v32 = vmul.f32 0.6931472, %v3358_v17  ;;  %v3360_v45 = vpop.eup %3359 }
 0x20c   : > { %v1249_v41 = vmul.f32 0.6931472, %v3360_v45 }
 0x20d   : > { %v1316_v44 = vadd.f32 %v1247_v32, %v804_v6 }
 0x20e   : > { %v3362_v54 = vpop.eup %3361  ;;  %2964 = vmatmul.mubr.f32.gmra.mrb[54].mxu1 %v1313_v8  ;;  %v1317_v62 = vadd.f32 %v1249_v41, %v805_v35  ;;  %v3633_v41 = vld [vmem:[%s4074_s12 + $0x30] sm:$0xff] }
 0x20f   : > { %2966 = vmatprep.mubr.f32.mxu1 %v1314_v43  ;;  %v1251_v38 = vmul.f32 0.6931472, %v3362_v54  ;;  %v3364_v53 = vpop.eup %3363 }
 0x210   : > { %v1253_v58 = vmul.f32 0.6931472, %v3364_v53 }
 0x211   : > { %v1318_v33 = vadd.f32 %v1251_v38, %v806_v16 }
 0x212   : > { %2967 = vmatmul.mubr.f32.gmra.mrb[56].mxu1 %v1315_v5  ;;  %v1319_v40 = vadd.f32 %v1253_v58, %v807_v37  ;;  %v3634_v37 = vld [vmem:[%s4074_s12 + $0x48] sm:$0xff] }
 0x213   : > { %v3366_v46 = vpop.eup %3365  ;;  %2969 = vmatprep.mubr.f32.mxu1 %v1316_v44  ;;  %v3632_v44 = vld [vmem:[%s4074_s12 + $0x38] sm:$0xff] }
 0x214   : > { %v1255_v52 = vmul.f32 0.6931472, %v3366_v46  ;;  %v3368_v55 = vpop.eup %3367 }
 0x215   : > { %v1257_v3 = vmul.f32 0.6931472, %v3368_v55 }
 0x216   : > { %2970 = vmatmul.mubr.f32.gmra.mrb[58].mxu1 %v1317_v62  ;;  %v1320_v60 = vadd.f32 %v1255_v52, %v808_v9 }
 0x217   : > { %2972 = vmatprep.mubr.f32.mxu1 %v1318_v33  ;;  %v1321_v15 = vadd.f32 %v1257_v3, %v809_v49  ;;  %v3635_v3 = vld [vmem:[%s4074_s12 + $0x40] sm:$0xff] }
 0x21a   : > { %2973 = vmatmul.mubr.f32.gmra.mrb[60].mxu1 %v1319_v40 }
 0x21b   : > { %2975 = vmatprep.mubr.f32.mxu1 %v1320_v60 }
 0x21e   : > { %2976 = vmatmul.mubr.f32.gmra.mrb[62].mxu1 %v1321_v15 }
 0x267   : > { %v2884_v36 = vpop.f32.mrb[0].mxu1 }
 0x268   : > { %v1417_v42 = vadd.f32 %v2884_v36, %v4659_v30  ;;  %v1411_v61 = vpop.f32.mrb[1].mxu1 }
 0x269   : > { %v1412_v34 = vadd.f32 %v4659_v30, %v1411_v61 }
 0x26a   : > { %v4664_v39 = vadd.f32 %v3626_v4, %v1417_v42 }
 0x26b   : > { %v4667_v13 = vadd.f32 %v3627_v14, %v1412_v34  ;;  %v2887_v48 = vpop.f32.mrb[2].mxu1 }
 0x26c   : > { %v1859_v22 = vand.u32 2147483647, %v4664_v39  ;;  %v1427_v59 = vadd.f32 %v2887_v48, %v4659_v30  ;;  %v1421_v11 = vpop.f32.mrb[3].mxu1 }
 0x26d   : > { %v1858_v12 = vand.u32 2147483647, %v4667_v13  ;;  %v1422_v28 = vadd.f32 %v4659_v30, %v1421_v11 }
 0x26e   : > { %v1923_v47 = vsub.f32 0.0, %v1859_v22  ;;  %v4674_v57 = vadd.f32 %v3628_v63, %v1427_v59  ;;  %v1795_v63 = vmax.f32 %v4664_v39, 0.0 }
 0x26f   : > { %v1922_v10 = vsub.f32 0.0, %v1858_v12  ;;  %v4677_v27 = vadd.f32 %v3629_v0, %v1422_v28  ;;  %v2890_v19 = vpop.f32.mrb[4].mxu1  ;;  %v3636_v28 = vld [vmem:[%s4074_s12 + $0x58] sm:$0xff] }
 0x270   : > { %v1988_v29 = vmul.f32 1.442695, %v1923_v47  ;;  %v1861_v24 = vand.u32 2147483647, %v4674_v57  ;;  %v1437_v23 = vadd.f32 %v2890_v19, %v4659_v30  ;;  %v1431_v7 = vpop.f32.mrb[5].mxu1 }
 0x271   : > { %v1986_v56 = vmul.f32 1.442695, %v1922_v10  ;;  %v1860_v26 = vand.u32 2147483647, %v4677_v27  ;;  %v1432_v18 = vadd.f32 %v4659_v30, %v1431_v7 }
 0x272   : > { %3369 = vpow2.f32 %v1988_v29  ;;  %v1925_v31 = vsub.f32 0.0, %v1861_v24  ;;  %v4684_v25 = vadd.f32 %v3630_v2, %v1437_v23  ;;  %v1794_v24 = vmax.f32 %v4667_v13, 0.0  ;;  %v3637_v2 = vld [vmem:[%s4074_s12 + $0x50] sm:$0xff] }
 0x273   : > { %3371 = vpow2.f32 %v1986_v56  ;;  %v1924_v50 = vsub.f32 0.0, %v1860_v26  ;;  %v4687_v17 = vadd.f32 %v3631_v51, %v1432_v18  ;;  %v2893_v21 = vpop.f32.mrb[6].mxu1 }
 0x274   : > { %v1992_v43 = vmul.f32 1.442695, %v1925_v31  ;;  %v1863_v32 = vand.u32 2147483647, %v4684_v25  ;;  %v1447_v8 = vadd.f32 %v2893_v21, %v4659_v30  ;;  %v1441_v1 = vpop.f32.mrb[7].mxu1 }
 0x275   : > { %v1990_v45 = vmul.f32 1.442695, %v1924_v50  ;;  %v1862_v6 = vand.u32 2147483647, %v4687_v17  ;;  %v1442_v54 = vadd.f32 %v4659_v30, %v1441_v1 }
 0x276   : > { %3373 = vpow2.f32 %v1992_v43  ;;  %v1927_v20 = vsub.f32 0.0, %v1863_v32  ;;  %v4694_v38 = vadd.f32 %v3632_v44, %v1447_v8  ;;  %v1797_v32 = vmax.f32 %v4674_v57, 0.0 }
 0x277   : > { %3375 = vpow2.f32 %v1990_v45  ;;  %v1926_v5 = vsub.f32 0.0, %v1862_v6  ;;  %v4697_v53 = vadd.f32 %v3633_v41, %v1442_v54 }
 0x278   : > { %v2896_v16 = vpop.f32.mrb[8].mxu1  ;;  %v1996_v35 = vmul.f32 1.442695, %v1927_v20  ;;  %v1865_v46 = vand.u32 2147483647, %v4694_v38  ;;  %v3638_v20 = vld [vmem:[%s4074_s12 + $0x68] sm:$0xff] }
 0x279   : > { %v1457_v33 = vadd.f32 %v2896_v16, %v4659_v30  ;;  %v1451_v62 = vpop.f32.mrb[9].mxu1  ;;  %v1994_v58 = vmul.f32 1.442695, %v1926_v5  ;;  %v1864_v52 = vand.u32 2147483647, %v4697_v53 }
 0x27a   : > { %v1452_v55 = vadd.f32 %v4659_v30, %v1451_v62  ;;  %3377 = vpow2.f32 %v1996_v35  ;;  %v1929_v9 = vsub.f32 0.0, %v1865_v46 }
 0x27b   : > { %v4704_v60 = vadd.f32 %v3634_v37, %v1457_v33  ;;  %3379 = vpow2.f32 %v1994_v58  ;;  %v1928_v40 = vsub.f32 0.0, %v1864_v52  ;;  %v3639_v33 = vld [vmem:[%s4074_s12 + $0x60] sm:$0xff]  ;;  %v1796_v58 = vmax.f32 %v4677_v27, 0.0 }
 0x27c   : > { %v4707_v49 = vadd.f32 %v3635_v3, %v1452_v55  ;;  %v3370_v36 = vpop.eup %3369  ;;  %v2000_v42 = vmul.f32 1.442695, %v1929_v9  ;;  %v1799_v9 = vmax.f32 %v4684_v25, 0.0 }
 0x27d   : > { %v1867_v61 = vand.u32 2147483647, %v4704_v60  ;;  %v3372_v14 = vpop.eup %3371  ;;  %v2115_v48 = vadd.f32 1.0, %v3370_v36  ;;  %v1998_v22 = vmul.f32 1.442695, %v1928_v40 }
 0x27e   : > { %v2899_v15 = vpop.f32.mrb[10].mxu1  ;;  %v1866_v59 = vand.u32 2147483647, %v4707_v49  ;;  %v2114_v11 = vadd.f32 1.0, %v3372_v14  ;;  %3381 = vpow2.f32 %v2000_v42  ;;  %v3640_v42 = vld [vmem:[%s4074_s12 + $0x78] sm:$0xff] }
 0x27f   : > { %v1467_v34 = vadd.f32 %v2899_v15, %v4659_v30  ;;  %v1461_v4 = vpop.f32.mrb[11].mxu1  ;;  %v1931_v12 = vsub.f32 0.0, %v1867_v61  ;;  %3383 = vlog2.f32 %v2115_v48  ;;  %v1798_v48 = vmax.f32 %v4687_v17, 0.0 }
 0x280   : > { %v1930_v10 = vsub.f32 0.0, %v1866_v59  ;;  %v1462_v0 = vadd.f32 %v4659_v30, %v1461_v4  ;;  %v3374_v29 = vpop.eup %3373  ;;  %3385 = vlog2.f32 %v2114_v11  ;;  %v1802_v17 = vmax.f32 %v4707_v49, 0.0  ;;  %v3646_v49 = vld [vmem:[%s4074_s12 + $0xa8] sm:$0xff] }
 0x281   : > { %v4713_v47 = vadd.f32 %v3636_v28, %v1467_v34  ;;  %v2004_v23 = vmul.f32 1.442695, %v1931_v12  ;;  %v3376_v26 = vpop.eup %3375  ;;  %v2117_v18 = vadd.f32 1.0, %v3374_v29  ;;  %3387 = vpow2.f32 %v1998_v22 }
 0x282   : > { %v2902_v19 = vpop.f32.mrb[12].mxu1  ;;  %v2002_v31 = vmul.f32 1.442695, %v1930_v10  ;;  %v4720_v50 = vadd.f32 %v3637_v2, %v1462_v0  ;;  %v2116_v51 = vadd.f32 1.0, %v3376_v26  ;;  %v3641_v10 = vld [vmem:[%s4074_s12 + $0x70] sm:$0xff] }
 0x283   : > { %v1869_v7 = vand.u32 2147483647, %v4713_v47  ;;  %v1471_v56 = vpop.f32.mrb[13].mxu1  ;;  %3389 = vpow2.f32 %v2004_v23  ;;  %v1477_v43 = vadd.f32 %v2902_v19, %v4659_v30 }
 0x284   : > { %3391 = vlog2.f32 %v2117_v18  ;;  %v1868_v8 = vand.u32 2147483647, %v4720_v50  ;;  %v1472_v1 = vadd.f32 %v4659_v30, %v1471_v56  ;;  %v3378_v6 = vpop.eup %3377 }
 0x285   : > { %v1933_v21 = vsub.f32 0.0, %v1869_v7  ;;  %3393 = vlog2.f32 %v2116_v51  ;;  %v4727_v44 = vadd.f32 %v3638_v20, %v1477_v43  ;;  %v3380_v16 = vpop.eup %3379  ;;  %v2119_v35 = vadd.f32 1.0, %v3378_v6 }
 0x286   : > { %v2905_v45 = vpop.f32.mrb[14].mxu1  ;;  %3395 = vpow2.f32 %v2002_v31  ;;  %v1932_v46 = vsub.f32 0.0, %v1868_v8  ;;  %v4731_v62 = vadd.f32 %v3639_v33, %v1472_v1  ;;  %v2118_v52 = vadd.f32 1.0, %v3380_v16 }
 0x287   : > { %v2008_v54 = vmul.f32 1.442695, %v1933_v21  ;;  %v1487_v5 = vadd.f32 %v2905_v45, %v4659_v30  ;;  %v1481_v41 = vpop.f32.mrb[15].mxu1  ;;  %v1871_v55 = vand.u32 2147483647, %v4727_v44  ;;  %v1801_v31 = vmax.f32 %v4694_v38, 0.0 }
 0x288   : > { %v2006_v37 = vmul.f32 1.442695, %v1932_v46  ;;  %v1870_v40 = vand.u32 2147483647, %v4731_v62  ;;  %v3382_v15 = vpop.eup %3381  ;;  %v1482_v34 = vadd.f32 %v4659_v30, %v1481_v41  ;;  %v1800_v33 = vmax.f32 %v4697_v53, 0.0 }
 0x289   : > { %3397 = vpow2.f32 %v2008_v54  ;;  %v1935_v36 = vsub.f32 0.0, %v1871_v55  ;;  %v4738_v61 = vadd.f32 %v3640_v42, %v1487_v5  ;;  %v3384_v14 = vpop.eup %3383  ;;  %v2121_v22 = vadd.f32 1.0, %v3382_v15  ;;  %v3642_v54 = vld [vmem:[%s4074_s12 + $0x88] sm:$0xff] }
 0x28a   : > { %3399 = vlog2.f32 %v2119_v35  ;;  %v2908_v3 = vpop.f32.mrb[16].mxu1  ;;  %v1934_v59 = vsub.f32 0.0, %v1870_v40  ;;  %v3386_v11 = vpop.eup %3385  ;;  %v2181_v12 = vmul.f32 0.6931472, %v3384_v14  ;;  %v4743_v0 = vadd.f32 %v3641_v10, %v1482_v34  ;;  %v3643_v34 = vld [vmem:[%s4074_s12 + $0x80] sm:$0xff] }
 0x28b   : > { %3401 = vlog2.f32 %v2118_v52  ;;  %v1491_v4 = vpop.f32.mrb[17].mxu1  ;;  %v2012_v28 = vmul.f32 1.442695, %v1935_v36  ;;  %v1497_v19 = vadd.f32 %v2908_v3, %v4659_v30  ;;  %v3388_v29 = vpop.eup %3387  ;;  %v2179_v23 = vmul.f32 0.6931472, %v3386_v11 }
 0x28c   : > { %3403 = vpow2.f32 %v2006_v37  ;;  %v2010_v7 = vmul.f32 1.442695, %v1934_v59  ;;  %v1873_v56 = vand.u32 2147483647, %v4738_v61  ;;  %v2307_v18 = vadd.f32 %v2181_v12, %v1795_v63 }
 0x28d   : > { %3405 = vlog2.f32 %v2121_v22  ;;  %v3390_v26 = vpop.eup %3389  ;;  %v2120_v2 = vadd.f32 1.0, %v3388_v29  ;;  %v2306_v43 = vadd.f32 %v2179_v23, %v1794_v24  ;;  %v1872_v63 = vand.u32 2147483647, %v4743_v0 }
 0x28e   : > { %3407 = vpow2.f32 %v2012_v28  ;;  %v2911_v51 = vpop.f32.mrb[18].mxu1  ;;  %v3392_v21 = vpop.eup %3391  ;;  %v2123_v8 = vadd.f32 1.0, %v3390_v26  ;;  %v1937_v1 = vsub.f32 0.0, %v1873_v56  ;;  %2371 = vst [vmem:[%s4754_s13 + $0x8] sm:$0xff] %v2307_v18  ;;  %v4759_v20 = vadd.f32 %v3642_v54, %v1497_v19  ;;  %v3644_v56 = vld [vmem:[%s4074_s12 + $0x98] sm:$0xff] }
 0x28f   : > { %3409 = vpow2.f32 %v2010_v7  ;;  %v1501_v45 = vpop.f32.mrb[19].mxu1  ;;  %v3394_v6 = vpop.eup %3393  ;;  %v2185_v39 = vmul.f32 0.6931472, %v3392_v21  ;;  %2370 = vst [vmem:[%s4754_s13] sm:$0xff] %v2306_v43  ;;  %v1492_v41 = vadd.f32 %v4659_v30, %v1491_v4  ;;  %v1936_v55 = vsub.f32 0.0, %v1872_v63 }
 0x290   : > { %3411 = vlog2.f32 %v2120_v2  ;;  %v3396_v13 = vpop.eup %3395  ;;  %v2183_v24 = vmul.f32 0.6931472, %v3394_v6  ;;  %v2016_v5 = vmul.f32 1.442695, %v1937_v1  ;;  %v1875_v36 = vand.u32 2147483647, %v4759_v20 }
 0x291   : > { %3413 = vlog2.f32 %v2123_v8  ;;  %v2309_v46 = vadd.f32 %v2185_v39, %v1797_v32  ;;  %v2122_v52 = vadd.f32 1.0, %v3396_v13  ;;  %v2014_v32 = vmul.f32 1.442695, %v1936_v55  ;;  %v3645_v6 = vld [vmem:[%s4074_s12 + $0x90] sm:$0xff] }
 0x292   : > { %v2914_v16 = vpop.f32.mrb[20].mxu1  ;;  %v2308_v3 = vadd.f32 %v2183_v24, %v1796_v58  ;;  %3415 = vpow2.f32 %v2016_v5  ;;  %v4773_v4 = vadd.f32 %v3643_v34, %v1492_v41  ;;  %v1939_v27 = vsub.f32 0.0, %v1875_v36 }
 0x293   : > { %v3398_v35 = vpop.eup %3397  ;;  %v4766_v37 = vpop.f32.mrb[21].mxu1  ;;  %2373 = vst [vmem:[%s4754_s13 + $0x18] sm:$0xff] %v2309_v46  ;;  %3417 = vlog2.f32 %v2122_v52  ;;  %v1507_v58 = vadd.f32 %v2911_v51, %v4659_v30  ;;  %v1803_v12 = vmax.f32 %v4704_v60, 0.0  ;;  %v1502_v60 = vadd.f32 %v4659_v30, %v1501_v45 }
 0x294   : > { %v3400_v40 = vpop.eup %3399  ;;  %v2125_v15 = vadd.f32 1.0, %v3398_v35  ;;  %2372 = vst [vmem:[%s4754_s13 + $0x10] sm:$0xff] %v2308_v3  ;;  %v2020_v23 = vmul.f32 1.442695, %v1939_v27  ;;  %v1874_v7 = vand.u32 2147483647, %v4773_v4  ;;  %v1512_v53 = vadd.f32 %v4659_v30, %v4766_v37 }
 0x295   : > { %v3402_v42 = vpop.eup %3401  ;;  %v2189_v57 = vmul.f32 0.6931472, %v3400_v40  ;;  %v4784_v26 = vadd.f32 %v3644_v56, %v1507_v58  ;;  %v4795_v45 = vadd.f32 %v3645_v6, %v1502_v60  ;;  %v1804_v46 = vmax.f32 %v4720_v50, 0.0 }
 0x296   : > { %v3404_v14 = vpop.eup %3403  ;;  %v2187_v22 = vmul.f32 0.6931472, %v3402_v42  ;;  %3419 = vlog2.f32 %v2125_v15  ;;  %v2917_v59 = vpop.f32.mrb[22].mxu1  ;;  %v1938_v51 = vsub.f32 0.0, %v1874_v7 }
 0x297   : > { %v2311_v11 = vadd.f32 %v2189_v57, %v1799_v9  ;;  %v2124_v28 = vadd.f32 1.0, %v3404_v14  ;;  %3421 = vpow2.f32 %v2014_v32  ;;  %v1521_v10 = vpop.f32.mrb[23].mxu1  ;;  %v3406_v19 = vpop.eup %3405  ;;  %v1517_v9 = vadd.f32 %v2914_v16, %v4659_v30 }
 0x298   : > { %v2310_v29 = vadd.f32 %v2187_v22, %v1798_v48  ;;  %v3408_v18 = vpop.eup %3407  ;;  %v2193_v25 = vmul.f32 0.6931472, %v3406_v19  ;;  %v1877_v1 = vand.u32 2147483647, %v4784_v26  ;;  %v2018_v13 = vmul.f32 1.442695, %v1938_v51 }
 0x299   : > { %2375 = vst [vmem:[%s4754_s13 + $0x28] sm:$0xff] %v2311_v11  ;;  %3423 = vlog2.f32 %v2124_v28  ;;  %v3410_v2 = vpop.eup %3409  ;;  %v2127_v48 = vadd.f32 1.0, %v3408_v18  ;;  %v4798_v24 = vadd.f32 %v3646_v49, %v1517_v9  ;;  %v1876_v52 = vand.u32 2147483647, %v4795_v45  ;;  %v3647_v19 = vld [vmem:[%s4074_s12 + $0xa0] sm:$0xff]  ;;  %v3649_v18 = vld [vmem:[%s4074_s12 + $0xb0] sm:$0xff] }
 0x29a   : > { %2374 = vst [vmem:[%s4754_s13 + $0x20] sm:$0xff] %v2310_v29  ;;  %3425 = vpow2.f32 %v2020_v23  ;;  %v3412_v21 = vpop.eup %3411  ;;  %v2313_v43 = vadd.f32 %v2193_v25, %v1801_v31  ;;  %v2126_v8 = vadd.f32 1.0, %v3410_v2  ;;  %v2920_v39 = vpop.f32.mrb[24].mxu1  ;;  %v1805_v31 = vmax.f32 %v4713_v47, 0.0  ;;  %v3648_v23 = vld [vmem:[%s4074_s12 + $0xb8] sm:$0xff] }
 0x29b   : > { %v3414_v63 = vpop.eup %3413  ;;  %v2191_v54 = vmul.f32 0.6931472, %v3412_v21  ;;  %3427 = vlog2.f32 %v2127_v48  ;;  %v4800_v5 = vpop.f32.mrb[25].mxu1  ;;  %v1941_v41 = vsub.f32 0.0, %v1877_v1  ;;  %v1879_v36 = vand.u32 2147483647, %v4798_v24 }
 0x29c   : > { %2377 = vst [vmem:[%s4754_s13 + $0x38] sm:$0xff] %v2313_v43  ;;  %v2197_v38 = vmul.f32 0.6931472, %v3414_v63  ;;  %3429 = vlog2.f32 %v2126_v8  ;;  %v3416_v16 = vpop.eup %3415  ;;  %v1940_v57 = vsub.f32 0.0, %v1876_v52  ;;  %v1522_v14 = vadd.f32 %v4659_v30, %v1521_v10 }
 0x29d   : > { %v2312_v35 = vadd.f32 %v2191_v54, %v1800_v33  ;;  %3431 = vpow2.f32 %v2018_v13  ;;  %v3418_v55 = vpop.eup %3417  ;;  %v2129_v3 = vadd.f32 1.0, %v3416_v16  ;;  %v2024_v15 = vmul.f32 1.442695, %v1941_v41 }
 0x29e   : > { %v2315_v40 = vadd.f32 %v2197_v38, %v1803_v12  ;;  %v2195_v47 = vmul.f32 0.6931472, %v3418_v55  ;;  %v1527_v33 = vadd.f32 %v2917_v59, %v4659_v30  ;;  %v1943_v34 = vsub.f32 0.0, %v1879_v36 }
 0x29f   : > { %2376 = vst [vmem:[%s4754_s13 + $0x30] sm:$0xff] %v2312_v35  ;;  %3433 = vlog2.f32 %v2129_v3  ;;  %v2022_v11 = vmul.f32 1.442695, %v1940_v57  ;;  %v4816_v29 = vadd.f32 %v3647_v19, %v1512_v53  ;;  %v4823_v25 = vadd.f32 %v3649_v18, %v1522_v14 }
 0x2a0   : > { %v3420_v42 = vpop.eup %3419  ;;  %2379 = vst [vmem:[%s4754_s13 + $0x48] sm:$0xff] %v2315_v40  ;;  %v2923_v22 = vpop.f32.mrb[26].mxu1  ;;  %v2314_v27 = vadd.f32 %v2195_v47, %v1802_v17  ;;  %3435 = vpow2.f32 %v2024_v15  ;;  %v2028_v28 = vmul.f32 1.442695, %v1943_v34  ;;  %v4819_v7 = vadd.f32 %v3648_v23, %v1527_v33  ;;  %v3653_v23 = vld [vmem:[%s4074_s12 + $0xd0] sm:$0xff] }
 0x2a1   : > { %v3422_v50 = vpop.eup %3421  ;;  %v2201_v32 = vmul.f32 0.6931472, %v3420_v42  ;;  %v1541_v37 = vpop.f32.mrb[27].mxu1  ;;  %v1537_v60 = vadd.f32 %v2920_v39, %v4659_v30  ;;  %v1878_v2 = vand.u32 2147483647, %v4816_v29  ;;  %v1807_v21 = vmax.f32 %v4727_v44, 0.0 }
 0x2a2   : > { %v2128_v58 = vadd.f32 1.0, %v3422_v50  ;;  %2378 = vst [vmem:[%s4754_s13 + $0x40] sm:$0xff] %v2314_v27  ;;  %v1881_v43 = vand.u32 2147483647, %v4819_v7  ;;  %v1806_v39 = vmax.f32 %v4731_v62, 0.0  ;;  %v3650_v44 = vld [vmem:[%s4074_s12 + $0xc8] sm:$0xff]  ;;  %v1532_v62 = vadd.f32 %v4659_v30, %v4800_v5 }
 0x2a3   : > { %v3424_v12 = vpop.eup %3423  ;;  %v2317_v59 = vadd.f32 %v2201_v32, %v1805_v31  ;;  %v1942_v63 = vsub.f32 0.0, %v1878_v2  ;;  %v1880_v38 = vand.u32 2147483647, %v4823_v25  ;;  %v4838_v31 = vadd.f32 %v3650_v44, %v1537_v60  ;;  %v3651_v42 = vld [vmem:[%s4074_s12 + $0xc0] sm:$0xff] }
 0x2a4   : > { %v3426_v56 = vpop.eup %3425  ;;  %v2199_v10 = vmul.f32 0.6931472, %v3424_v12  ;;  %3437 = vlog2.f32 %v2128_v58  ;;  %v1945_v49 = vsub.f32 0.0, %v1881_v43  ;;  %v1809_v52 = vmax.f32 %v4738_v61, 0.0 }
 0x2a5   : > { %2381 = vst [vmem:[%s4754_s13 + $0x58] sm:$0xff] %v2317_v59  ;;  %v2131_v9 = vadd.f32 1.0, %v3426_v56  ;;  %3439 = vpow2.f32 %v2022_v11  ;;  %v3428_v48 = vpop.eup %3427  ;;  %v2026_v35 = vmul.f32 1.442695, %v1942_v63  ;;  %v1944_v40 = vsub.f32 0.0, %v1880_v38  ;;  %v3652_v11 = vld [vmem:[%s4074_s12 + $0xd8] sm:$0xff] }
 0x2a6   : > { %v4828_v17 = vpop.f32.mrb[28].mxu1  ;;  %v2316_v51 = vadd.f32 %v2199_v10, %v1804_v46  ;;  %3441 = vpow2.f32 %v2028_v28  ;;  %v3430_v1 = vpop.eup %3429  ;;  %v2205_v6 = vmul.f32 0.6931472, %v3428_v48  ;;  %v2032_v55 = vmul.f32 1.442695, %v1945_v49 }
 0x2a7   : > { %v4832_v8 = vpop.f32.mrb[29].mxu1  ;;  %3443 = vlog2.f32 %v2131_v9  ;;  %v3432_v54 = vpop.eup %3431  ;;  %v2203_v13 = vmul.f32 0.6931472, %v3430_v1  ;;  %v1883_v36 = vand.u32 2147483647, %v4838_v31  ;;  %v4846_v47 = vadd.f32 %v3651_v42, %v1532_v62  ;;  %v3655_v62 = vld [vmem:[%s4074_s12 + $0xe0] sm:$0xff] }
 0x2a8   : > { %2380 = vst [vmem:[%s4754_s13 + $0x50] sm:$0xff] %v2316_v51  ;;  %v2319_v41 = vadd.f32 %v2205_v6, %v1807_v21  ;;  %v2130_v16 = vadd.f32 1.0, %v3432_v54  ;;  %v1547_v57 = vadd.f32 %v2923_v22, %v4659_v30  ;;  %v2030_v61 = vmul.f32 1.442695, %v1944_v40  ;;  %v3656_v40 = vld [vmem:[%s4074_s12 + $0xf8] sm:$0xff] }
 0x2a9   : > { %v2318_v46 = vadd.f32 %v2203_v13, %v1806_v39  ;;  %v3434_v15 = vpop.eup %3433  ;;  %v1542_v50 = vadd.f32 %v4659_v30, %v1541_v37  ;;  %v1808_v32 = vmax.f32 %v4743_v0, 0.0  ;;  %v1947_v14 = vsub.f32 0.0, %v1883_v36 }
 0x2aa   : > { %v2929_v3 = vpop.f32.mrb[30].mxu1  ;;  %2383 = vst [vmem:[%s4754_s13 + $0x68] sm:$0xff] %v2319_v41  ;;  %3445 = vlog2.f32 %v2130_v16  ;;  %v3436_v5 = vpop.eup %3435  ;;  %v2209_v33 = vmul.f32 0.6931472, %v3434_v15  ;;  %v1882_v22 = vand.u32 2147483647, %v4846_v47  ;;  %v4856_v12 = vadd.f32 %v3652_v11, %v1547_v57 }
 0x2ab   : > { %v4849_v53 = vpop.f32.mrb[31].mxu1  ;;  %2382 = vst [vmem:[%s4754_s13 + $0x60] sm:$0xff] %v2318_v46  ;;  %3447 = vpow2.f32 %v2026_v35  ;;  %v2133_v34 = vadd.f32 1.0, %v3436_v5  ;;  %v2036_v19 = vmul.f32 1.442695, %v1947_v14  ;;  %v4859_v37 = vadd.f32 %v3653_v23, %v1542_v50  ;;  %v3654_v16 = vld [vmem:[%s4074_s12 + $0xe8] sm:$0xff] }
 0x2ac   : > { %3449 = vpow2.f32 %v2032_v55  ;;  %v2321_v58 = vadd.f32 %v2209_v33, %v1809_v52  ;;  %v1811_v56 = vmax.f32 %v4759_v20, 0.0  ;;  %v1946_v18 = vsub.f32 0.0, %v1882_v22  ;;  %v3657_v23 = vld [vmem:[%s4074_s12 + $0xf0] sm:$0xff] }
 0x2ad   : > { %3451 = vpow2.f32 %v2030_v61  ;;  %v1885_v60 = vand.u32 2147483647, %v4856_v12  ;;  %v1810_v51 = vmax.f32 %v4773_v4, 0.0  ;;  %v1884_v20 = vand.u32 2147483647, %v4859_v37 }
 0x2ae   : > { %v3438_v27 = vpop.eup %3437  ;;  %3453 = vlog2.f32 %v2133_v34  ;;  %2385 = vst [vmem:[%s4754_s13 + $0x78] sm:$0xff] %v2321_v58  ;;  %v2034_v6 = vmul.f32 1.442695, %v1946_v18  ;;  %v1557_v63 = vadd.f32 %v4828_v17, %v4659_v30  ;;  %v1552_v4 = vadd.f32 %v4659_v30, %v4832_v8 }
 0x2af   : > { %v3440_v59 = vpop.eup %3439  ;;  %v2207_v28 = vmul.f32 0.6931472, %v3438_v27  ;;  %v2932_v9 = vpop.f32.mrb[32].mxu1  ;;  %3455 = vpow2.f32 %v2036_v19  ;;  %v1949_v39 = vsub.f32 0.0, %v1885_v60  ;;  %v1567_v49 = vadd.f32 %v2929_v3, %v4659_v30 }
 0x2b0   : > { %v3442_v0 = vpop.eup %3441  ;;  %v2132_v10 = vadd.f32 1.0, %v3440_v59  ;;  %v4865_v43 = vpop.f32.mrb[33].mxu1  ;;  %v1813_v44 = vmax.f32 %v4784_v26, 0.0  ;;  %v1948_v41 = vsub.f32 0.0, %v1884_v20  ;;  %v4876_v35 = vadd.f32 %v3654_v16, %v1557_v63 }
 0x2b1   : > { %v3444_v2 = vpop.eup %3443  ;;  %v2320_v48 = vadd.f32 %v2207_v28, %v1808_v32  ;;  %v2135_v21 = vadd.f32 1.0, %v3442_v0  ;;  %v2040_v13 = vmul.f32 1.442695, %v1949_v39  ;;  %v4879_v46 = vadd.f32 %v3655_v62, %v1552_v4 }
 0x2b2   : > { %v2213_v1 = vmul.f32 0.6931472, %v3444_v2  ;;  %3457 = vlog2.f32 %v2132_v10  ;;  %v1812_v55 = vmax.f32 %v4795_v45, 0.0  ;;  %v4886_v3 = vadd.f32 %v3656_v40, %v1567_v49 }
 0x2b3   : > { %2384 = vst [vmem:[%s4754_s13 + $0x70] sm:$0xff] %v2320_v48  ;;  %3459 = vlog2.f32 %v2135_v21  ;;  %v1887_v42 = vand.u32 2147483647, %v4876_v35  ;;  %v1562_v57 = vadd.f32 %v4659_v30, %v4849_v53  ;;  %v1577_v5 = vadd.f32 %v2932_v9, %v4659_v30 }
 0x2b4   : > { %v2323_v54 = vadd.f32 %v2213_v1, %v1811_v56  ;;  %3461 = vpow2.f32 %v2034_v6  ;;  %v3446_v38 = vpop.eup %3445  ;;  %v2038_v32 = vmul.f32 1.442695, %v1948_v41  ;;  %v1886_v45 = vand.u32 2147483647, %v4879_v46  ;;  %v3658_v56 = vld [vmem:[%s4074_s12 + $0x108] sm:$0xff] }
 0x2b5   : > { %v4881_v17 = vpop.f32.mrb[34].mxu1  ;;  %v3448_v52 = vpop.eup %3447  ;;  %v2211_v8 = vmul.f32 0.6931472, %v3446_v38  ;;  %3463 = vpow2.f32 %v2040_v13  ;;  %v1815_v14 = vmax.f32 %v4798_v24, 0.0  ;;  %v1951_v58 = vsub.f32 0.0, %v1887_v42 }
 0x2b6   : > { %2387 = vst [vmem:[%s4754_s13 + $0x88] sm:$0xff] %v2323_v54  ;;  %v1581_v15 = vpop.f32.mrb[35].mxu1  ;;  %v3450_v26 = vpop.eup %3449  ;;  %v2134_v36 = vadd.f32 1.0, %v3448_v52  ;;  %v1950_v53 = vsub.f32 0.0, %v1886_v45  ;;  %v1889_v11 = vand.u32 2147483647, %v4886_v3  ;;  %v4897_v0 = vadd.f32 %v3657_v23, %v1562_v57 }
 0x2b7   : > { %v3452_v33 = vpop.eup %3451  ;;  %v2322_v61 = vadd.f32 %v2211_v8, %v1810_v51  ;;  %v2137_v50 = vadd.f32 1.0, %v3450_v26  ;;  %v2044_v19 = vmul.f32 1.442695, %v1951_v58  ;;  %v4900_v10 = vadd.f32 %v3658_v56, %v1577_v5  ;;  %v3659_v26 = vld [vmem:[%s4074_s12 + $0x100] sm:$0xff]  ;;  %v3660_v57 = vld [vmem:[%s4074_s12 + $0x118] sm:$0xff] }
 0x2b8   : > { %v3454_v34 = vpop.eup %3453  ;;  %3465 = vlog2.f32 %v2134_v36  ;;  %v2136_v27 = vadd.f32 1.0, %v3452_v33  ;;  %v2042_v2 = vmul.f32 1.442695, %v1950_v53  ;;  %v1814_v21 = vmax.f32 %v4816_v29, 0.0  ;;  %v3661_v33 = vld [vmem:[%s4074_s12 + $0x110] sm:$0xff] }
 0x2b9   : > { %2386 = vst [vmem:[%s4754_s13 + $0x80] sm:$0xff] %v2322_v61  ;;  %v2217_v22 = vmul.f32 0.6931472, %v3454_v34  ;;  %3467 = vlog2.f32 %v2137_v50  ;;  %v2938_v59 = vpop.f32.mrb[36].mxu1  ;;  %v3456_v28 = vpop.eup %3455  ;;  %v1953_v1 = vsub.f32 0.0, %v1889_v11  ;;  %v1817_v20 = vmax.f32 %v4819_v7, 0.0 }
 0x2ba   : > { %3469 = vlog2.f32 %v2136_v27  ;;  %v4902_v24 = vpop.f32.mrb[37].mxu1  ;;  %v2139_v9 = vadd.f32 1.0, %v3456_v28  ;;  %v1888_v63 = vand.u32 2147483647, %v4897_v0  ;;  %v1891_v41 = vand.u32 2147483647, %v4900_v10 }
 0x2bb   : > { %v2325_v60 = vadd.f32 %v2217_v22, %v1813_v44  ;;  %3471 = vpow2.f32 %v2038_v32  ;;  %v2048_v13 = vmul.f32 1.442695, %v1953_v1  ;;  %v1572_v16 = vadd.f32 %v4659_v30, %v4865_v43 }
 0x2bc   : > { %v3458_v18 = vpop.eup %3457  ;;  %3473 = vpow2.f32 %v2044_v19  ;;  %v1952_v44 = vsub.f32 0.0, %v1888_v63  ;;  %v1587_v52 = vadd.f32 %v4881_v17, %v4659_v30  ;;  %v1582_v8 = vadd.f32 %v4659_v30, %v1581_v15 }
 0x2bd   : > { %v3460_v48 = vpop.eup %3459  ;;  %v2215_v51 = vmul.f32 0.6931472, %v3458_v18  ;;  %2389 = vst [vmem:[%s4754_s13 + $0x98] sm:$0xff] %v2325_v60  ;;  %3475 = vlog2.f32 %v2139_v9  ;;  %v1955_v40 = vsub.f32 0.0, %v1891_v41  ;;  %v4921_v36 = vadd.f32 %v3659_v26, %v1572_v16 }
 0x2be   : > { %v3462_v6 = vpop.eup %3461  ;;  %v2221_v39 = vmul.f32 0.6931472, %v3460_v48  ;;  %3477 = vpow2.f32 %v2042_v2  ;;  %v4908_v49 = vpop.f32.mrb[38].mxu1  ;;  %v1816_v42 = vmax.f32 %v4823_v25, 0.0  ;;  %v4925_v5 = vadd.f32 %v3660_v57, %v1587_v52  ;;  %v3662_v48 = vld [vmem:[%s4074_s12 + $0x128] sm:$0xff] }
 0x2bf   : > { %v2324_v4 = vadd.f32 %v2215_v51, %v1812_v55  ;;  %v2138_v54 = vadd.f32 1.0, %v3462_v6  ;;  %v3464_v29 = vpop.eup %3463  ;;  %v4913_v7 = vpop.f32.mrb[39].mxu1  ;;  %v2046_v55 = vmul.f32 1.442695, %v1952_v44  ;;  %v4928_v61 = vadd.f32 %v3661_v33, %v1582_v8  ;;  %v3663_v33 = vld [vmem:[%s4074_s12 + $0x120] sm:$0xff] }
 0x2c0   : > { %v2327_v38 = vadd.f32 %v2221_v39, %v1815_v14  ;;  %v2141_v62 = vadd.f32 1.0, %v3464_v29  ;;  %v2052_v15 = vmul.f32 1.442695, %v1955_v40  ;;  %v1597_v32 = vadd.f32 %v2938_v59, %v4659_v30 }
 0x2c1   : > { %2388 = vst [vmem:[%s4754_s13 + $0x90] sm:$0xff] %v2324_v4  ;;  %3479 = vlog2.f32 %v2138_v54  ;;  %v1819_v25 = vmax.f32 %v4838_v31, 0.0  ;;  %v1818_v27 = vmax.f32 %v4846_v47, 0.0  ;;  %v1890_v58 = vand.u32 2147483647, %v4921_v36 }
 0x2c2   : > { %2391 = vst [vmem:[%s4754_s13 + $0xa8] sm:$0xff] %v2327_v38  ;;  %3481 = vpow2.f32 %v2048_v13  ;;  %v3466_v43 = vpop.eup %3465  ;;  %v1893_v28 = vand.u32 2147483647, %v4925_v5  ;;  %v1892_v31 = vand.u32 2147483647, %v4928_v61  ;;  %v4942_v51 = vadd.f32 %v3662_v48, %v1597_v32 }
 0x2c3   : > { %3483 = vlog2.f32 %v2141_v62  ;;  %v3468_v17 = vpop.eup %3467  ;;  %v2219_v50 = vmul.f32 0.6931472, %v3466_v43  ;;  %v4931_v45 = vpop.f32.mrb[40].mxu1  ;;  %v1954_v18 = vsub.f32 0.0, %v1890_v58  ;;  %v1821_v63 = vmax.f32 %v4856_v12, 0.0 }
 0x2c4   : > { %3485 = vpow2.f32 %v2046_v55  ;;  %v3470_v34 = vpop.eup %3469  ;;  %v2225_v14 = vmul.f32 0.6931472, %v3468_v17  ;;  %v4937_v59 = vpop.f32.mrb[41].mxu1  ;;  %v1957_v2 = vsub.f32 0.0, %v1893_v28  ;;  %v1956_v39 = vsub.f32 0.0, %v1892_v31 }
 0x2c5   : > { %v3472_v22 = vpop.eup %3471  ;;  %v2326_v53 = vadd.f32 %v2219_v50, %v1814_v21  ;;  %v2223_v11 = vmul.f32 0.6931472, %v3470_v34  ;;  %3487 = vpow2.f32 %v2052_v15  ;;  %v2050_v6 = vmul.f32 1.442695, %v1954_v18  ;;  %v3664_v15 = vld [vmem:[%s4074_s12 + $0x138] sm:$0xff] }
 0x2c6   : > { %v3474_v19 = vpop.eup %3473  ;;  %v2329_v23 = vadd.f32 %v2225_v14, %v1817_v20  ;;  %v2140_v56 = vadd.f32 1.0, %v3472_v22  ;;  %v2056_v54 = vmul.f32 1.442695, %v1957_v2  ;;  %v2054_v44 = vmul.f32 1.442695, %v1956_v39 }
 0x2c7   : > { %v3476_v47 = vpop.eup %3475  ;;  %2390 = vst [vmem:[%s4754_s13 + $0xa0] sm:$0xff] %v2326_v53  ;;  %v2328_v60 = vadd.f32 %v2223_v11, %v1816_v42  ;;  %v2143_v9 = vadd.f32 1.0, %v3474_v19  ;;  %v1895_v41 = vand.u32 2147483647, %v4942_v51  ;;  %v1592_v52 = vadd.f32 %v4659_v30, %v4902_v24 }
 0x2c8   : > { %v3478_v21 = vpop.eup %3477  ;;  %2393 = vst [vmem:[%s4754_s13 + $0xb8] sm:$0xff] %v2329_v23  ;;  %v2229_v1 = vmul.f32 0.6931472, %v3476_v47  ;;  %3489 = vlog2.f32 %v2140_v56  ;;  %v4945_v20 = vpop.f32.mrb[42].mxu1  ;;  %v1607_v12 = vadd.f32 %v4908_v49, %v4659_v30  ;;  %v1602_v26 = vadd.f32 %v4659_v30, %v4913_v7 }
 0x2c9   : > { %2392 = vst [vmem:[%s4754_s13 + $0xb0] sm:$0xff] %v2328_v60  ;;  %3491 = vlog2.f32 %v2143_v9  ;;  %v2142_v4 = vadd.f32 1.0, %v3478_v21  ;;  %v4949_v13 = vpop.f32.mrb[43].mxu1  ;;  %v1959_v40 = vsub.f32 0.0, %v1895_v41  ;;  %v4960_v24 = vadd.f32 %v3663_v33, %v1592_v52 }
 0x2ca   : > { %v2331_v38 = vadd.f32 %v2229_v1, %v1819_v25  ;;  %3493 = vpow2.f32 %v2050_v6  ;;  %v4965_v32 = vadd.f32 %v3664_v15, %v1607_v12  ;;  %v1820_v14 = vmax.f32 %v4859_v37, 0.0 }
 0x2cb   : > { %v3480_v29 = vpop.eup %3479  ;;  %3495 = vlog2.f32 %v2142_v4  ;;  %v2060_v50 = vmul.f32 1.442695, %v1959_v40  ;;  %v1894_v25 = vand.u32 2147483647, %v4960_v24  ;;  %v1823_v22 = vmax.f32 %v4876_v35, 0.0 }
 0x2cc   : > { %v3482_v16 = vpop.eup %3481  ;;  %v2227_v62 = vmul.f32 0.6931472, %v3480_v29  ;;  %2395 = vst [vmem:[%s4754_s13 + $0xc8] sm:$0xff] %v2331_v38  ;;  %3497 = vpow2.f32 %v2056_v54  ;;  %v1897_v11 = vand.u32 2147483647, %v4965_v32  ;;  %v1822_v28 = vmax.f32 %v4879_v46, 0.0 }
 0x2cd   : > { %v3484_v8 = vpop.eup %3483  ;;  %v2145_v55 = vadd.f32 1.0, %v3482_v16  ;;  %3499 = vpow2.f32 %v2054_v44  ;;  %v4962_v17 = vpop.f32.mrb[44].mxu1  ;;  %v1958_v19 = vsub.f32 0.0, %v1894_v25  ;;  %v4985_v35 = vld [vmem:[%s5291_s4] ss:$0 sm:$0xff]  ;;  %v1825_v52 = vmax.f32 %v4886_v3, 0.0 }
 0x2ce   : > { %v3486_v43 = vpop.eup %3485  ;;  %v2330_v42 = vadd.f32 %v2227_v62, %v1818_v27  ;;  %v2233_v57 = vmul.f32 0.6931472, %v3484_v8  ;;  %v4967_v34 = vpop.f32.mrb[45].mxu1  ;;  %v3665_v27 = vld [vmem:[%s4074_s12 + $0x130] sm:$0xff]  ;;  %v1961_v18 = vsub.f32 0.0, %v1897_v11  ;;  %v1617_v31 = vadd.f32 %v4985_v35, %v4931_v45  ;;  %v3668_v45 = vld [vmem:[%s4074_s12 + $0x140] sm:$0xff] }
 0x2cf   : > { %3501 = vlog2.f32 %v2145_v55  ;;  %v2144_v49 = vadd.f32 1.0, %v3486_v43  ;;  %v3488_v30 = vpop.eup %3487  ;;  %v4973_v58 = vadd.f32 %v3665_v27, %v1602_v26  ;;  %v1612_v46 = vadd.f32 %v4985_v35, %v4937_v59 }
 0x2d0   : > { %2394 = vst [vmem:[%s4754_s13 + $0xc0] sm:$0xff] %v2330_v42  ;;  %v2333_v7 = vadd.f32 %v2233_v57, %v1821_v63  ;;  %v2147_v53 = vadd.f32 1.0, %v3488_v30  ;;  %v2058_v2 = vmul.f32 1.442695, %v1958_v19  ;;  %v1627_v21 = vadd.f32 %v4985_v35, %v4945_v20  ;;  %v3667_v63 = vld [vmem:[%s4074_s12 + $0x148] sm:$0xff] }
 0x2d1   : > { %3503 = vlog2.f32 %v2144_v49  ;;  %v1896_v23 = vand.u32 2147483647, %v4973_v58  ;;  %v4980_v56 = vpop.f32.mrb[46].mxu1  ;;  %v2064_v39 = vmul.f32 1.442695, %v1961_v18  ;;  %v4996_v4 = vadd.f32 %v3667_v63, %v1617_v31 }
 0x2d2   : > { %2397 = vst [vmem:[%s4754_s13 + $0xd8] sm:$0xff] %v2333_v7  ;;  %3505 = vpow2.f32 %v2060_v50  ;;  %v3490_v37 = vpop.eup %3489  ;;  %v4991_v47 = vpop.f32.mrb[47].mxu1  ;;  %v4999_v54 = vadd.f32 %v3668_v45, %v1612_v46  ;;  %v1824_v55 = vmax.f32 %v4897_v0, 0.0  ;;  %v3669_v50 = vld [vmem:[%s4074_s12 + $0x158] sm:$0xff]  ;;  %v1637_v25 = vadd.f32 %v4985_v35, %v4962_v17  ;;  %v3670_v46 = vld [vmem:[%s4074_s12 + $0x150] sm:$0xff] }
 0x2d3   : > { %3507 = vlog2.f32 %v2147_v53  ;;  %v3492_v60 = vpop.eup %3491  ;;  %v2231_v9 = vmul.f32 0.6931472, %v3490_v37  ;;  %v1960_v48 = vsub.f32 0.0, %v1896_v23  ;;  %v1899_v26 = vand.u32 2147483647, %v4996_v4 }
 0x2d4   : > { %v3494_v1 = vpop.eup %3493  ;;  %v2237_v6 = vmul.f32 0.6931472, %v3492_v60  ;;  %3509 = vpow2.f32 %v2058_v2  ;;  %v1898_v3 = vand.u32 2147483647, %v4999_v54  ;;  %v5012_v15 = vadd.f32 %v3669_v50, %v1627_v21 }
 0x2d5   : > { %v3496_v59 = vpop.eup %3495  ;;  %v2332_v29 = vadd.f32 %v2231_v9, %v1820_v14  ;;  %v2146_v38 = vadd.f32 1.0, %v3494_v1  ;;  %v2062_v44 = vmul.f32 1.442695, %v1960_v48  ;;  %v5001_v41 = vpop.f32.mrb[48].mxu1  ;;  %3511 = vpow2.f32 %v2064_v39  ;;  %v3671_v9 = vld [vmem:[%s4074_s12 + $0x168] sm:$0xff] }
 0x2d6   : > { %v3498_v16 = vpop.eup %3497  ;;  %v2335_v20 = vadd.f32 %v2237_v6, %v1823_v22  ;;  %v2235_v62 = vmul.f32 0.6931472, %v3496_v59  ;;  %v5004_v12 = vpop.f32.mrb[49].mxu1  ;;  %v1963_v49 = vsub.f32 0.0, %v1899_v26  ;;  %v1962_v7 = vsub.f32 0.0, %v1898_v3 }
 0x2d7   : > { %v3500_v8 = vpop.eup %3499  ;;  %2396 = vst [vmem:[%s4754_s13 + $0xd0] sm:$0xff] %v2332_v29  ;;  %3513 = vlog2.f32 %v2146_v38  ;;  %v2149_v40 = vadd.f32 1.0, %v3498_v16  ;;  %v1622_v14 = vadd.f32 %v4985_v35, %v4949_v13  ;;  %v1901_v31 = vand.u32 2147483647, %v5012_v15 }
 0x2d8   : > { %2399 = vst [vmem:[%s4754_s13 + $0xe8] sm:$0xff] %v2335_v20  ;;  %v2334_v42 = vadd.f32 %v2235_v62, %v1822_v28  ;;  %v2148_v57 = vadd.f32 1.0, %v3500_v8  ;;  %3515 = vpow2.f32 %v2062_v44  ;;  %v1827_v28 = vmax.f32 %v4900_v10, 0.0 }
 0x2d9   : > { %v3502_v43 = vpop.eup %3501  ;;  %3517 = vlog2.f32 %v2149_v40  ;;  %v5014_v30 = vpop.f32.mrb[50].mxu1  ;;  %v2068_v19 = vmul.f32 1.442695, %v1963_v49  ;;  %v2066_v18 = vmul.f32 1.442695, %v1962_v7  ;;  %v5026_v13 = vadd.f32 %v3670_v46, %v1622_v14 }
 0x2da   : > { %v2241_v33 = vmul.f32 0.6931472, %v3502_v43  ;;  %2398 = vst [vmem:[%s4754_s13 + $0xe0] sm:$0xff] %v2334_v42  ;;  %3519 = vlog2.f32 %v2148_v57  ;;  %v5021_v27 = vpop.f32.mrb[51].mxu1  ;;  %v5030_v2 = vadd.f32 %v3671_v9, %v1637_v25  ;;  %v1826_v10 = vmax.f32 %v4921_v36, 0.0  ;;  %v3672_v42 = vld [vmem:[%s4074_s12 + $0x160] sm:$0xff] }
 0x2db   : > { %v3504_v0 = vpop.eup %3503  ;;  %3521 = vpow2.f32 %v2068_v19  ;;  %v1965_v21 = vsub.f32 0.0, %v1901_v31  ;;  %v1900_v1 = vand.u32 2147483647, %v5026_v13  ;;  %v1829_v45 = vmax.f32 %v4925_v5, 0.0 }
 0x2dc   : > { %v3506_v22 = vpop.eup %3505  ;;  %v2337_v53 = vadd.f32 %v2241_v33, %v1825_v52  ;;  %v2239_v11 = vmul.f32 0.6931472, %v3504_v0  ;;  %v1903_v59 = vand.u32 2147483647, %v5030_v2  ;;  %v1632_v16 = vadd.f32 %v4985_v35, %v4967_v34 }
 0x2dd   : > { %v3508_v23 = vpop.eup %3507  ;;  %v2151_v37 = vadd.f32 1.0, %v3506_v22  ;;  %v5032_v48 = vpop.f32.mrb[52].mxu1  ;;  %v2072_v44 = vmul.f32 1.442695, %v1965_v21  ;;  %v1964_v36 = vsub.f32 0.0, %v1900_v1  ;;  %v1647_v8 = vadd.f32 %v4985_v35, %v4980_v56  ;;  %v3673_v56 = vld [vmem:[%s4074_s12 + $0x178] sm:$0xff] }
 0x2de   : > { %2401 = vst [vmem:[%s4754_s13 + $0xf8] sm:$0xff] %v2337_v53  ;;  %v2336_v17 = vadd.f32 %v2239_v11, %v1824_v55  ;;  %v2245_v60 = vmul.f32 0.6931472, %v3508_v23  ;;  %v5036_v6 = vpop.f32.mrb[53].mxu1  ;;  %v3510_v39 = vpop.eup %3509  ;;  %v1967_v52 = vsub.f32 0.0, %v1903_v59  ;;  %v1642_v5 = vadd.f32 %v4985_v35, %v4991_v47  ;;  %v3674_v23 = vld [vmem:[%s4074_s12 + $0x170] sm:$0xff] }
 0x2df   : > { %3523 = vlog2.f32 %v2151_v37  ;;  %v3512_v29 = vpop.eup %3511  ;;  %v2150_v38 = vadd.f32 1.0, %v3510_v39  ;;  %v2070_v43 = vmul.f32 1.442695, %v1964_v36  ;;  %v5051_v57 = vadd.f32 %v3672_v42, %v1632_v16 }
 0x2e0   : > { %2400 = vst [vmem:[%s4754_s13 + $0xf0] sm:$0xff] %v2336_v17  ;;  %v2339_v63 = vadd.f32 %v2245_v60, %v1827_v28  ;;  %3525 = vpow2.f32 %v2066_v18  ;;  %v2153_v62 = vadd.f32 1.0, %v3512_v29  ;;  %v2076_v49 = vmul.f32 1.442695, %v1967_v52 }
 0x2e1   : > { %v3514_v20 = vpop.eup %3513  ;;  %v5048_v55 = vpop.f32.mrb[54].mxu1  ;;  %3527 = vlog2.f32 %v2150_v38  ;;  %v5056_v50 = vadd.f32 %v3673_v56, %v1647_v8  ;;  %v1828_v14 = vmax.f32 %v4928_v61, 0.0  ;;  %v1831_v22 = vmax.f32 %v4942_v51, 0.0 }
 0x2e2   : > { %2403 = vst [vmem:[%s4754_s13 + $0x108] sm:$0xff] %v2339_v63  ;;  %v3516_v40 = vpop.eup %3515  ;;  %v2243_v26 = vmul.f32 0.6931472, %v3514_v20  ;;  %v5053_v34 = vpop.f32.mrb[55].mxu1  ;;  %3529 = vlog2.f32 %v2153_v62  ;;  %v1902_v53 = vand.u32 2147483647, %v5051_v57  ;;  %v5066_v37 = vadd.f32 %v3674_v23, %v1642_v5 }
 0x2e3   : > { %v3518_v3 = vpop.eup %3517  ;;  %v2152_v33 = vadd.f32 1.0, %v3516_v40  ;;  %3531 = vpow2.f32 %v2072_v44  ;;  %v1905_v19 = vand.u32 2147483647, %v5056_v50  ;;  %v1657_v46 = vadd.f32 %v4985_v35, %v5001_v41  ;;  %v3676_v5 = vld [vmem:[%s4074_s12 + $0x180] sm:$0xff] }
 0x2e4   : > { %v3520_v47 = vpop.eup %3519  ;;  %v2338_v0 = vadd.f32 %v2243_v26, %v1826_v10  ;;  %v2249_v7 = vmul.f32 0.6931472, %v3518_v3  ;;  %v1966_v31 = vsub.f32 0.0, %v1902_v53  ;;  %v1830_v60 = vmax.f32 %v4960_v24, 0.0 }
 0x2e5   : > { %v2247_v25 = vmul.f32 0.6931472, %v3520_v47  ;;  %3533 = vlog2.f32 %v2152_v33  ;;  %v5061_v11 = vpop.f32.mrb[56].mxu1  ;;  %v3522_v18 = vpop.eup %3521  ;;  %v1969_v10 = vsub.f32 0.0, %v1905_v19  ;;  %v1904_v21 = vand.u32 2147483647, %v5066_v37 }
 0x2e6   : > { %2402 = vst [vmem:[%s4754_s13 + $0x100] sm:$0xff] %v2338_v0  ;;  %v2341_v28 = vadd.f32 %v2249_v7, %v1829_v45  ;;  %3535 = vpow2.f32 %v2070_v43  ;;  %v5068_v61 = vpop.f32.mrb[57].mxu1  ;;  %v2155_v9 = vadd.f32 1.0, %v3522_v18  ;;  %v2074_v63 = vmul.f32 1.442695, %v1966_v31  ;;  %v3675_v45 = vld [vmem:[%s4074_s12 + $0x188] sm:$0xff] }
 0x2e7   : > { %v2340_v51 = vadd.f32 %v2247_v25, %v1828_v14  ;;  %3537 = vpow2.f32 %v2076_v49  ;;  %v5077_v59 = vadd.f32 %v3675_v45, %v1657_v46  ;;  %v1652_v29 = vadd.f32 %v4985_v35, %v5004_v12  ;;  %v3678_v18 = vld [vmem:[%s4074_s12 + $0x190] sm:$0xff] }
 0x2e8   : > { %2405 = vst [vmem:[%s4754_s13 + $0x118] sm:$0xff] %v2341_v28  ;;  %3539 = vlog2.f32 %v2155_v9  ;;  %v2080_v38 = vmul.f32 1.442695, %v1969_v10  ;;  %v1968_v44 = vsub.f32 0.0, %v1904_v21  ;;  %v1833_v20 = vmax.f32 %v4965_v32, 0.0 }
 0x2e9   : > { %v3524_v17 = vpop.eup %3523  ;;  %2404 = vst [vmem:[%s4754_s13 + $0x110] sm:$0xff] %v2340_v51  ;;  %v5081_v41 = vpop.f32.mrb[58].mxu1  ;;  %3541 = vpow2.f32 %v2074_v63  ;;  %v1907_v62 = vand.u32 2147483647, %v5077_v59  ;;  %v5088_v12 = vadd.f32 %v3676_v5, %v1652_v29  ;;  %v1667_v40 = vadd.f32 %v4985_v35, %v5014_v30 }
 0x2ea   : > { %v3526_v1 = vpop.eup %3525  ;;  %v2253_v39 = vmul.f32 0.6931472, %v3524_v17  ;;  %v5083_v36 = vpop.f32.mrb[59].mxu1  ;;  %v2078_v8 = vmul.f32 1.442695, %v1968_v44  ;;  %v1662_v32 = vadd.f32 %v4985_v35, %v5021_v27  ;;  %v1832_v56 = vmax.f32 %v4973_v58, 0.0 }
 0x2eb   : > { %v2154_v24 = vadd.f32 1.0, %v3526_v1  ;;  %v3528_v52 = vpop.eup %3527  ;;  %v1971_v42 = vsub.f32 0.0, %v1907_v62  ;;  %v1906_v30 = vand.u32 2147483647, %v5088_v12  ;;  %v1835_v31 = vmax.f32 %v4996_v4, 0.0 }
 0x2ec   : > { %v2343_v16 = vadd.f32 %v2253_v39, %v1831_v22  ;;  %v3530_v26 = vpop.eup %3529  ;;  %v2251_v43 = vmul.f32 0.6931472, %v3528_v52  ;;  %v3677_v22 = vld [vmem:[%s4074_s12 + $0x198] sm:$0xff]  ;;  %v5105_v58 = vadd.f32 %v3678_v18, %v1662_v32  ;;  %v1834_v39 = vmax.f32 %v4999_v54, 0.0 }
 0x2ed   : > { %3543 = vlog2.f32 %v2154_v24  ;;  %v5095_v3 = vpop.f32.mrb[60].mxu1  ;;  %v3532_v33 = vpop.eup %3531  ;;  %v2257_v49 = vmul.f32 0.6931472, %v3530_v26  ;;  %v2084_v25 = vmul.f32 1.442695, %v1971_v42  ;;  %v5102_v27 = vadd.f32 %v3677_v22, %v1667_v40  ;;  %v3680_v40 = vld [vmem:[%s4074_s12 + $0x1a0] sm:$0xff] }
 0x2ee   : > { %2407 = vst [vmem:[%s4754_s13 + $0x128] sm:$0xff] %v2343_v16  ;;  %3545 = vpow2.f32 %v2080_v38  ;;  %v5099_v47 = vpop.f32.mrb[61].mxu1  ;;  %v2342_v7 = vadd.f32 %v2251_v43, %v1830_v60  ;;  %v2157_v14 = vadd.f32 1.0, %v3532_v33  ;;  %v1970_v23 = vsub.f32 0.0, %v1906_v30 }
 0x2ef   : > { %3547 = vpow2.f32 %v2078_v8  ;;  %v3534_v0 = vpop.eup %3533  ;;  %v2345_v28 = vadd.f32 %v2257_v49, %v1833_v20  ;;  %v1909_v17 = vand.u32 2147483647, %v5102_v27  ;;  %v1908_v4 = vand.u32 2147483647, %v5105_v58  ;;  %v3679_v8 = vld [vmem:[%s4074_s12 + $0x1a8] sm:$0xff] }
 0x2f0   : > { %v3536_v53 = vpop.eup %3535  ;;  %v2255_v19 = vmul.f32 0.6931472, %v3534_v0  ;;  %2406 = vst [vmem:[%s4754_s13 + $0x120] sm:$0xff] %v2342_v7  ;;  %3549 = vlog2.f32 %v2157_v14  ;;  %v2082_v21 = vmul.f32 1.442695, %v1970_v23  ;;  %v1677_v29 = vadd.f32 %v4985_v35, %v5032_v48  ;;  %v3681_v48 = vld [vmem:[%s4074_s12 + $0x1b8] sm:$0xff] }
 0x2f1   : > { %v3538_v51 = vpop.eup %3537  ;;  %v2156_v46 = vadd.f32 1.0, %v3536_v53  ;;  %v5110_v60 = vpop.f32.mrb[62].mxu1  ;;  %2409 = vst [vmem:[%s4754_s13 + $0x138] sm:$0xff] %v2345_v28  ;;  %3551 = vpow2.f32 %v2084_v25  ;;  %v1973_v63 = vsub.f32 0.0, %v1909_v17  ;;  %v1672_v24 = vadd.f32 %v4985_v35, %v5036_v6 }
 0x2f2   : > { %v2344_v9 = vadd.f32 %v2255_v19, %v1832_v56  ;;  %v2159_v10 = vadd.f32 1.0, %v3538_v51  ;;  %v5113_v1 = vpop.f32.mrb[63].mxu1  ;;  %v3540_v45 = vpop.eup %3539  ;;  %v1687_v38 = vadd.f32 %v4985_v35, %v5048_v55  ;;  %v1972_v20 = vsub.f32 0.0, %v1908_v4 }
 0x2f3   : > { %3553 = vlog2.f32 %v2156_v46  ;;  %v3542_v54 = vpop.eup %3541  ;;  %v2261_v44 = vmul.f32 0.6931472, %v3540_v45  ;;  %v2088_v16 = vmul.f32 1.442695, %v1973_v63  ;;  %v5125_v5 = vadd.f32 %v3679_v8, %v1677_v29 }
 0x2f4   : > { %2408 = vst [vmem:[%s4754_s13 + $0x130] sm:$0xff] %v2344_v9  ;;  %3555 = vlog2.f32 %v2159_v10  ;;  %v2158_v52 = vadd.f32 1.0, %v3542_v54  ;;  %v5128_v26 = vadd.f32 %v3680_v40, %v1672_v24  ;;  %v5131_v43 = vadd.f32 %v3681_v48, %v1687_v38  ;;  %v3682_v10 = vld [vmem:[%s4074_s12 + $0x1b0] sm:$0xff] }
 0x2f5   : > { %3557 = vpow2.f32 %v2082_v21  ;;  %v2347_v42 = vadd.f32 %v2261_v44, %v1835_v31  ;;  %v2086_v32 = vmul.f32 1.442695, %v1972_v20  ;;  %v1837_v49 = vmax.f32 %v5012_v15, 0.0 }
 0x2f6   : > { %3559 = vpow2.f32 %v2088_v16  ;;  %v1911_v30 = vand.u32 2147483647, %v5125_v5  ;;  %v1836_v7 = vmax.f32 %v5026_v13, 0.0  ;;  %v1839_v25 = vmax.f32 %v5030_v2, 0.0 }
 0x2f7   : > { %v3544_v62 = vpop.eup %3543  ;;  %3561 = vlog2.f32 %v2158_v52  ;;  %2411 = vst [vmem:[%s4754_s13 + $0x148] sm:$0xff] %v2347_v42  ;;  %v1910_v53 = vand.u32 2147483647, %v5128_v26  ;;  %v1913_v15 = vand.u32 2147483647, %v5131_v43  ;;  %v1682_v19 = vadd.f32 %v4985_v35, %v5053_v34 }
 0x2f8   : > { %v3546_v6 = vpop.eup %3545  ;;  %v2259_v55 = vmul.f32 0.6931472, %v3544_v62  ;;  %3563 = vpow2.f32 %v2086_v32  ;;  %v1975_v22 = vsub.f32 0.0, %v1911_v30  ;;  %v1697_v13 = vadd.f32 %v4985_v35, %v5061_v11 }
 0x2f9   : > { %v3548_v33 = vpop.eup %3547  ;;  %v2161_v56 = vadd.f32 1.0, %v3546_v6  ;;  %v1974_v51 = vsub.f32 0.0, %v1910_v53  ;;  %v1692_v31 = vadd.f32 %v4985_v35, %v5068_v61  ;;  %v1977_v9 = vsub.f32 0.0, %v1913_v15  ;;  %v3684_v6 = vld [vmem:[%s4074_s12 + $0x1c0] sm:$0xff] }
 0x2fa   : > { %v2346_v0 = vadd.f32 %v2259_v55, %v1834_v39  ;;  %v2160_v14 = vadd.f32 1.0, %v3548_v33  ;;  %v3550_v28 = vpop.eup %3549  ;;  %v2092_v2 = vmul.f32 1.442695, %v1975_v22  ;;  %v5148_v21 = vadd.f32 %v3682_v10, %v1682_v19  ;;  %v3683_v39 = vld [vmem:[%s4074_s12 + $0x1c8] sm:$0xff] }
 0x2fb   : > { %3565 = vlog2.f32 %v2161_v56  ;;  %v3552_v23 = vpop.eup %3551  ;;  %v2265_v18 = vmul.f32 0.6931472, %v3550_v28  ;;  %v5151_v63 = vadd.f32 %v3683_v39, %v1697_v13  ;;  %v2090_v45 = vmul.f32 1.442695, %v1974_v51 }
 0x2fc   : > { %2410 = vst [vmem:[%s4754_s13 + $0x140] sm:$0xff] %v2346_v0  ;;  %3567 = vlog2.f32 %v2160_v14  ;;  %v2163_v17 = vadd.f32 1.0, %v3552_v23  ;;  %v1838_v61 = vmax.f32 %v5051_v57, 0.0  ;;  %v2096_v38 = vmul.f32 1.442695, %v1977_v9 }
 0x2fd   : > { %v3554_v46 = vpop.eup %3553  ;;  %v2349_v4 = vadd.f32 %v2265_v18, %v1837_v49  ;;  %3569 = vpow2.f32 %v2092_v2  ;;  %v1912_v16 = vand.u32 2147483647, %v5148_v21  ;;  %v1841_v52 = vmax.f32 %v5056_v50, 0.0 }
 0x2fe   : > { %v3556_v34 = vpop.eup %3555  ;;  %v2263_v11 = vmul.f32 0.6931472, %v3554_v46  ;;  %3571 = vlog2.f32 %v2163_v17  ;;  %v1915_v8 = vand.u32 2147483647, %v5151_v63  ;;  %v5160_v42 = vadd.f32 %v3684_v6, %v1692_v31 }
 0x2ff   : > { %v3558_v29 = vpop.eup %3557  ;;  %v2269_v24 = vmul.f32 0.6931472, %v3556_v34  ;;  %2413 = vst [vmem:[%s4754_s13 + $0x158] sm:$0xff] %v2349_v4  ;;  %3573 = vpow2.f32 %v2090_v45  ;;  %v1976_v48 = vsub.f32 0.0, %v1912_v16  ;;  %v1707_v49 = vadd.f32 %v4985_v35, %v5081_v41  ;;  %v3685_v41 = vld [vmem:[%s4074_s12 + $0x1d8] sm:$0xff]  ;;  %v3687_v45 = vld [vmem:[%s4074_s12 + $0x1e8] sm:$0xff] }
 0x300   : > { %v2348_v54 = vadd.f32 %v2263_v11, %v1836_v7  ;;  %v2162_v44 = vadd.f32 1.0, %v3558_v29  ;;  %v3560_v20 = vpop.eup %3559  ;;  %3575 = vpow2.f32 %v2096_v38  ;;  %v1979_v33 = vsub.f32 0.0, %v1915_v8 }
 0x301   : > { %v2351_v62 = vadd.f32 %v2269_v24, %v1839_v25  ;;  %v3562_v40 = vpop.eup %3561  ;;  %v2165_v57 = vadd.f32 1.0, %v3560_v20  ;;  %v1702_v50 = vadd.f32 %v4985_v35, %v5083_v36  ;;  %v1840_v30 = vmax.f32 %v5066_v37, 0.0  ;;  %v3686_v36 = vld [vmem:[%s4074_s12 + $0x1d0] sm:$0xff] }
 0x302   : > { %2412 = vst [vmem:[%s4754_s13 + $0x150] sm:$0xff] %v2348_v54  ;;  %3577 = vlog2.f32 %v2162_v44  ;;  %v3564_v55 = vpop.eup %3563  ;;  %v2267_v32 = vmul.f32 0.6931472, %v3562_v40  ;;  %v2094_v7 = vmul.f32 1.442695, %v1976_v48  ;;  %v5170_v19 = vadd.f32 %v3685_v41, %v1707_v49 }
 0x303   : > { %2415 = vst [vmem:[%s4754_s13 + $0x168] sm:$0xff] %v2351_v62  ;;  %3579 = vlog2.f32 %v2165_v57  ;;  %v2164_v0 = vadd.f32 1.0, %v3564_v55  ;;  %v2100_v53 = vmul.f32 1.442695, %v1979_v33  ;;  %v1914_v28 = vand.u32 2147483647, %v5160_v42 }
 0x304   : > { %v2350_v25 = vadd.f32 %v2267_v32, %v1838_v61  ;;  %v5173_v13 = vadd.f32 %v3686_v36, %v1702_v50  ;;  %v1717_v18 = vadd.f32 %v4985_v35, %v5095_v3  ;;  %v1843_v31 = vmax.f32 %v5077_v59, 0.0  ;;  %v3688_v57 = vld [vmem:[%s4074_s12 + $0x1e0] sm:$0xff] }
 0x305   : > { %v3566_v56 = vpop.eup %3565  ;;  %3581 = vlog2.f32 %v2164_v0  ;;  %v1978_v23 = vsub.f32 0.0, %v1914_v28  ;;  %v1917_v46 = vand.u32 2147483647, %v5170_v19  ;;  %v1842_v9 = vmax.f32 %v5088_v12, 0.0 }
 0x306   : > { %v3568_v14 = vpop.eup %3567  ;;  %v2273_v22 = vmul.f32 0.6931472, %v3566_v56  ;;  %2414 = vst [vmem:[%s4754_s13 + $0x160] sm:$0xff] %v2350_v25  ;;  %3583 = vpow2.f32 %v2094_v7  ;;  %v1916_v34 = vand.u32 2147483647, %v5173_v13  ;;  %v5185_v29 = vadd.f32 %v3687_v45, %v1717_v18 }
 0x307   : > { %v2271_v15 = vmul.f32 0.6931472, %v3568_v14  ;;  %v3570_v2 = vpop.eup %3569  ;;  %3585 = vpow2.f32 %v2100_v53  ;;  %v2098_v39 = vmul.f32 1.442695, %v1978_v23  ;;  %v1981_v3 = vsub.f32 0.0, %v1917_v46 }
 0x308   : > { %v2353_v37 = vadd.f32 %v2273_v22, %v1841_v52  ;;  %v3572_v17 = vpop.eup %3571  ;;  %v2167_v10 = vadd.f32 1.0, %v3570_v2  ;;  %v1712_v59 = vadd.f32 %v4985_v35, %v5099_v47  ;;  %v1980_v12 = vsub.f32 0.0, %v1916_v34 }
 0x309   : > { %v2352_v51 = vadd.f32 %v2271_v15, %v1840_v30  ;;  %v3574_v4 = vpop.eup %3573  ;;  %v2277_v11 = vmul.f32 0.6931472, %v3572_v17  ;;  %v1727_v38 = vadd.f32 %v4985_v35, %v5110_v60  ;;  %v2104_v20 = vmul.f32 1.442695, %v1981_v3  ;;  %v3689_v60 = vld [vmem:[%s4074_s12 + $0x1f8] sm:$0xff] }
 0x30a   : > { %2417 = vst [vmem:[%s4754_s13 + $0x178] sm:$0xff] %v2353_v37  ;;  %v3576_v24 = vpop.eup %3575  ;;  %3587 = vlog2.f32 %v2167_v10  ;;  %v2166_v61 = vadd.f32 1.0, %v3574_v4  ;;  %v1845_v52 = vmax.f32 %v5102_v27, 0.0  ;;  %v2102_v47 = vmul.f32 1.442695, %v1980_v12 }
 0x30b   : > { %2416 = vst [vmem:[%s4754_s13 + $0x170] sm:$0xff] %v2352_v51  ;;  %v2355_v44 = vadd.f32 %v2277_v11, %v1843_v31  ;;  %v2169_v16 = vadd.f32 1.0, %v3576_v24  ;;  %3589 = vpow2.f32 %v2098_v39  ;;  %v1919_v40 = vand.u32 2147483647, %v5185_v29 }
 0x30c   : > { %v3578_v54 = vpop.eup %3577  ;;  %3591 = vlog2.f32 %v2166_v61  ;;  %v5195_v48 = vadd.f32 %v3688_v57, %v1712_v59  ;;  %v5198_v6 = vadd.f32 %v3689_v60, %v1727_v38  ;;  %v1722_v27 = vadd.f32 %v4985_v35, %v5113_v1  ;;  %v3690_v35 = vld [vmem:[%s4074_s12 + $0x1f0] sm:$0xff]  ;;  %s3777_s12 = scalar_lea.vmem %s5241_s17, 8192 }
 0x30d   : > { %v2275_v62 = vmul.f32 0.6931472, %v3578_v54  ;;  %v3580_v8 = vpop.eup %3579  ;;  %2419 = vst [vmem:[%s4754_s13 + $0x188] sm:$0xff] %v2355_v44  ;;  %3593 = vlog2.f32 %v2169_v16  ;;  %v1983_v49 = vsub.f32 0.0, %v1919_v40  ;;  %v1844_v0 = vmax.f32 %v5105_v58, 0.0  ;;  %p3778_p11 = scmp.ne.s32.totalorder %s5241_s17, %s3777_s12  ;;  %p3785_p9 = scmp.lt.s32.totalorder %s3783_s15, %s3777_s12 }
 0x30e   : > { %v2281_v32 = vmul.f32 0.6931472, %v3580_v8  ;;  %3595 = vpow2.f32 %v2104_v20  ;;  %v1918_v50 = vand.u32 2147483647, %v5195_v48  ;;  %v1921_v14 = vand.u32 2147483647, %v5198_v6 }
 0x30f   : > { %v2354_v55 = vadd.f32 %v2275_v62, %v1842_v9  ;;  %v3582_v33 = vpop.eup %3581  ;;  %3597 = vpow2.f32 %v2102_v47  ;;  %v2108_v53 = vmul.f32 1.442695, %v1983_v49  ;;  %v5207_v1 = vadd.f32 %v3690_v35, %v1722_v27  ;;  %p3779_p2 = pnand %p3778_p11, %p5313_p0  ;;  %p3786_p12 = por %p3785_p9, %p3784_p7 }
 0x310   : > { %v3584_v56 = vpop.eup %3583  ;;  %v2357_v30 = vadd.f32 %v2281_v32, %v1845_v52  ;;  %v2279_v7 = vmul.f32 0.6931472, %v3582_v33  ;;  %v1982_v28 = vsub.f32 0.0, %v1918_v50  ;;  %v1985_v36 = vsub.f32 0.0, %v1921_v14 }
 0x311   : > { %2418 = vst [vmem:[%s4754_s13 + $0x180] sm:$0xff] %v2354_v55  ;;  %v3586_v25 = vpop.eup %3585  ;;  %v2168_v22 = vadd.f32 1.0, %v3584_v56  ;;  %v1920_v23 = vand.u32 2147483647, %v5207_v1  ;;  %v1847_v51 = vmax.f32 %v5125_v5, 0.0  ;;  %v1846_v9 = vmax.f32 %v5128_v26, 0.0  ;;  %p3780_p3 = pneg %p3779_p2 }
 0x312   : > { %2421 = vst [vmem:[%s4754_s13 + $0x198] sm:$0xff] %v2357_v30  ;;  %v2356_v15 = vadd.f32 %v2279_v7, %v1844_v0  ;;  %v2171_v41 = vadd.f32 1.0, %v3586_v25  ;;  %v2106_v37 = vmul.f32 1.442695, %v1982_v28  ;;  %v2112_v18 = vmul.f32 1.442695, %v1985_v36 }
 0x313   : > { %3599 = vlog2.f32 %v2168_v22  ;;  %v1984_v46 = vsub.f32 0.0, %v1920_v23  ;;  %v1849_v45 = vmax.f32 %v5131_v43, 0.0  ;;  %v1848_v44 = vmax.f32 %v5148_v21, 0.0  ;;  %p3787_p1 = pnand %p3786_p12, %p3780_p3 }
 0x314   : > { %v3588_v58 = vpop.eup %3587  ;;  %2420 = vst [vmem:[%s4754_s13 + $0x190] sm:$0xff] %v2356_v15  ;;  %3601 = vlog2.f32 %v2171_v41  ;;  %v1851_v20 = vmax.f32 %v5151_v63, 0.0  ;;  %v1850_v21 = vmax.f32 %v5160_v42, 0.0  ;;  %v1853_v30 = vmax.f32 %v5170_v19, 0.0 }
 0x315   : > { %v3590_v2 = vpop.eup %3589  ;;  %v2285_v31 = vmul.f32 0.6931472, %v3588_v58  ;;  %3603 = vpow2.f32 %v2108_v53  ;;  %v2110_v11 = vmul.f32 1.442695, %v1984_v46  ;;  %v1852_v7 = vmax.f32 %v5173_v13, 0.0 }
 0x316   : > { %v3592_v17 = vpop.eup %3591  ;;  %v2170_v10 = vadd.f32 1.0, %v3590_v2  ;;  %3605 = vpow2.f32 %v2106_v37  ;;  %v1855_v28 = vmax.f32 %v5185_v29, 0.0  ;;  %v1854_v15 = vmax.f32 %v5195_v48, 0.0 }
 0x317   : > { %v3594_v39 = vpop.eup %3593  ;;  %v2359_v34 = vadd.f32 %v2285_v31, %v1847_v51  ;;  %v2283_v4 = vmul.f32 0.6931472, %v3592_v17  ;;  %3607 = vpow2.f32 %v2112_v18  ;;  %v1857_v36 = vmax.f32 %v5198_v6, 0.0 }
 0x318   : > { %v3596_v3 = vpop.eup %3595  ;;  %v2289_v5 = vmul.f32 0.6931472, %v3594_v39  ;;  %3609 = vlog2.f32 %v2170_v10  ;;  %v1856_v18 = vmax.f32 %v5207_v1, 0.0 }
 0x319   : > { %v3598_v59 = vpop.eup %3597  ;;  %2423 = vst [vmem:[%s4754_s13 + $0x1a8] sm:$0xff] %v2359_v34  ;;  %v2358_v24 = vadd.f32 %v2283_v4, %v1846_v9  ;;  %v2173_v61 = vadd.f32 1.0, %v3596_v3  ;;  %3611 = vpow2.f32 %v2110_v11 }
 0x31a   : > { %v2361_v26 = vadd.f32 %v2289_v5, %v1849_v45  ;;  %v2172_v12 = vadd.f32 1.0, %v3598_v59 }
 0x31b   : > { %2422 = vst [vmem:[%s4754_s13 + $0x1a0] sm:$0xff] %v2358_v24  ;;  %3613 = vlog2.f32 %v2173_v61 }
 0x31c   : > { %2425 = vst [vmem:[%s4754_s13 + $0x1b8] sm:$0xff] %v2361_v26  ;;  %3615 = vlog2.f32 %v2172_v12 }
 0x31d   : > { %v3600_v38 = vpop.eup %3599 }
 0x31e   : > { %v3602_v54 = vpop.eup %3601  ;;  %v2287_v43 = vmul.f32 0.6931472, %v3600_v38 }
 0x31f   : > { %v3604_v16 = vpop.eup %3603  ;;  %v2293_v62 = vmul.f32 0.6931472, %v3602_v54 }
 0x320   : > { %v3606_v52 = vpop.eup %3605  ;;  %v2360_v47 = vadd.f32 %v2287_v43, %v1848_v44  ;;  %v2175_v8 = vadd.f32 1.0, %v3604_v16 }
 0x321   : > { %v3608_v40 = vpop.eup %3607  ;;  %v2363_v57 = vadd.f32 %v2293_v62, %v1851_v20  ;;  %v2174_v60 = vadd.f32 1.0, %v3606_v52 }
 0x322   : > { %v3610_v55 = vpop.eup %3609  ;;  %2424 = vst [vmem:[%s4754_s13 + $0x1b0] sm:$0xff] %v2360_v47  ;;  %3617 = vlog2.f32 %v2175_v8  ;;  %v2177_v32 = vadd.f32 1.0, %v3608_v40 }
 0x323   : > { %v3612_v27 = vpop.eup %3611  ;;  %2427 = vst [vmem:[%s4754_s13 + $0x1c8] sm:$0xff] %v2363_v57  ;;  %v2291_v33 = vmul.f32 0.6931472, %v3610_v55  ;;  %3619 = vlog2.f32 %v2174_v60 }
 0x324   : > { %3621 = vlog2.f32 %v2177_v32  ;;  %v2176_v63 = vadd.f32 1.0, %v3612_v27 }
 0x325   : > { %v3614_v49 = vpop.eup %3613  ;;  %v2362_v50 = vadd.f32 %v2291_v33, %v1850_v21 }
 0x326   : > { %v3616_v56 = vpop.eup %3615  ;;  %v2297_v0 = vmul.f32 0.6931472, %v3614_v49  ;;  %3623 = vlog2.f32 %v2176_v63 }
 0x327   : > { %2426 = vst [vmem:[%s4754_s13 + $0x1c0] sm:$0xff] %v2362_v50  ;;  %v2295_v14 = vmul.f32 0.6931472, %v3616_v56 }
 0x328   : > { %v2365_v42 = vadd.f32 %v2297_v0, %v1853_v30 }
 0x329   : > { %v2364_v25 = vadd.f32 %v2295_v14, %v1852_v7 }
 0x32a   : > { %2429 = vst [vmem:[%s4754_s13 + $0x1d8] sm:$0xff] %v2365_v42 }
 0x32b   : > { %2428 = vst [vmem:[%s4754_s13 + $0x1d0] sm:$0xff] %v2364_v25 }
 0x32c   : > { %v3618_v22 = vpop.eup %3617 }
 0x32d   : > { %v3620_v53 = vpop.eup %3619  ;;  %v2301_v35 = vmul.f32 0.6931472, %v3618_v22 }
 0x32e   : > { %v3622_v19 = vpop.eup %3621  ;;  %v2299_v41 = vmul.f32 0.6931472, %v3620_v53 }
 0x32f   : > { %v2367_v13 = vadd.f32 %v2301_v35, %v1855_v28  ;;  %v2305_v37 = vmul.f32 0.6931472, %v3622_v19 }
 0x330   : > { %v3624_v23 = vpop.eup %3623  ;;  %v2366_v58 = vadd.f32 %v2299_v41, %v1854_v15 }
 0x331   : > { %2431 = vst [vmem:[%s4754_s13 + $0x1e8] sm:$0xff] %v2367_v13  ;;  %v2369_v29 = vadd.f32 %v2305_v37, %v1857_v36  ;;  %v2303_v2 = vmul.f32 0.6931472, %v3624_v23 }
 0x332   : > { %2430 = vst [vmem:[%s4754_s13 + $0x1e0] sm:$0xff] %v2366_v58 }
 0x333   : > { %2433 = vst [vmem:[%s4754_s13 + $0x1f8] sm:$0xff] %v2369_v29  ;;  %v2368_v48 = vadd.f32 %v2303_v2, %v1856_v18 }
 0x335   : > { %2432 = vst [vmem:[%s4754_s13 + $0x1f0] sm:$0xff] %v2368_v48 }
 0x336   : > { %3790 = shalt.err (!%p3787_p1)
}
 0x337   : > { %s3791_s16 = scalar_lea.hbm %s5239_s8, 8192  ;;  %s3795_s13 = scalar_lea.hbm %s5292_s5, 16384 }
 0x338   : > { %p3792_p13 = scmp.ne.s32.totalorder %s5239_s8, %s3791_s16  ;;  %p3796_p4 = scmp.lt.u32.totalorder %s5239_s8, %s5292_s5 }
 0x339   : > { %p3797_p5 = scmp.lt.u32.totalorder %s3795_s13, %s3791_s16  ;;  %p3799_p11 = scmp.lt.u32.totalorder %s3791_s16, %s5239_s8 }
 0x33a   : > { %p3793_p6 = pnand %p3792_p13, %p5313_p0 }
 0x33b   : > { %p3798_p8 = por %p3797_p5, %p3796_p4 }
 0x33c   : > { %p3794_p10 = pneg %p3793_p6 }
 0x33d   : > { %p3800_p2 = por %p3799_p11, %p3798_p8 }
 0x33f   : > { %p3801_p3 = pnand %p3800_p2, %p3794_p10 }
 0x341   : > { %3804 = shalt.err (!%p3801_p3)
}
 0x342   : > { %s3855_s11 = smov 128   ;;  %s3856_s7 = smov 8  }
 0x343   : > { %3052 = dma.vmem_to_hbm [thread:$0]  (%p5313_p0), %s5241_s17, 8192, %s5239_s8, %s2435_s22, %s3855_s11, %s3855_s11, %s3856_s7  }
 0x344 PF: > { %s2463_s6 = sand.u32 1, %s3835_s18   ;;  %p5314_p7 = scmp.ne.s32.totalorder %s5297_s25, 0 }
 0x345   : > { %p5315_p9 = scmp.ge.s32.totalorder %s3847_s21, 2  ;;  %s2464_s12 = scalar_lea.sflag [#allocation4], %s2463_s6 }
 0x347   : > { %p3066_p12 = pnand %p5315_p9, %p5314_p7 }
 0x349   : > { %3830 = dma.done.wait (!%p3066_p12), %s2464_s12, 8192  }
 0x34a   : > { %3832 = vsyncadd (!%p3066_p12), %s2464_s12, 4294959104  ;;  %p19_p1 = scmp.ge.s32.totalorder %s4003_s29, 4   ;;  %s5316_s18 = smov %s3839_s19 }
 0x34b   : > { %s5317_s19 = smov %s3843_s20  ;;  %s5318_s20 = smov %s4019_s27 }
 0x34c   : > { %s5319_s21 = smov %s4003_s29  ;;  %21 = sbr.rel (!%p19_p1) target bundleno = 6 (0x6), region = 93 }
 0x353   :  { %2469 = vsyncpa [#allocation3], 1 }
 0x354   :  { %2471 = vsyncpa [#allocation3 + $0x1], 1 }
 0x355   :  { %2472 = vsyncpa [#allocation6], 1 }
 0x356   :  { %2473 = vsyncpa [#allocation4], 1 }
 0x357   :  { %2475 = vsyncpa [#allocation4 + $0x1], 1 }

</bundles_post_ra>
